<compile_context>
chip_gen: v7x
topology: tpu7x:2x2x1
jax: 0.10.0
libtpu: 0.0.40
codegen_flags: <defaults>
</compile_context>

<pallas_src>
import jax
import jax.numpy as jnp
from jax.experimental import pallas as pl
from jax.experimental.pallas import tpu as pltpu

ND = 512          # hidden width from the module
LN_EPS = 1e-5     # nn.LayerNorm default eps
NEG_SLOPE = 0.2   # LeakyReLU slope


def _layernorm(h, gamma, beta):
    # Single-pass stats: biased variance E[h^2] - E[h]^2 (matches nn.LayerNorm).
    mu = jnp.mean(h, axis=-1, keepdims=True)
    ms = jnp.mean(h * h, axis=-1, keepdims=True)
    var = ms - mu * mu
    return (h - mu) * jax.lax.rsqrt(var + LN_EPS) * gamma + beta


def _leaky_relu(h):
    # slope < 1  =>  leaky_relu(h) == max(h, slope * h)  (one VALU op)
    return jnp.maximum(h, NEG_SLOPE * h)


def length_estimator_kernel(
    x_ref,
    w1_ref, b1_ref, g1_ref, be1_ref,
    w2_ref, b2_ref, g2_ref, be2_ref,
    w3_ref, b3_ref, g3_ref, be3_ref,
    w4_ref, b4_ref,
    o_ref,
):
    # x_ref is already bf16 and lane-padded by the wrapper.
    # Block 1: Linear -> LayerNorm -> LeakyReLU (Dropout = identity at eval);
    # bf16 MXU operands, f32 accumulation, f32 LN/LeakyReLU, bf16 materialized.
    h = jnp.dot(x_ref[...], w1_ref[...],
                preferred_element_type=jnp.float32) + b1_ref[...]
    h = _leaky_relu(_layernorm(h, g1_ref[...], be1_ref[...])).astype(jnp.bfloat16)

    # Block 2
    h = jnp.dot(h, w2_ref[...],
                preferred_element_type=jnp.float32) + b2_ref[...]
    h = _leaky_relu(_layernorm(h, g2_ref[...], be2_ref[...])).astype(jnp.bfloat16)

    # Block 3
    h = jnp.dot(h, w3_ref[...],
                preferred_element_type=jnp.float32) + b3_ref[...]
    h = _leaky_relu(_layernorm(h, g3_ref[...], be3_ref[...])).astype(jnp.bfloat16)

    # Output projection (out dim pre-padded to a multiple of 128 lanes);
    # store bf16 to halve the padded-output HBM writeback.
    out = jnp.dot(h, w4_ref[...],
                  preferred_element_type=jnp.float32) + b4_ref[...]
    o_ref[...] = out.astype(o_ref.dtype)


def _round_up(n, m):
    return -(-n // m) * m


def _vmem_footprint_bytes(block_b, in_pad, out_pad):
    """Rough per-step VMEM model: f32+bf16 intermediates of the 4-layer chain,
    double-buffered bf16 input/output tiles, one (worst case two) copies of the
    bf16 weights, and the small f32 bias/LN params."""
    act = block_b * (ND + ND // 2 + ND // 4) * (4 + 2)
    io = 2 * block_b * in_pad * 2 + 2 * block_b * out_pad * 2
    w = (in_pad * ND + ND * (ND // 2) + (ND // 2) * (ND // 4)
         + (ND // 4) * out_pad) * 2 * 2
    small = (ND + ND // 2 + ND // 4 + out_pad) * 4 * 8
    return act + io + w + small


def _pick_block_b(B, in_pad, out_pad, vmem_budget=12 << 20, granule=16):
    """Batch tile: multiple of 16 sublanes (bf16 packing); >=2 grid steps when
    the batch allows (v7x megacore); <=512 rows (tiled throughput saturates by
    512 and smaller tiles keep live intermediates down); largest candidate
    that fits the VMEM budget (keeps v5e's 16 MiB scoped default safe)."""
    Bg = _round_up(B, granule)
    if Bg <= granule:
        return granule
    half = _round_up((Bg + 1) // 2, granule)          # >= 2 grid steps
    cands = [c for c in (512, 256, 128, 64, 32, 16) if c <= half] or [granule]
    for bb in cands:
        if _vmem_footprint_bytes(bb, in_pad, out_pad) <= vmem_budget:
            return bb
    return cands[-1]


def length_estimator_forward(x, params, *, block_b=None):
    """x: (B, input_size) f32. Returns (B, output_size) in x.dtype."""
    orig_dtype = x.dtype
    B, in_size = x.shape
    out_size = params["w4"].shape[1]

    in_pad = _round_up(in_size, 128)
    out_pad = _round_up(out_size, 128)

    if block_b is None:
        block_b = _pick_block_b(B, in_pad, out_pad)

    # Ragged batch: zero-pad to a multiple of the batch tile, slice afterwards.
    Bp = _round_up(B, block_b)

    # bf16, lane-padded input: halves input DMA bytes and makes the x loads
    # lane-dense/unmasked; the zero columns meet zero rows in w1 (no-op).
    xb = x.astype(jnp.bfloat16)
    if Bp != B or in_pad != in_size:
        xb = jnp.pad(xb, ((0, Bp - B), (0, in_pad - in_size)))

    w1 = params["w1"]
    if in_pad != in_size:
        w1 = jnp.pad(w1, ((0, in_pad - in_size), (0, 0)))

    # Lane-dense output: pad output features to a multiple of 128 so the final
    # store is a full-lane vst; padded columns are zero and sliced off below.
    w4, b4 = params["w4"], params["b4"]
    if out_pad != out_size:
        w4 = jnp.pad(w4, ((0, 0), (0, out_pad - out_size)))
        b4 = jnp.pad(b4, ((0, 0), (0, out_pad - out_size)))

    weight_args = [
        w1, params["b1"], params["g1"], params["be1"],
        params["w2"], params["b2"], params["g2"], params["be2"],
        params["w3"], params["b3"], params["g3"], params["be3"],
        w4, b4,
    ]

    footprint = _vmem_footprint_bytes(block_b, in_pad, out_pad)
    # Explicit scoped-VMEM request sized from the footprint (cap at v7x's 64 MiB).
    vmem_limit = int(min(64 << 20, max(16 << 20, 2 * footprint)))

    def build_call(single_buffer_weights):
        def full_spec(arr):
            nd = arr.ndim
            idx = lambda i, _nd=nd: (0,) * _nd   # constant -> DMA issued once
            if single_buffer_weights:
                # Grid-invariant operands: no benefit from double buffering.
                return pl.BlockSpec(arr.shape, idx, pipeline_mode=pl.Buffered(1))
            return pl.BlockSpec(arr.shape, idx)

        in_specs = [pl.BlockSpec((block_b, in_pad), lambda i: (i, 0))]
        in_specs += [full_spec(w) for w in weight_args]
        out_spec = pl.BlockSpec((block_b, out_pad), lambda i: (i, 0))

        return pl.pallas_call(
            length_estimator_kernel,
            out_shape=jax.ShapeDtypeStruct((Bp, out_pad), jnp.bfloat16),
            grid_spec=pltpu.PrefetchScalarGridSpec(
                num_scalar_prefetch=0,
                grid=(Bp // block_b,),
                in_specs=in_specs,
                out_specs=out_spec,
            ),
            compiler_params=pltpu.CompilerParams(
                dimension_semantics=("parallel",),
                vmem_limit_bytes=vmem_limit,
            ),
        )

    try:
        out = build_call(True)(xb, *weight_args)
    except Exception:
        # Fallback if this jax version rejects pl.Buffered(1) on weight specs.
        out = build_call(False)(xb, *weight_args)

    return out[:B, :out_size].astype(orig_dtype)


def init_params(key, input_size, output_size):
    """Mirror of LengthEstimator.__init_weights: Linear W ~ N(0, 0.02), b = 0,
    LayerNorm weight = 1, bias = 0. Linear weights stored as (in, out) bf16
    (MXU operands); biases / LayerNorm params stay f32."""
    ks = jax.random.split(key, 4)
    dims = [(input_size, ND), (ND, ND // 2), (ND // 2, ND // 4), (ND // 4, output_size)]
    p = {}
    for idx, (k, (din, dout)) in enumerate(zip(ks, dims), start=1):
        w = 0.02 * jax.random.normal(k, (din, dout), jnp.float32)
        p[f"w{idx}"] = w.astype(jnp.bfloat16)
        p[f"b{idx}"] = jnp.zeros((1, dout), jnp.float32)
    for idx, d in zip((1, 2, 3), (ND, ND // 2, ND // 4)):
        p[f"g{idx}"] = jnp.ones((1, d), jnp.float32)
        p[f"be{idx}"] = jnp.zeros((1, d), jnp.float32)
    return p


def reference_forward(x, p):
    """Pure-JAX reference with the same numerics / cast points as the kernel
    (bf16 MXU operands, f32 accumulation, bf16 inter-layer activations,
    bf16 output)."""
    def lin(h, w, b):
        return jnp.dot(h, w, preferred_element_type=jnp.float32) + b

    h = x.astype(jnp.bfloat16)
    h = _leaky_relu(_layernorm(lin(h, p["w1"], p["b1"]), p["g1"], p["be1"])).astype(jnp.bfloat16)
    h = _leaky_relu(_layernorm(lin(h, p["w2"], p["b2"]), p["g2"], p["be2"])).astype(jnp.bfloat16)
    h = _leaky_relu(_layernorm(lin(h, p["w3"], p["b3"]), p["g3"], p["be3"])).astype(jnp.bfloat16)
    out = lin(h, p["w4"], p["b4"]).astype(jnp.bfloat16)
    return out.astype(x.dtype)


if __name__ == "__main__":
    key = jax.random.PRNGKey(0)
    k_param, k_x = jax.random.split(key)

    input_size = 32
    output_size = 16
    batch = 32          # 2 batch tiles of 16 rows -> 2 grid steps

    params = init_params(k_param, input_size, output_size)
    x = jax.random.normal(k_x, (batch, input_size), jnp.float32)

    out = length_estimator_forward(x, params)
    out = jax.block_until_ready(out)

    ref = reference_forward(x, params)
    assert out.shape == (batch, output_size)
    # Kernel and reference quantize at the same points (bf16); residual
    # differences are a few bf16 ulps from reduction-order effects.
    assert jnp.allclose(out, ref, atol=1e-2, rtol=1e-2), "mismatch vs JAX reference"

    print("KERNEL_OK")
</pallas_src>

<mosaic_0001>
module attributes {stable_mosaic.version = 11 : i64} {
  func.func @length_estimator_kernel(%arg0: i32, %arg1: memref<16x128xbf16, #tpu.memory_space<vmem>>, %arg2: memref<128x512xbf16, #tpu.memory_space<vmem>>, %arg3: memref<1x512xf32, #tpu.memory_space<vmem>>, %arg4: memref<1x512xf32, #tpu.memory_space<vmem>>, %arg5: memref<1x512xf32, #tpu.memory_space<vmem>>, %arg6: memref<512x256xbf16, #tpu.memory_space<vmem>>, %arg7: memref<1x256xf32, #tpu.memory_space<vmem>>, %arg8: memref<1x256xf32, #tpu.memory_space<vmem>>, %arg9: memref<1x256xf32, #tpu.memory_space<vmem>>, %arg10: memref<256x128xbf16, #tpu.memory_space<vmem>>, %arg11: memref<1x128xf32, #tpu.memory_space<vmem>>, %arg12: memref<1x128xf32, #tpu.memory_space<vmem>>, %arg13: memref<1x128xf32, #tpu.memory_space<vmem>>, %arg14: memref<128x128xbf16, #tpu.memory_space<vmem>>, %arg15: memref<1x128xf32, #tpu.memory_space<vmem>>, %arg16: memref<16x128xbf16, #tpu.memory_space<vmem>>) attributes {dimension_semantics = [#tpu.dimension_semantics<parallel>], iteration_bounds = array<i64: 2>, scalar_prefetch = 0 : i64, scratch_operands = 0 : i64, tpu.core_type = #tpu.core_type<tc>, window_params = [{transform_indices = @transform_0, window_bounds = array<i64: 16, 128>}, {pipeline_mode = #tpu.pipeline_mode<synchronous>, transform_indices = @transform_1, window_bounds = array<i64: 128, 512>}, {pipeline_mode = #tpu.pipeline_mode<synchronous>, transform_indices = @transform_2, window_bounds = array<i64: 1, 512>}, {pipeline_mode = #tpu.pipeline_mode<synchronous>, transform_indices = @transform_3, window_bounds = array<i64: 1, 512>}, {pipeline_mode = #tpu.pipeline_mode<synchronous>, transform_indices = @transform_4, window_bounds = array<i64: 1, 512>}, {pipeline_mode = #tpu.pipeline_mode<synchronous>, transform_indices = @transform_5, window_bounds = array<i64: 512, 256>}, {pipeline_mode = #tpu.pipeline_mode<synchronous>, transform_indices = @transform_6, window_bounds = array<i64: 1, 256>}, {pipeline_mode = #tpu.pipeline_mode<synchronous>, transform_indices = @transform_7, window_bounds = array<i64: 1, 256>}, {pipeline_mode = #tpu.pipeline_mode<synchronous>, transform_indices = @transform_8, window_bounds = array<i64: 1, 256>}, {pipeline_mode = #tpu.pipeline_mode<synchronous>, transform_indices = @transform_9, window_bounds = array<i64: 256, 128>}, {pipeline_mode = #tpu.pipeline_mode<synchronous>, transform_indices = @transform_10, window_bounds = array<i64: 1, 128>}, {pipeline_mode = #tpu.pipeline_mode<synchronous>, transform_indices = @transform_11, window_bounds = array<i64: 1, 128>}, {pipeline_mode = #tpu.pipeline_mode<synchronous>, transform_indices = @transform_12, window_bounds = array<i64: 1, 128>}, {pipeline_mode = #tpu.pipeline_mode<synchronous>, transform_indices = @transform_13, window_bounds = array<i64: 128, 128>}, {pipeline_mode = #tpu.pipeline_mode<synchronous>, transform_indices = @transform_14, window_bounds = array<i64: 1, 128>}, {transform_indices = @transform_15, window_bounds = array<i64: 16, 128>}]} {
    %c0 = arith.constant 0 : index
    %c0_0 = arith.constant 0 : index
    %0 = vector.load %arg1[%c0, %c0_0] : memref<16x128xbf16, #tpu.memory_space<vmem>>, vector<16x128xbf16>
    %c0_1 = arith.constant 0 : index
    %c0_2 = arith.constant 0 : index
    %1 = vector.load %arg2[%c0_1, %c0_2] : memref<128x512xbf16, #tpu.memory_space<vmem>>, vector<128x512xbf16>
    %cst = arith.constant dense<0.000000e+00> : vector<16x512xf32>
    %2 = tpu.matmul %0, %1, %cst {dimension_numbers = #tpu.dot_dimension_numbers<[1], [0], [0], [1], [0, 0, 1, 1], [], []>} : vector<16x128xbf16>, vector<128x512xbf16>, vector<16x512xf32> -> vector<16x512xf32>
    %c0_3 = arith.constant 0 : index
    %c0_4 = arith.constant 0 : index
    %3 = vector.load %arg3[%c0_3, %c0_4] : memref<1x512xf32, #tpu.memory_space<vmem>>, vector<1x512xf32>
    %4 = vector.broadcast %3 : vector<1x512xf32> to vector<16x512xf32>
    %5 = arith.addf %2, %4 : vector<16x512xf32>
    %c0_5 = arith.constant 0 : index
    %c0_6 = arith.constant 0 : index
    %6 = vector.load %arg4[%c0_5, %c0_6] : memref<1x512xf32, #tpu.memory_space<vmem>>, vector<1x512xf32>
    %c0_7 = arith.constant 0 : index
    %c0_8 = arith.constant 0 : index
    %7 = vector.load %arg5[%c0_7, %c0_8] : memref<1x512xf32, #tpu.memory_space<vmem>>, vector<1x512xf32>
    %cst_9 = arith.constant dense<0.000000e+00> : vector<16xf32>
    %8 = vector.multi_reduction <add>, %5, %cst_9 [1] : vector<16x512xf32> to vector<16xf32>
    %9 = vector.shape_cast %8 : vector<16xf32> to vector<16x1xf32>
    %cst_10 = arith.constant 5.120000e+02 : f32
    %10 = vector.broadcast %cst_10 : f32 to vector<16x1xf32>
    %11 = arith.divf %9, %10 : vector<16x1xf32>
    %12 = arith.mulf %5, %5 : vector<16x512xf32>
    %cst_11 = arith.constant dense<0.000000e+00> : vector<16xf32>
    %13 = vector.multi_reduction <add>, %12, %cst_11 [1] : vector<16x512xf32> to vector<16xf32>
    %14 = vector.shape_cast %13 : vector<16xf32> to vector<16x1xf32>
    %cst_12 = arith.constant 5.120000e+02 : f32
    %15 = vector.broadcast %cst_12 : f32 to vector<16x1xf32>
    %16 = arith.divf %14, %15 : vector<16x1xf32>
    %17 = arith.mulf %11, %11 : vector<16x1xf32>
    %18 = arith.subf %16, %17 : vector<16x1xf32>
    %19 = vector.broadcast %11 : vector<16x1xf32> to vector<16x512xf32>
    %20 = arith.subf %5, %19 : vector<16x512xf32>
    %cst_13 = arith.constant 9.99999974E-6 : f32
    %21 = vector.broadcast %cst_13 : f32 to vector<16x1xf32>
    %22 = arith.addf %18, %21 : vector<16x1xf32>
    %23 = math.rsqrt %22 : vector<16x1xf32>
    %24 = vector.broadcast %23 : vector<16x1xf32> to vector<16x512xf32>
    %25 = arith.mulf %20, %24 : vector<16x512xf32>
    %26 = vector.broadcast %6 : vector<1x512xf32> to vector<16x512xf32>
    %27 = arith.mulf %25, %26 : vector<16x512xf32>
    %28 = vector.broadcast %7 : vector<1x512xf32> to vector<16x512xf32>
    %29 = arith.addf %27, %28 : vector<16x512xf32>
    %cst_14 = arith.constant 2.000000e-01 : f32
    %30 = vector.broadcast %cst_14 : f32 to vector<16x512xf32>
    %31 = arith.mulf %30, %29 : vector<16x512xf32>
    %32 = arith.maximumf %29, %31 : vector<16x512xf32>
    %33 = arith.truncf %32 : vector<16x512xf32> to vector<16x512xbf16>
    %c0_15 = arith.constant 0 : index
    %c0_16 = arith.constant 0 : index
    %34 = vector.load %arg6[%c0_15, %c0_16] : memref<512x256xbf16, #tpu.memory_space<vmem>>, vector<512x256xbf16>
    %cst_17 = arith.constant dense<0.000000e+00> : vector<16x256xf32>
    %35 = tpu.matmul %33, %34, %cst_17 {dimension_numbers = #tpu.dot_dimension_numbers<[1], [0], [0], [1], [0, 0, 1, 1], [], []>} : vector<16x512xbf16>, vector<512x256xbf16>, vector<16x256xf32> -> vector<16x256xf32>
    %c0_18 = arith.constant 0 : index
    %c0_19 = arith.constant 0 : index
    %36 = vector.load %arg7[%c0_18, %c0_19] : memref<1x256xf32, #tpu.memory_space<vmem>>, vector<1x256xf32>
    %37 = vector.broadcast %36 : vector<1x256xf32> to vector<16x256xf32>
    %38 = arith.addf %35, %37 : vector<16x256xf32>
    %c0_20 = arith.constant 0 : index
    %c0_21 = arith.constant 0 : index
    %39 = vector.load %arg8[%c0_20, %c0_21] : memref<1x256xf32, #tpu.memory_space<vmem>>, vector<1x256xf32>
    %c0_22 = arith.constant 0 : index
    %c0_23 = arith.constant 0 : index
    %40 = vector.load %arg9[%c0_22, %c0_23] : memref<1x256xf32, #tpu.memory_space<vmem>>, vector<1x256xf32>
    %cst_24 = arith.constant dense<0.000000e+00> : vector<16xf32>
    %41 = vector.multi_reduction <add>, %38, %cst_24 [1] : vector<16x256xf32> to vector<16xf32>
    %42 = vector.shape_cast %41 : vector<16xf32> to vector<16x1xf32>
    %cst_25 = arith.constant 2.560000e+02 : f32
    %43 = vector.broadcast %cst_25 : f32 to vector<16x1xf32>
    %44 = arith.divf %42, %43 : vector<16x1xf32>
    %45 = arith.mulf %38, %38 : vector<16x256xf32>
    %cst_26 = arith.constant dense<0.000000e+00> : vector<16xf32>
    %46 = vector.multi_reduction <add>, %45, %cst_26 [1] : vector<16x256xf32> to vector<16xf32>
    %47 = vector.shape_cast %46 : vector<16xf32> to vector<16x1xf32>
    %cst_27 = arith.constant 2.560000e+02 : f32
    %48 = vector.broadcast %cst_27 : f32 to vector<16x1xf32>
    %49 = arith.divf %47, %48 : vector<16x1xf32>
    %50 = arith.mulf %44, %44 : vector<16x1xf32>
    %51 = arith.subf %49, %50 : vector<16x1xf32>
    %52 = vector.broadcast %44 : vector<16x1xf32> to vector<16x256xf32>
    %53 = arith.subf %38, %52 : vector<16x256xf32>
    %cst_28 = arith.constant 9.99999974E-6 : f32
    %54 = vector.broadcast %cst_28 : f32 to vector<16x1xf32>
    %55 = arith.addf %51, %54 : vector<16x1xf32>
    %56 = math.rsqrt %55 : vector<16x1xf32>
    %57 = vector.broadcast %56 : vector<16x1xf32> to vector<16x256xf32>
    %58 = arith.mulf %53, %57 : vector<16x256xf32>
    %59 = vector.broadcast %39 : vector<1x256xf32> to vector<16x256xf32>
    %60 = arith.mulf %58, %59 : vector<16x256xf32>
    %61 = vector.broadcast %40 : vector<1x256xf32> to vector<16x256xf32>
    %62 = arith.addf %60, %61 : vector<16x256xf32>
    %cst_29 = arith.constant 2.000000e-01 : f32
    %63 = vector.broadcast %cst_29 : f32 to vector<16x256xf32>
    %64 = arith.mulf %63, %62 : vector<16x256xf32>
    %65 = arith.maximumf %62, %64 : vector<16x256xf32>
    %66 = arith.truncf %65 : vector<16x256xf32> to vector<16x256xbf16>
    %c0_30 = arith.constant 0 : index
    %c0_31 = arith.constant 0 : index
    %67 = vector.load %arg10[%c0_30, %c0_31] : memref<256x128xbf16, #tpu.memory_space<vmem>>, vector<256x128xbf16>
    %cst_32 = arith.constant dense<0.000000e+00> : vector<16x128xf32>
    %68 = tpu.matmul %66, %67, %cst_32 {dimension_numbers = #tpu.dot_dimension_numbers<[1], [0], [0], [1], [0, 0, 1, 1], [], []>} : vector<16x256xbf16>, vector<256x128xbf16>, vector<16x128xf32> -> vector<16x128xf32>
    %c0_33 = arith.constant 0 : index
    %c0_34 = arith.constant 0 : index
    %69 = vector.load %arg11[%c0_33, %c0_34] : memref<1x128xf32, #tpu.memory_space<vmem>>, vector<1x128xf32>
    %70 = vector.broadcast %69 : vector<1x128xf32> to vector<16x128xf32>
    %71 = arith.addf %68, %70 : vector<16x128xf32>
    %c0_35 = arith.constant 0 : index
    %c0_36 = arith.constant 0 : index
    %72 = vector.load %arg12[%c0_35, %c0_36] : memref<1x128xf32, #tpu.memory_space<vmem>>, vector<1x128xf32>
    %c0_37 = arith.constant 0 : index
    %c0_38 = arith.constant 0 : index
    %73 = vector.load %arg13[%c0_37, %c0_38] : memref<1x128xf32, #tpu.memory_space<vmem>>, vector<1x128xf32>
    %cst_39 = arith.constant dense<0.000000e+00> : vector<16xf32>
    %74 = vector.multi_reduction <add>, %71, %cst_39 [1] : vector<16x128xf32> to vector<16xf32>
    %75 = vector.shape_cast %74 : vector<16xf32> to vector<16x1xf32>
    %cst_40 = arith.constant 1.280000e+02 : f32
    %76 = vector.broadcast %cst_40 : f32 to vector<16x1xf32>
    %77 = arith.divf %75, %76 : vector<16x1xf32>
    %78 = arith.mulf %71, %71 : vector<16x128xf32>
    %cst_41 = arith.constant dense<0.000000e+00> : vector<16xf32>
    %79 = vector.multi_reduction <add>, %78, %cst_41 [1] : vector<16x128xf32> to vector<16xf32>
    %80 = vector.shape_cast %79 : vector<16xf32> to vector<16x1xf32>
    %cst_42 = arith.constant 1.280000e+02 : f32
    %81 = vector.broadcast %cst_42 : f32 to vector<16x1xf32>
    %82 = arith.divf %80, %81 : vector<16x1xf32>
    %83 = arith.mulf %77, %77 : vector<16x1xf32>
    %84 = arith.subf %82, %83 : vector<16x1xf32>
    %85 = vector.broadcast %77 : vector<16x1xf32> to vector<16x128xf32>
    %86 = arith.subf %71, %85 : vector<16x128xf32>
    %cst_43 = arith.constant 9.99999974E-6 : f32
    %87 = vector.broadcast %cst_43 : f32 to vector<16x1xf32>
    %88 = arith.addf %84, %87 : vector<16x1xf32>
    %89 = math.rsqrt %88 : vector<16x1xf32>
    %90 = vector.broadcast %89 : vector<16x1xf32> to vector<16x128xf32>
    %91 = arith.mulf %86, %90 : vector<16x128xf32>
    %92 = vector.broadcast %72 : vector<1x128xf32> to vector<16x128xf32>
    %93 = arith.mulf %91, %92 : vector<16x128xf32>
    %94 = vector.broadcast %73 : vector<1x128xf32> to vector<16x128xf32>
    %95 = arith.addf %93, %94 : vector<16x128xf32>
    %cst_44 = arith.constant 2.000000e-01 : f32
    %96 = vector.broadcast %cst_44 : f32 to vector<16x128xf32>
    %97 = arith.mulf %96, %95 : vector<16x128xf32>
    %98 = arith.maximumf %95, %97 : vector<16x128xf32>
    %99 = arith.truncf %98 : vector<16x128xf32> to vector<16x128xbf16>
    %c0_45 = arith.constant 0 : index
    %c0_46 = arith.constant 0 : index
    %100 = vector.load %arg14[%c0_45, %c0_46] : memref<128x128xbf16, #tpu.memory_space<vmem>>, vector<128x128xbf16>
    %cst_47 = arith.constant dense<0.000000e+00> : vector<16x128xf32>
    %101 = tpu.matmul %99, %100, %cst_47 {dimension_numbers = #tpu.dot_dimension_numbers<[1], [0], [0], [1], [0, 0, 1, 1], [], []>} : vector<16x128xbf16>, vector<128x128xbf16>, vector<16x128xf32> -> vector<16x128xf32>
    %c0_48 = arith.constant 0 : index
    %c0_49 = arith.constant 0 : index
    %102 = vector.load %arg15[%c0_48, %c0_49] : memref<1x128xf32, #tpu.memory_space<vmem>>, vector<1x128xf32>
    %103 = vector.broadcast %102 : vector<1x128xf32> to vector<16x128xf32>
    %104 = arith.addf %101, %103 : vector<16x128xf32>
    %105 = arith.truncf %104 : vector<16x128xf32> to vector<16x128xbf16>
    %c0_50 = arith.constant 0 : index
    %c0_51 = arith.constant 0 : index
    %106 = vector.load %arg16[%c0_50, %c0_51] : memref<16x128xbf16, #tpu.memory_space<vmem>>, vector<16x128xbf16>
    tpu.vector_store %arg16[%c0_50, %c0_51], %105 {strides = array<i32>} : memref<16x128xbf16, #tpu.memory_space<vmem>>, vector<16x128xbf16>,
    return
  }
  func.func @transform_0(%arg0: i32) -> (i32, i32) {
    %c0_i32 = arith.constant 0 : i32
    %c0_i32_0 = arith.constant 0 : i32
    return %arg0, %c0_i32 : i32, i32
  }
  func.func @transform_1(%arg0: i32) -> (i32, i32) {
    %c0_i32 = arith.constant 0 : i32
    %c0_i32_0 = arith.constant 0 : i32
    %c0_i32_1 = arith.constant 0 : i32
    return %c0_i32, %c0_i32_0 : i32, i32
  }
  func.func @transform_2(%arg0: i32) -> (i32, i32) {
    %c0_i32 = arith.constant 0 : i32
    %c0_i32_0 = arith.constant 0 : i32
    %c0_i32_1 = arith.constant 0 : i32
    return %c0_i32, %c0_i32_0 : i32, i32
  }
  func.func @transform_3(%arg0: i32) -> (i32, i32) {
    %c0_i32 = arith.constant 0 : i32
    %c0_i32_0 = arith.constant 0 : i32
    %c0_i32_1 = arith.constant 0 : i32
    return %c0_i32, %c0_i32_0 : i32, i32
  }
  func.func @transform_4(%arg0: i32) -> (i32, i32) {
    %c0_i32 = arith.constant 0 : i32
    %c0_i32_0 = arith.constant 0 : i32
    %c0_i32_1 = arith.constant 0 : i32
    return %c0_i32, %c0_i32_0 : i32, i32
  }
  func.func @transform_5(%arg0: i32) -> (i32, i32) {
    %c0_i32 = arith.constant 0 : i32
    %c0_i32_0 = arith.constant 0 : i32
    %c0_i32_1 = arith.constant 0 : i32
    return %c0_i32, %c0_i32_0 : i32, i32
  }
  func.func @transform_6(%arg0: i32) -> (i32, i32) {
    %c0_i32 = arith.constant 0 : i32
    %c0_i32_0 = arith.constant 0 : i32
    %c0_i32_1 = arith.constant 0 : i32
    return %c0_i32, %c0_i32_0 : i32, i32
  }
  func.func @transform_7(%arg0: i32) -> (i32, i32) {
    %c0_i32 = arith.constant 0 : i32
    %c0_i32_0 = arith.constant 0 : i32
    %c0_i32_1 = arith.constant 0 : i32
    return %c0_i32, %c0_i32_0 : i32, i32
  }
  func.func @transform_8(%arg0: i32) -> (i32, i32) {
    %c0_i32 = arith.constant 0 : i32
    %c0_i32_0 = arith.constant 0 : i32
    %c0_i32_1 = arith.constant 0 : i32
    return %c0_i32, %c0_i32_0 : i32, i32
  }
  func.func @transform_9(%arg0: i32) -> (i32, i32) {
    %c0_i32 = arith.constant 0 : i32
    %c0_i32_0 = arith.constant 0 : i32
    %c0_i32_1 = arith.constant 0 : i32
    return %c0_i32, %c0_i32_0 : i32, i32
  }
  func.func @transform_10(%arg0: i32) -> (i32, i32) {
    %c0_i32 = arith.constant 0 : i32
    %c0_i32_0 = arith.constant 0 : i32
    %c0_i32_1 = arith.constant 0 : i32
    return %c0_i32, %c0_i32_0 : i32, i32
  }
  func.func @transform_11(%arg0: i32) -> (i32, i32) {
    %c0_i32 = arith.constant 0 : i32
    %c0_i32_0 = arith.constant 0 : i32
    %c0_i32_1 = arith.constant 0 : i32
    return %c0_i32, %c0_i32_0 : i32, i32
  }
  func.func @transform_12(%arg0: i32) -> (i32, i32) {
    %c0_i32 = arith.constant 0 : i32
    %c0_i32_0 = arith.constant 0 : i32
    %c0_i32_1 = arith.constant 0 : i32
    return %c0_i32, %c0_i32_0 : i32, i32
  }
  func.func @transform_13(%arg0: i32) -> (i32, i32) {
    %c0_i32 = arith.constant 0 : i32
    %c0_i32_0 = arith.constant 0 : i32
    %c0_i32_1 = arith.constant 0 : i32
    return %c0_i32, %c0_i32_0 : i32, i32
  }
  func.func @transform_14(%arg0: i32) -> (i32, i32) {
    %c0_i32 = arith.constant 0 : i32
    %c0_i32_0 = arith.constant 0 : i32
    %c0_i32_1 = arith.constant 0 : i32
    return %c0_i32, %c0_i32_0 : i32, i32
  }
  func.func @transform_15(%arg0: i32) -> (i32, i32) {
    %c0_i32 = arith.constant 0 : i32
    %c0_i32_0 = arith.constant 0 : i32
    return %arg0, %c0_i32 : i32, i32
  }
}

module attributes {stable_mosaic.version = 11 : i64} {
  func.func @length_estimator_kernel(%arg0: i32, %arg1: memref<16x128xbf16, #tpu.memory_space<vmem>>, %arg2: memref<128x512xbf16, #tpu.memory_space<vmem>>, %arg3: memref<1x512xf32, #tpu.memory_space<vmem>>, %arg4: memref<1x512xf32, #tpu.memory_space<vmem>>, %arg5: memref<1x512xf32, #tpu.memory_space<vmem>>, %arg6: memref<512x256xbf16, #tpu.memory_space<vmem>>, %arg7: memref<1x256xf32, #tpu.memory_space<vmem>>, %arg8: memref<1x256xf32, #tpu.memory_space<vmem>>, %arg9: memref<1x256xf32, #tpu.memory_space<vmem>>, %arg10: memref<256x128xbf16, #tpu.memory_space<vmem>>, %arg11: memref<1x128xf32, #tpu.memory_space<vmem>>, %arg12: memref<1x128xf32, #tpu.memory_space<vmem>>, %arg13: memref<1x128xf32, #tpu.memory_space<vmem>>, %arg14: memref<128x128xbf16, #tpu.memory_space<vmem>>, %arg15: memref<1x128xf32, #tpu.memory_space<vmem>>, %arg16: memref<16x128xbf16, #tpu.memory_space<vmem>>) attributes {dimension_semantics = [#tpu.dimension_semantics<parallel>], iteration_bounds = array<i64: 2>, scalar_prefetch = 0 : i64, scratch_operands = 0 : i64, tpu.core_type = #tpu.core_type<tc>, window_params = [{transform_indices = @transform_0, window_bounds = array<i64: 16, 128>}, {pipeline_mode = #tpu.pipeline_mode<synchronous>, transform_indices = @transform_1, window_bounds = array<i64: 128, 512>}, {pipeline_mode = #tpu.pipeline_mode<synchronous>, transform_indices = @transform_2, window_bounds = array<i64: 1, 512>}, {pipeline_mode = #tpu.pipeline_mode<synchronous>, transform_indices = @transform_3, window_bounds = array<i64: 1, 512>}, {pipeline_mode = #tpu.pipeline_mode<synchronous>, transform_indices = @transform_4, window_bounds = array<i64: 1, 512>}, {pipeline_mode = #tpu.pipeline_mode<synchronous>, transform_indices = @transform_5, window_bounds = array<i64: 512, 256>}, {pipeline_mode = #tpu.pipeline_mode<synchronous>, transform_indices = @transform_6, window_bounds = array<i64: 1, 256>}, {pipeline_mode = #tpu.pipeline_mode<synchronous>, transform_indices = @transform_7, window_bounds = array<i64: 1, 256>}, {pipeline_mode = #tpu.pipeline_mode<synchronous>, transform_indices = @transform_8, window_bounds = array<i64: 1, 256>}, {pipeline_mode = #tpu.pipeline_mode<synchronous>, transform_indices = @transform_9, window_bounds = array<i64: 256, 128>}, {pipeline_mode = #tpu.pipeline_mode<synchronous>, transform_indices = @transform_10, window_bounds = array<i64: 1, 128>}, {pipeline_mode = #tpu.pipeline_mode<synchronous>, transform_indices = @transform_11, window_bounds = array<i64: 1, 128>}, {pipeline_mode = #tpu.pipeline_mode<synchronous>, transform_indices = @transform_12, window_bounds = array<i64: 1, 128>}, {pipeline_mode = #tpu.pipeline_mode<synchronous>, transform_indices = @transform_13, window_bounds = array<i64: 128, 128>}, {pipeline_mode = #tpu.pipeline_mode<synchronous>, transform_indices = @transform_14, window_bounds = array<i64: 1, 128>}, {transform_indices = @transform_15, window_bounds = array<i64: 16, 128>}]} {
    %c0 = arith.constant 0 : index
    %c0_0 = arith.constant 0 : index
    %0 = vector.load %arg1[%c0, %c0_0] : memref<16x128xbf16, #tpu.memory_space<vmem>>, vector<16x128xbf16>
    %c0_1 = arith.constant 0 : index
    %c0_2 = arith.constant 0 : index
    %1 = vector.load %arg2[%c0_1, %c0_2] : memref<128x512xbf16, #tpu.memory_space<vmem>>, vector<128x512xbf16>
    %cst = arith.constant dense<0.000000e+00> : vector<16x512xf32>
    %2 = tpu.matmul %0, %1, %cst {dimension_numbers = #tpu.dot_dimension_numbers<[1], [0], [0], [1], [0, 0, 1, 1], [], []>} : vector<16x128xbf16>, vector<128x512xbf16>, vector<16x512xf32> -> vector<16x512xf32>
    %c0_3 = arith.constant 0 : index
    %c0_4 = arith.constant 0 : index
    %3 = vector.load %arg3[%c0_3, %c0_4] : memref<1x512xf32, #tpu.memory_space<vmem>>, vector<1x512xf32>
    %4 = vector.broadcast %3 : vector<1x512xf32> to vector<16x512xf32>
    %5 = arith.addf %2, %4 : vector<16x512xf32>
    %c0_5 = arith.constant 0 : index
    %c0_6 = arith.constant 0 : index
    %6 = vector.load %arg4[%c0_5, %c0_6] : memref<1x512xf32, #tpu.memory_space<vmem>>, vector<1x512xf32>
    %c0_7 = arith.constant 0 : index
    %c0_8 = arith.constant 0 : index
    %7 = vector.load %arg5[%c0_7, %c0_8] : memref<1x512xf32, #tpu.memory_space<vmem>>, vector<1x512xf32>
    %cst_9 = arith.constant dense<0.000000e+00> : vector<16xf32>
    %8 = vector.multi_reduction <add>, %5, %cst_9 [1] : vector<16x512xf32> to vector<16xf32>
    %9 = vector.shape_cast %8 : vector<16xf32> to vector<16x1xf32>
    %cst_10 = arith.constant 5.120000e+02 : f32
    %10 = vector.broadcast %cst_10 : f32 to vector<16x1xf32>
    %11 = arith.divf %9, %10 : vector<16x1xf32>
    %12 = arith.mulf %5, %5 : vector<16x512xf32>
    %cst_11 = arith.constant dense<0.000000e+00> : vector<16xf32>
    %13 = vector.multi_reduction <add>, %12, %cst_11 [1] : vector<16x512xf32> to vector<16xf32>
    %14 = vector.shape_cast %13 : vector<16xf32> to vector<16x1xf32>
    %cst_12 = arith.constant 5.120000e+02 : f32
    %15 = vector.broadcast %cst_12 : f32 to vector<16x1xf32>
    %16 = arith.divf %14, %15 : vector<16x1xf32>
    %17 = arith.mulf %11, %11 : vector<16x1xf32>
    %18 = arith.subf %16, %17 : vector<16x1xf32>
    %19 = vector.broadcast %11 : vector<16x1xf32> to vector<16x512xf32>
    %20 = arith.subf %5, %19 : vector<16x512xf32>
    %cst_13 = arith.constant 9.99999974E-6 : f32
    %21 = vector.broadcast %cst_13 : f32 to vector<16x1xf32>
    %22 = arith.addf %18, %21 : vector<16x1xf32>
    %23 = math.rsqrt %22 : vector<16x1xf32>
    %24 = vector.broadcast %23 : vector<16x1xf32> to vector<16x512xf32>
    %25 = arith.mulf %20, %24 : vector<16x512xf32>
    %26 = vector.broadcast %6 : vector<1x512xf32> to vector<16x512xf32>
    %27 = arith.mulf %25, %26 : vector<16x512xf32>
    %28 = vector.broadcast %7 : vector<1x512xf32> to vector<16x512xf32>
    %29 = arith.addf %27, %28 : vector<16x512xf32>
    %cst_14 = arith.constant 2.000000e-01 : f32
    %30 = vector.broadcast %cst_14 : f32 to vector<16x512xf32>
    %31 = arith.mulf %30, %29 : vector<16x512xf32>
    %32 = arith.maximumf %29, %31 : vector<16x512xf32>
    %33 = arith.truncf %32 : vector<16x512xf32> to vector<16x512xbf16>
    %c0_15 = arith.constant 0 : index
    %c0_16 = arith.constant 0 : index
    %34 = vector.load %arg6[%c0_15, %c0_16] : memref<512x256xbf16, #tpu.memory_space<vmem>>, vector<512x256xbf16>
    %cst_17 = arith.constant dense<0.000000e+00> : vector<16x256xf32>
    %35 = tpu.matmul %33, %34, %cst_17 {dimension_numbers = #tpu.dot_dimension_numbers<[1], [0], [0], [1], [0, 0, 1, 1], [], []>} : vector<16x512xbf16>, vector<512x256xbf16>, vector<16x256xf32> -> vector<16x256xf32>
    %c0_18 = arith.constant 0 : index
    %c0_19 = arith.constant 0 : index
    %36 = vector.load %arg7[%c0_18, %c0_19] : memref<1x256xf32, #tpu.memory_space<vmem>>, vector<1x256xf32>
    %37 = vector.broadcast %36 : vector<1x256xf32> to vector<16x256xf32>
    %38 = arith.addf %35, %37 : vector<16x256xf32>
    %c0_20 = arith.constant 0 : index
    %c0_21 = arith.constant 0 : index
    %39 = vector.load %arg8[%c0_20, %c0_21] : memref<1x256xf32, #tpu.memory_space<vmem>>, vector<1x256xf32>
    %c0_22 = arith.constant 0 : index
    %c0_23 = arith.constant 0 : index
    %40 = vector.load %arg9[%c0_22, %c0_23] : memref<1x256xf32, #tpu.memory_space<vmem>>, vector<1x256xf32>
    %cst_24 = arith.constant dense<0.000000e+00> : vector<16xf32>
    %41 = vector.multi_reduction <add>, %38, %cst_24 [1] : vector<16x256xf32> to vector<16xf32>
    %42 = vector.shape_cast %41 : vector<16xf32> to vector<16x1xf32>
    %cst_25 = arith.constant 2.560000e+02 : f32
    %43 = vector.broadcast %cst_25 : f32 to vector<16x1xf32>
    %44 = arith.divf %42, %43 : vector<16x1xf32>
    %45 = arith.mulf %38, %38 : vector<16x256xf32>
    %cst_26 = arith.constant dense<0.000000e+00> : vector<16xf32>
    %46 = vector.multi_reduction <add>, %45, %cst_26 [1] : vector<16x256xf32> to vector<16xf32>
    %47 = vector.shape_cast %46 : vector<16xf32> to vector<16x1xf32>
    %cst_27 = arith.constant 2.560000e+02 : f32
    %48 = vector.broadcast %cst_27 : f32 to vector<16x1xf32>
    %49 = arith.divf %47, %48 : vector<16x1xf32>
    %50 = arith.mulf %44, %44 : vector<16x1xf32>
    %51 = arith.subf %49, %50 : vector<16x1xf32>
    %52 = vector.broadcast %44 : vector<16x1xf32> to vector<16x256xf32>
    %53 = arith.subf %38, %52 : vector<16x256xf32>
    %cst_28 = arith.constant 9.99999974E-6 : f32
    %54 = vector.broadcast %cst_28 : f32 to vector<16x1xf32>
    %55 = arith.addf %51, %54 : vector<16x1xf32>
    %56 = math.rsqrt %55 : vector<16x1xf32>
    %57 = vector.broadcast %56 : vector<16x1xf32> to vector<16x256xf32>
    %58 = arith.mulf %53, %57 : vector<16x256xf32>
    %59 = vector.broadcast %39 : vector<1x256xf32> to vector<16x256xf32>
    %60 = arith.mulf %58, %59 : vector<16x256xf32>
    %61 = vector.broadcast %40 : vector<1x256xf32> to vector<16x256xf32>
    %62 = arith.addf %60, %61 : vector<16x256xf32>
    %cst_29 = arith.constant 2.000000e-01 : f32
    %63 = vector.broadcast %cst_29 : f32 to vector<16x256xf32>
    %64 = arith.mulf %63, %62 : vector<16x256xf32>
    %65 = arith.maximumf %62, %64 : vector<16x256xf32>
    %66 = arith.truncf %65 : vector<16x256xf32> to vector<16x256xbf16>
    %c0_30 = arith.constant 0 : index
    %c0_31 = arith.constant 0 : index
    %67 = vector.load %arg10[%c0_30, %c0_31] : memref<256x128xbf16, #tpu.memory_space<vmem>>, vector<256x128xbf16>
    %cst_32 = arith.constant dense<0.000000e+00> : vector<16x128xf32>
    %68 = tpu.matmul %66, %67, %cst_32 {dimension_numbers = #tpu.dot_dimension_numbers<[1], [0], [0], [1], [0, 0, 1, 1], [], []>} : vector<16x256xbf16>, vector<256x128xbf16>, vector<16x128xf32> -> vector<16x128xf32>
    %c0_33 = arith.constant 0 : index
    %c0_34 = arith.constant 0 : index
    %69 = vector.load %arg11[%c0_33, %c0_34] : memref<1x128xf32, #tpu.memory_space<vmem>>, vector<1x128xf32>
    %70 = vector.broadcast %69 : vector<1x128xf32> to vector<16x128xf32>
    %71 = arith.addf %68, %70 : vector<16x128xf32>
    %c0_35 = arith.constant 0 : index
    %c0_36 = arith.constant 0 : index
    %72 = vector.load %arg12[%c0_35, %c0_36] : memref<1x128xf32, #tpu.memory_space<vmem>>, vector<1x128xf32>
    %c0_37 = arith.constant 0 : index
    %c0_38 = arith.constant 0 : index
    %73 = vector.load %arg13[%c0_37, %c0_38] : memref<1x128xf32, #tpu.memory_space<vmem>>, vector<1x128xf32>
    %cst_39 = arith.constant dense<0.000000e+00> : vector<16xf32>
    %74 = vector.multi_reduction <add>, %71, %cst_39 [1] : vector<16x128xf32> to vector<16xf32>
    %75 = vector.shape_cast %74 : vector<16xf32> to vector<16x1xf32>
    %cst_40 = arith.constant 1.280000e+02 : f32
    %76 = vector.broadcast %cst_40 : f32 to vector<16x1xf32>
    %77 = arith.divf %75, %76 : vector<16x1xf32>
    %78 = arith.mulf %71, %71 : vector<16x128xf32>
    %cst_41 = arith.constant dense<0.000000e+00> : vector<16xf32>
    %79 = vector.multi_reduction <add>, %78, %cst_41 [1] : vector<16x128xf32> to vector<16xf32>
    %80 = vector.shape_cast %79 : vector<16xf32> to vector<16x1xf32>
    %cst_42 = arith.constant 1.280000e+02 : f32
    %81 = vector.broadcast %cst_42 : f32 to vector<16x1xf32>
    %82 = arith.divf %80, %81 : vector<16x1xf32>
    %83 = arith.mulf %77, %77 : vector<16x1xf32>
    %84 = arith.subf %82, %83 : vector<16x1xf32>
    %85 = vector.broadcast %77 : vector<16x1xf32> to vector<16x128xf32>
    %86 = arith.subf %71, %85 : vector<16x128xf32>
    %cst_43 = arith.constant 9.99999974E-6 : f32
    %87 = vector.broadcast %cst_43 : f32 to vector<16x1xf32>
    %88 = arith.addf %84, %87 : vector<16x1xf32>
    %89 = math.rsqrt %88 : vector<16x1xf32>
    %90 = vector.broadcast %89 : vector<16x1xf32> to vector<16x128xf32>
    %91 = arith.mulf %86, %90 : vector<16x128xf32>
    %92 = vector.broadcast %72 : vector<1x128xf32> to vector<16x128xf32>
    %93 = arith.mulf %91, %92 : vector<16x128xf32>
    %94 = vector.broadcast %73 : vector<1x128xf32> to vector<16x128xf32>
    %95 = arith.addf %93, %94 : vector<16x128xf32>
    %cst_44 = arith.constant 2.000000e-01 : f32
    %96 = vector.broadcast %cst_44 : f32 to vector<16x128xf32>
    %97 = arith.mulf %96, %95 : vector<16x128xf32>
    %98 = arith.maximumf %95, %97 : vector<16x128xf32>
    %99 = arith.truncf %98 : vector<16x128xf32> to vector<16x128xbf16>
    %c0_45 = arith.constant 0 : index
    %c0_46 = arith.constant 0 : index
    %100 = vector.load %arg14[%c0_45, %c0_46] : memref<128x128xbf16, #tpu.memory_space<vmem>>, vector<128x128xbf16>
    %cst_47 = arith.constant dense<0.000000e+00> : vector<16x128xf32>
    %101 = tpu.matmul %99, %100, %cst_47 {dimension_numbers = #tpu.dot_dimension_numbers<[1], [0], [0], [1], [0, 0, 1, 1], [], []>} : vector<16x128xbf16>, vector<128x128xbf16>, vector<16x128xf32> -> vector<16x128xf32>
    %c0_48 = arith.constant 0 : index
    %c0_49 = arith.constant 0 : index
    %102 = vector.load %arg15[%c0_48, %c0_49] : memref<1x128xf32, #tpu.memory_space<vmem>>, vector<1x128xf32>
    %103 = vector.broadcast %102 : vector<1x128xf32> to vector<16x128xf32>
    %104 = arith.addf %101, %103 : vector<16x128xf32>
    %105 = arith.truncf %104 : vector<16x128xf32> to vector<16x128xbf16>
    %c0_50 = arith.constant 0 : index
    %c0_51 = arith.constant 0 : index
    %106 = vector.load %arg16[%c0_50, %c0_51] : memref<16x128xbf16, #tpu.memory_space<vmem>>, vector<16x128xbf16>
    tpu.vector_store %arg16[%c0_50, %c0_51], %105 {strides = array<i32>} : memref<16x128xbf16, #tpu.memory_space<vmem>>, vector<16x128xbf16>,
    return
  }
  func.func @transform_0(%arg0: i32) -> (i32, i32) {
    %c0_i32 = arith.constant 0 : i32
    %c0_i32_0 = arith.constant 0 : i32
    return %arg0, %c0_i32 : i32, i32
  }
  func.func @transform_1(%arg0: i32) -> (i32, i32) {
    %c0_i32 = arith.constant 0 : i32
    %c0_i32_0 = arith.constant 0 : i32
    %c0_i32_1 = arith.constant 0 : i32
    return %c0_i32, %c0_i32_0 : i32, i32
  }
  func.func @transform_2(%arg0: i32) -> (i32, i32) {
    %c0_i32 = arith.constant 0 : i32
    %c0_i32_0 = arith.constant 0 : i32
    %c0_i32_1 = arith.constant 0 : i32
    return %c0_i32, %c0_i32_0 : i32, i32
  }
  func.func @transform_3(%arg0: i32) -> (i32, i32) {
    %c0_i32 = arith.constant 0 : i32
    %c0_i32_0 = arith.constant 0 : i32
    %c0_i32_1 = arith.constant 0 : i32
    return %c0_i32, %c0_i32_0 : i32, i32
  }
  func.func @transform_4(%arg0: i32) -> (i32, i32) {
    %c0_i32 = arith.constant 0 : i32
    %c0_i32_0 = arith.constant 0 : i32
    %c0_i32_1 = arith.constant 0 : i32
    return %c0_i32, %c0_i32_0 : i32, i32
  }
  func.func @transform_5(%arg0: i32) -> (i32, i32) {
    %c0_i32 = arith.constant 0 : i32
    %c0_i32_0 = arith.constant 0 : i32
    %c0_i32_1 = arith.constant 0 : i32
    return %c0_i32, %c0_i32_0 : i32, i32
  }
  func.func @transform_6(%arg0: i32) -> (i32, i32) {
    %c0_i32 = arith.constant 0 : i32
    %c0_i32_0 = arith.constant 0 : i32
    %c0_i32_1 = arith.constant 0 : i32
    return %c0_i32, %c0_i32_0 : i32, i32
  }
  func.func @transform_7(%arg0: i32) -> (i32, i32) {
    %c0_i32 = arith.constant 0 : i32
    %c0_i32_0 = arith.constant 0 : i32
    %c0_i32_1 = arith.constant 0 : i32
    return %c0_i32, %c0_i32_0 : i32, i32
  }
  func.func @transform_8(%arg0: i32) -> (i32, i32) {
    %c0_i32 = arith.constant 0 : i32
    %c0_i32_0 = arith.constant 0 : i32
    %c0_i32_1 = arith.constant 0 : i32
    return %c0_i32, %c0_i32_0 : i32, i32
  }
  func.func @transform_9(%arg0: i32) -> (i32, i32) {
    %c0_i32 = arith.constant 0 : i32
    %c0_i32_0 = arith.constant 0 : i32
    %c0_i32_1 = arith.constant 0 : i32
    return %c0_i32, %c0_i32_0 : i32, i32
  }
  func.func @transform_10(%arg0: i32) -> (i32, i32) {
    %c0_i32 = arith.constant 0 : i32
    %c0_i32_0 = arith.constant 0 : i32
    %c0_i32_1 = arith.constant 0 : i32
    return %c0_i32, %c0_i32_0 : i32, i32
  }
  func.func @transform_11(%arg0: i32) -> (i32, i32) {
    %c0_i32 = arith.constant 0 : i32
    %c0_i32_0 = arith.constant 0 : i32
    %c0_i32_1 = arith.constant 0 : i32
    return %c0_i32, %c0_i32_0 : i32, i32
  }
  func.func @transform_12(%arg0: i32) -> (i32, i32) {
    %c0_i32 = arith.constant 0 : i32
    %c0_i32_0 = arith.constant 0 : i32
    %c0_i32_1 = arith.constant 0 : i32
    return %c0_i32, %c0_i32_0 : i32, i32
  }
  func.func @transform_13(%arg0: i32) -> (i32, i32) {
    %c0_i32 = arith.constant 0 : i32
    %c0_i32_0 = arith.constant 0 : i32
    %c0_i32_1 = arith.constant 0 : i32
    return %c0_i32, %c0_i32_0 : i32, i32
  }
  func.func @transform_14(%arg0: i32) -> (i32, i32) {
    %c0_i32 = arith.constant 0 : i32
    %c0_i32_0 = arith.constant 0 : i32
    %c0_i32_1 = arith.constant 0 : i32
    return %c0_i32, %c0_i32_0 : i32, i32
  }
  func.func @transform_15(%arg0: i32) -> (i32, i32) {
    %c0_i32 = arith.constant 0 : i32
    %c0_i32_0 = arith.constant 0 : i32
    return %arg0, %c0_i32 : i32, i32
  }
}

</mosaic_0001>

<bundles_post_ra>
// kernel: tpu_custom_call.1
= control target key start
LH: loop header
LB: loop body
LE: loop exit
PB: predicated region body
PF: predicated region fallthrough
CT: control target
= control target key end

     0   :  { %s3285_s0 = inlined_call_operand.hbm [shape: bf16[32,128], index: 0, kind: input, shape index: {}]   ;;  %s3286_s1 = inlined_call_operand.hbm [shape: bf16[128,512], index: 1, kind: input, shape index: {}]   ;;  %s3287_s2 = inlined_call_operand.vmem [shape: f32[1,512], index: 2, kind: input, shape index: {}]   ;;  %s3288_s3 = inlined_call_operand.vmem [shape: f32[1,512], index: 3, kind: input, shape index: {}]   ;;  %s3289_s4 = inlined_call_operand.vmem [shape: f32[1,512], index: 4, kind: input, shape index: {}]   ;;  %s3290_s5 = inlined_call_operand.hbm [shape: bf16[512,256], index: 5, kind: input, shape index: {}]   ;;  %s3291_s6 = inlined_call_operand.vmem [shape: f32[1,256], index: 6, kind: input, shape index: {}]   ;;  %s3292_s7 = inlined_call_operand.vmem [shape: f32[1,256], index: 7, kind: input, shape index: {}]   ;;  %s3293_s8 = inlined_call_operand.vmem [shape: f32[1,256], index: 8, kind: input, shape index: {}]   ;;  %s3294_s9 = inlined_call_operand.hbm [shape: bf16[256,128], index: 9, kind: input, shape index: {}]   ;;  %s3295_s10 = inlined_call_operand.vmem [shape: f32[1,128], index: 10, kind: input, shape index: {}]   ;;  %s3296_s11 = inlined_call_operand.vmem [shape: f32[1,128], index: 11, kind: input, shape index: {}]   ;;  %s3297_s12 = inlined_call_operand.vmem [shape: f32[1,128], index: 12, kind: input, shape index: {}]   ;;  %s3298_s13 = inlined_call_operand.hbm [shape: bf16[128,128], index: 13, kind: input, shape index: {}]   ;;  %s3299_s14 = inlined_call_operand.vmem [shape: f32[1,128], index: 14, kind: input, shape index: {}]   ;;  %s3300_s15 = inlined_call_operand.hbm [shape: bf16[32,128], index: 15, kind: output, shape index: {}]  }
   0x1   :  { %3311 = sst [smem:[#allocation18_spill]] %s3286_s1 }
   0x2   :  { %3312 = sst [smem:[#allocation19_spill]] %s3293_s8 }
   0x3   :  { %3313 = sst [smem:[#allocation20_spill]] %s3295_s10 }
   0x4   :  { %3314 = sst [smem:[#allocation21_spill]] %s3296_s11 }
   0x5   :  { %3315 = sst [smem:[#allocation22_spill]] %s3297_s12 }
   0x6   :  { %3316 = sst [smem:[#allocation23_spill]] %s3299_s14 }
   0x7   :  { %3317 = sst [smem:[#allocation24_spill]] %s3300_s15 }
   0x8   :  { %20 = vsyncpa [#allocation3], 0 }
   0x9   :  { %22 = vsyncpa [#allocation3 + $0x1], 0 }
   0xa   :  { %23 = vsyncpa [#allocation6], 0 }
   0xb   :  { %24 = vsyncpa [#allocation9], 0 }
   0xc   :  { %25 = vsyncpa [#allocation4], 0 }
   0xd   :  { %27 = vsyncpa [#allocation4 + $0x1], 0  ;;  %s2864_s18 = smov 0   ;;  %s2866_s19 = smov 0  }
   0xe   :  { %s2868_s20 = smov 0   ;;  %s2870_s21 = smov 0  }
   0xf LB: > { %3318 = sst [smem:[#allocation16_spill]] %s2753_s18  ;;  %s2885_s22 = sadd.s32 4294967295, %s2765_s21   ;;  %s2765_s21 = sphi %s2870_s21, %s3350_s21   ;;  %s2761_s20 = sphi %s2868_s20, %s3349_s20   ;;  %s2757_s19 = sphi %s2866_s19, %s3348_s19   ;;  %s2753_s18 = sphi %s2864_s18, %s3347_s18  }
  0x10   : > { %s2053_s23 = sadd.s32 4294967294, %s2765_s21   ;;  %p53_p0 = scmp.ne.s32.totalorder %s2757_s19, %s2753_s18 }
  0x11   : > { %p3304_p1 = scmp.eq.s32.totalorder %s2885_s22, 0  ;;  %p377_p3 = scmp.eq.s32.totalorder %s2053_s23, 1 }
  0x12   : > { %p2054_p5 = scmp.ge.s32.totalorder %s2765_s21, 1  ;;  %p384_p7 = scmp.lt.s32.totalorder %s2765_s21, 3 }
  0x13   : > { %p2894_p4 = por %p3304_p1, %p53_p0  ;;  %p2899_p6 = por %p377_p3, %p53_p0 }
  0x14   : > { %p2904_p8 = pnand %p2054_p5, %p384_p7  ;;  %s2767_s27 = smov [#allocation5]  }
  0x15   : > { %s3319_s24 = scalar_select %p2894_p4, 1, 0 }
  0x16   : > { %s3320_s25 = scalar_select %p2899_p6, 1, 0 }
  0x17   : > { %s3322_s26 = scalar_select %p2904_p8, 1, 0 }
  0x18   : > { %3321 = sst [smem:[#allocation17_spill]] %s3320_s25  ;;  %s396_s28 = sshll.u32 %s2767_s27, 4  ;;  %s2908_s28 = int_to_ptr.vmem [resolvable:$true] %s396_s28 }
  0x19   : > { %p2290_p9 = pneg %p2904_p8  ;;  %s2768_s30 = smov [#allocation8]  }
  0x1a   : > { %s440_s16 = sshll.u32 %s2768_s30, 4  ;;  %s3324_s1 = sld [smem:[#allocation18_spill]]  ;;  %s2919_s16 = int_to_ptr.vmem [resolvable:$true] %s440_s16 }
  0x1b   : > { %p2915_p11 = pnand %p2290_p9, %p3304_p1 }
  0x1d   : > { %p2929_p13 = pneg %p2915_p11 }
  0x20   : > { %s2549_s25 = scalar_lea.hbm %s3324_s1, 4096 }
  0x21   : > { %p2550_p12 = scmp.ne.s32.totalorder %s3324_s1, %s2549_s25  ;;  %p2556_p5 = scmp.lt.u32.totalorder %s2549_s25, %s3324_s1 }
  0x23   : > { %p2552_p0 = pnand %p2929_p13, %p2550_p12 }
  0x25   : > { %p2553_p3 = pneg %p2552_p0 }
  0x27   : > { %p2558_p7 = pnand %p2556_p5, %p2553_p3 }
  0x29   : > { %2561 = shalt.err (!%p2558_p7)
}
  0x2a   : > { %s2562_s18 = scalar_lea.vmem %s2908_s28, 4096  ;;  %p2570_p2 = scmp.lt.s32.totalorder %s2908_s28, %s2908_s28 }
  0x2b   : > { %p2563_p9 = scmp.ne.s32.totalorder %s2908_s28, %s2562_s18  ;;  %p2571_p6 = scmp.lt.s32.totalorder %s2562_s18, %s2562_s18 }
  0x2d   : > { %p2565_p10 = pnand %p2563_p9, %p2929_p13  ;;  %p2572_p12 = por %p2571_p6, %p2570_p2 }
  0x2f   : > { %p2566_p1 = pneg %p2565_p10 }
  0x31   : > { %p2573_p0 = pnand %p2572_p12, %p2566_p1 }
  0x33   : > { %2576 = shalt.err (!%p2573_p0)
}
  0x34   : > { %s2769_s17 = smov 256   ;;  %s2770_s14 = smov 16  }
  0x35   : > { %2293 = dma.hbm_to_vmem [thread:$0]  (!%p2915_p11), %s3324_s1, 4096, %s2908_s28, [#allocation6], %s2769_s17, %s2769_s17, %s2770_s14  }
  0x36   : > { %s2577_s12 = scalar_lea.hbm %s3294_s9, 2048 }
  0x37   : > { %p2578_p2 = scmp.ne.s32.totalorder %s3294_s9, %s2577_s12  ;;  %p2584_p10 = scmp.lt.u32.totalorder %s2577_s12, %s3294_s9 }
  0x39   : > { %p2580_p1 = pnand %p2578_p2, %p2929_p13 }
  0x3b   : > { %p2581_p6 = pneg %p2580_p1 }
  0x3d   : > { %p2586_p3 = pnand %p2584_p10, %p2581_p6 }
  0x3f   : > { %2589 = shalt.err (!%p2586_p3)
}
  0x40   : > { %s2590_s28 = scalar_lea.vmem %s2919_s16, 2048  ;;  %p2598_p12 = scmp.lt.s32.totalorder %s2919_s16, %s2919_s16 }
  0x41   : > { %p2591_p5 = scmp.ne.s32.totalorder %s2919_s16, %s2590_s28  ;;  %p2599_p0 = scmp.lt.s32.totalorder %s2590_s28, %s2590_s28 }
  0x43   : > { %p2593_p7 = pnand %p2591_p5, %p2929_p13  ;;  %p2600_p2 = por %p2599_p0, %p2598_p12 }
  0x45   : > { %p2594_p9 = pneg %p2593_p7 }
  0x47   : > { %p2601_p1 = pnand %p2600_p2, %p2594_p9 }
  0x49   : > { %2604 = shalt.err (!%p2601_p1)
}
  0x4a   : > { %s3307_s10 = smov 64   ;;  %s3309_s8 = smov 4  }
  0x4b   : > { %2299 = dma.hbm_to_vmem [thread:$0]  (!%p2915_p11), %s3294_s9, 2048, %s2919_s16, [#allocation9], %s3307_s10, %s3307_s10, %s3309_s8  }
  0x4c   : > { %s2773_s17 = smov [#allocation7]   ;;  %s2605_s27 = scalar_lea.hbm %s3290_s5, 8192 }
  0x4d   : > { %s418_s14 = sshll.u32 %s2773_s17, 4  ;;  %p2606_p6 = scmp.ne.s32.totalorder %s3290_s5, %s2605_s27  ;;  %s419_s14 = int_to_ptr.vmem [resolvable:$true] %s418_s14 }
  0x4e   : > { %p2612_p5 = scmp.lt.u32.totalorder %s2605_s27, %s3290_s5 }
  0x4f   : > { %p2608_p10 = pnand %p2606_p6, %p2929_p13 }
  0x51   : > { %p2609_p3 = pneg %p2608_p10 }
  0x53   : > { %p2614_p7 = pnand %p2612_p5, %p2609_p3 }
  0x55   : > { %2617 = shalt.err (!%p2614_p7)
}
  0x56   : > { %s2618_s16 = scalar_lea.vmem %s419_s14, 8192  ;;  %p2626_p2 = scmp.lt.s32.totalorder %s419_s14, %s419_s14 }
  0x57   : > { %p2619_p9 = scmp.ne.s32.totalorder %s419_s14, %s2618_s16  ;;  %p2627_p1 = scmp.lt.s32.totalorder %s2618_s16, %s2618_s16 }
  0x59   : > { %p2621_p12 = pnand %p2619_p9, %p2929_p13  ;;  %p2628_p4 = por %p2627_p1, %p2626_p2 }
  0x5b   : > { %p2622_p0 = pneg %p2621_p12 }
  0x5d   : > { %p2629_p8 = pnand %p2628_p4, %p2622_p0 }
  0x5f   : > { %2632 = shalt.err (!%p2629_p8)
}
  0x60   : > { %s2774_s11 = smov 128   ;;  %s2775_s12 = smov 8  }
  0x61   : > { %2296 = dma.hbm_to_vmem [thread:$0]  (!%p2915_p11), %s3290_s5, 8192, %s419_s14, [#allocation6], %s2774_s11, %s2774_s11, %s2775_s12  }
  0x62   : > { %s2776_s25 = smov [#allocation10]   ;;  %s2633_s18 = scalar_lea.hbm %s3298_s13, 1024 }
  0x63   : > { %s462_s23 = sshll.u32 %s2776_s25, 4  ;;  %p2634_p4 = scmp.ne.s32.totalorder %s3298_s13, %s2633_s18  ;;  %s463_s23 = int_to_ptr.vmem [resolvable:$true] %s462_s23 }
  0x64   : > { %p2640_p10 = scmp.lt.u32.totalorder %s2633_s18, %s3298_s13 }
  0x65   : > { %p2636_p8 = pnand %p2634_p4, %p2929_p13 }
  0x67   : > { %p2637_p6 = pneg %p2636_p8 }
  0x69   : > { %p2642_p3 = pnand %p2640_p10, %p2637_p6 }
  0x6b   : > { %2645 = shalt.err (!%p2642_p3)
}
  0x6c   : > { %s2646_s14 = scalar_lea.vmem %s463_s23, 1024  ;;  %p2654_p12 = scmp.lt.s32.totalorder %s463_s23, %s463_s23 }
  0x6d   : > { %p2647_p5 = scmp.ne.s32.totalorder %s463_s23, %s2646_s14  ;;  %p2655_p0 = scmp.lt.s32.totalorder %s2646_s14, %s2646_s14 }
  0x6f   : > { %p2649_p7 = pnand %p2647_p5, %p2929_p13  ;;  %p2656_p2 = por %p2655_p0, %p2654_p12 }
  0x71   : > { %p2650_p9 = pneg %p2649_p7 }
  0x73   : > { %p2657_p1 = pnand %p2656_p2, %p2650_p9 }
  0x75   : > { %2660 = shalt.err (!%p2657_p1)
}
  0x76   : > { %s3326_s11 = smov 4   ;;  %s3327_s12 = smov 64  }
  0x77   : > { %2302 = dma.hbm_to_vmem [thread:$0]  (!%p2915_p11), %s3298_s13, 1024, %s463_s23, [#allocation9], %s3327_s12, %s3327_s12, %s3326_s11  }
  0x78   : > { %s3016_s15 = sadd.s32 1, %s2765_s21   ;;  %s40_s29 = sadd.s32 1, %s2761_s20 }
  0x79   : > { %s37_s1 = ssub.s32 %s2765_s21, %s3016_s15  ;;  %p47_p13 = scmp.ne.s32.totalorder %s2761_s20, %s2757_s19 }
  0x7a   : > { %p38_p4 = scmp.eq.s32.totalorder %s37_s1, 0  ;;  %p48_p8 = scmp.eq.s32.totalorder %s2765_s21, 0 }
  0x7b   : > { %p3328_p6 = scmp.eq.s32.totalorder %s2885_s22, 1  ;;  %p2315_p3 = scmp.lt.s32.totalorder %s2765_s21, 2 }
  0x7c   : > { %s3032_s25 = scalar_select %p38_p4, %s2761_s20, %s40_s29  }
  0x7d   : > { %p3026_p10 = por %p3328_p6, %p47_p13  ;;  %p49_p5 = por %p48_p8, %p47_p13 }
  0x7e   : > { %s479_s27 = sand.u32 1, %s2761_s20   ;;  %s2202_s23 = sshll.u32 %s2765_s21, 7 }
  0x7f   : > { %s2060_s30 = sshll.u32 %s479_s27, 3  ;;  %s3039_s16 = scalar_lea.hbm %s3285_s0, %s2202_s23 }
  0x80   : > { %s483_s14 = scalar_lea.vmem [#allocation2], %s2060_s30  ;;  %p3043_p11 = pnand %p2315_p3, %p49_p5 }
  0x81   : > { %s490_s10 = sshll.u32 %s483_s14, 4  ;;  %s3047_s29 = scalar_lea.sflag [#allocation3], %s479_s27  ;;  %s3041_s10 = int_to_ptr.vmem [resolvable:$true] %s490_s10 }
  0x82   : > { %s2661_s1 = scalar_lea.hbm %s3039_s16, 128  ;;  %p2663_p9 = pneg %p3043_p11 }
  0x83   : > { %p2662_p7 = scmp.ne.s32.totalorder %s3039_s16, %s2661_s1  ;;  %s2666_s18 = scalar_lea.hbm %s3285_s0, 256 }
  0x84   : > { %p2667_p2 = scmp.lt.u32.totalorder %s3039_s16, %s3285_s0  ;;  %p2668_p1 = scmp.lt.u32.totalorder %s2666_s18, %s2661_s1 }
  0x85   : > { %p2664_p12 = pnand %p2663_p9, %p2662_p7  ;;  %p2670_p4 = scmp.lt.u32.totalorder %s2661_s1, %s3039_s16 }
  0x86   : > { %p2669_p13 = por %p2668_p1, %p2667_p2 }
  0x87   : > { %p2665_p0 = pneg %p2664_p12 }
  0x88   : > { %p2671_p8 = por %p2670_p4, %p2669_p13 }
  0x8a   : > { %p2672_p6 = pnand %p2671_p8, %p2665_p0 }
  0x8c   : > { %2675 = shalt.err (!%p2672_p6)
}
  0x8d   : > { %s2676_s27 = scalar_lea.vmem %s3041_s10, 128  ;;  %s2777_s30 = smov [#allocation2]  }
  0x8e   : > { %p2677_p3 = scmp.ne.s32.totalorder %s3041_s10, %s2676_s27  ;;  %s2681_s23 = sshll.u32 %s2777_s30, 4  ;;  %s2682_s23 = int_to_ptr.vmem [resolvable:$false] %s2681_s23 }
  0x8f   : > { %s2683_s28 = scalar_lea.vmem %s2682_s23, 256  ;;  %p2684_p12 = scmp.lt.s32.totalorder %s3041_s10, %s2682_s23 }
  0x90   : > { %p2679_p5 = pnand %p2677_p3, %p2663_p9  ;;  %p2685_p2 = scmp.lt.s32.totalorder %s2683_s28, %s2676_s27 }
  0x92   : > { %p2680_p7 = pneg %p2679_p5  ;;  %p2686_p1 = por %p2685_p2, %p2684_p12 }
  0x94   : > { %p2687_p13 = pnand %p2686_p1, %p2680_p7 }
  0x96   : > { %2690 = shalt.err (!%p2687_p13)
}
  0x97   : > { %2306 = dma.hbm_to_vmem [thread:$0]  (!%p3043_p11), %s3039_s16, 128, %s3041_s10, %s3047_s29, %s3327_s12, %s3327_s12, %s3326_s11  }
  0x98   : > { %p3331_p9 = scmp.ne.s32.totalorder %s3322_s26, 0 }
  0x99   : > { %s3081_s1 = sand.u32 (!%p3331_p9), 1, %s2757_s19   ;;  %p3332_p0 = scmp.ne.s32.totalorder (!%p3331_p9), %s3319_s24, 0 }
  0x9a   : > { %502 = sbr.rel (%p3331_p9) target bundleno = 1716 (0x6b4), region = 80  ;;  %s2064_s18 = sshll.u32 (!%p3331_p9), %s3081_s1, 3 }
  0x9b   : > { %s505_s14 = scalar_lea.sflag (!%p3331_p9), [#allocation3], %s3081_s1  ;;  %s3087_s8 = scalar_lea.vmem (!%p3331_p9), [#allocation2], %s2064_s18 }
  0xa1   : > { %2736 = dma.done.wait (%p3332_p0), %s505_s14, 128  }
  0xa2   : > { %2738 = vsyncadd (%p3332_p0), %s505_s14, 4294967168  ;;  %p3333_p11 = scmp.eq.s32.totalorder %s2885_s22, 0 }
  0xa4   : > { %2740 = dma.done.wait (%p3333_p11), [#allocation6], 12288   ;;  %p3334_p4 = pmov %p3333_p11 }
  0xa6   : > { %2742 = vsyncadd (%p3334_p4), [#allocation6], 4294955008  ;;  %p3335_p8 = pmov %p3334_p4 }
  0xa7   : > { %p3336_p6 = pmov %p3334_p4 }
  0xa8   : > { %2744 = dma.done.wait (%p3335_p8), [#allocation9], 3072  }
  0xa9   : > { %2746 = vsyncadd (%p3336_p6), [#allocation9], 4294964224  ;;  %v2778_v0 = vmov 0   ;;  %v2368_v1 = vld [vmem:[#allocation5 + $0x4] ss:$16 sps:$4 sm:$0xff]   ;;  %v610_v53 = vlaneseq  ;;  %s3338_s11 = sld [smem:[#allocation20_spill]] }
  0xaa   : > { %828 = vmatprep.mubr.bf16.mxu1 %v2778_v0  ;;  %v2370_v2 = vld [vmem:[#allocation5] ss:$16 sps:$4 sm:$0xff]   ;;  %796 = vmatprep.subr.bf16.mxu1 %v2368_v1  ;;  %v2371_v3 = vld [vmem:[#allocation5 + $0x24] ss:$16 sps:$4 sm:$0xff]   ;;  %v2395_v17 = vld [vmem:[#allocation5 + $0xc] ss:$16 sps:$4 sm:$0xff]  }
  0xab   : > { %797 = vmatpush1.bf16.msra.mxu1 %v2370_v2  ;;  %v2373_v4 = vld [vmem:[#allocation5 + $0x20] ss:$16 sps:$4 sm:$0xff]   ;;  %v2374_v5 = vld [vmem:[#allocation5 + $0x44] ss:$16 sps:$4 sm:$0xff]   ;;  %v2393_v19 = vld [vmem:[#allocation5 + $0x8] ss:$16 sps:$4 sm:$0xff]  }
  0xac   : > { %798 = vmatprep.subr.bf16.mxu1 %v2371_v3  ;;  %v2376_v6 = vld [vmem:[#allocation5 + $0x40] ss:$16 sps:$4 sm:$0xff]   ;;  %v2377_v7 = vld [vmem:[#allocation5 + $0x64] ss:$16 sps:$4 sm:$0xff]   ;;  %v2398_v20 = vld [vmem:[#allocation5 + $0x2c] ss:$16 sps:$4 sm:$0xff]  }
  0xad   : > { %v2379_v8 = vld [vmem:[#allocation5 + $0x60] ss:$16 sps:$4 sm:$0xff]   ;;  %v2380_v9 = vld [vmem:[#allocation5 + $0x84] ss:$16 sps:$4 sm:$0xff]   ;;  %v2396_v21 = vld [vmem:[#allocation5 + $0x28] ss:$16 sps:$4 sm:$0xff]  }
  0xae   : > { %v2382_v10 = vld [vmem:[#allocation5 + $0x80] ss:$16 sps:$4 sm:$0xff]   ;;  %v2383_v11 = vld [vmem:[#allocation5 + $0xa4] ss:$16 sps:$4 sm:$0xff]   ;;  %v2401_v22 = vld [vmem:[#allocation5 + $0x4c] ss:$16 sps:$4 sm:$0xff]  }
  0xaf   : > { %799 = vmatpush1.bf16.msra.mxu1 %v2373_v4  ;;  %v2385_v12 = vld [vmem:[#allocation5 + $0xa0] ss:$16 sps:$4 sm:$0xff]   ;;  %v2386_v13 = vld [vmem:[#allocation5 + $0xc4] ss:$16 sps:$4 sm:$0xff]   ;;  %v2399_v23 = vld [vmem:[#allocation5 + $0x48] ss:$16 sps:$4 sm:$0xff]  }
  0xb0   : > { %800 = vmatprep.subr.bf16.mxu1 %v2374_v5  ;;  %v2388_v14 = vld [vmem:[#allocation5 + $0xc0] ss:$16 sps:$4 sm:$0xff]   ;;  %v2389_v15 = vld [vmem:[#allocation5 + $0xe4] ss:$16 sps:$4 sm:$0xff]   ;;  %v2404_v24 = vld [vmem:[#allocation5 + $0x6c] ss:$16 sps:$4 sm:$0xff]  }
  0xb1   : > { %v2391_v16 = vld [vmem:[#allocation5 + $0xe0] ss:$16 sps:$4 sm:$0xff]   ;;  %v2402_v25 = vld [vmem:[#allocation5 + $0x68] ss:$16 sps:$4 sm:$0xff]   ;;  %v2407_v26 = vld [vmem:[#allocation5 + $0x8c] ss:$16 sps:$4 sm:$0xff]  }
  0xb2   : > { %v2392_v18 = vld [vmem:[%s3087_s8] sm:$0xff]   ;;  %v2417_v34 = vld [vmem:[#allocation7 + $0x4] ss:$8 sps:$4 sm:$0xff]   ;;  %v2419_v35 = vld [vmem:[#allocation7] ss:$8 sps:$4 sm:$0xff]   ;;  %v611_v54 = vshrl.u32 %v610_v53, 7 }
  0xb3   : > { %801 = vmatpush1.bf16.msra.mxu1 %v2376_v6  ;;  %v2405_v27 = vld [vmem:[#allocation5 + $0x88] ss:$16 sps:$4 sm:$0xff]   ;;  %v2410_v28 = vld [vmem:[#allocation5 + $0xac] ss:$16 sps:$4 sm:$0xff]   ;;  %1415 = vmatprep.subr.bf16.mxu0 %v2417_v34  ;;  %v608_v57 = vld [vmem:[%s3287_s2] sm:$0xf] }
  0xb4   : > { %802 = vmatprep.subr.bf16.mxu1 %v2377_v7  ;;  %v2408_v29 = vld [vmem:[#allocation5 + $0xa8] ss:$16 sps:$4 sm:$0xff]   ;;  %v2413_v30 = vld [vmem:[#allocation5 + $0xcc] ss:$16 sps:$4 sm:$0xff]   ;;  %1416 = vmatpush1.bf16.msra.mxu0 %v2419_v35  ;;  %v3102_v55 = vsub.s32 0, %v611_v54  ;;  %v3104_v56 = vsub.s32 1, %v611_v54 }
  0xb5   : > { %v2411_v31 = vld [vmem:[#allocation5 + $0xc8] ss:$16 sps:$4 sm:$0xff]   ;;  %v2416_v32 = vld [vmem:[#allocation5 + $0xec] ss:$16 sps:$4 sm:$0xff]   ;;  %v3111_v60 = vsub.s32 2, %v611_v54  ;;  %v3113_v61 = vsub.s32 3, %v611_v54 }
  0xb6   : > { %v2414_v33 = vld [vmem:[#allocation5 + $0xe8] ss:$16 sps:$4 sm:$0xff]   ;;  %v2420_v36 = vld [vmem:[#allocation7 + $0x14] ss:$8 sps:$4 sm:$0xff]   ;;  %v2423_v38 = vld [vmem:[#allocation7 + $0x24] ss:$8 sps:$4 sm:$0xff]   ;;  %v613_v58 = vrot.slane %v608_v57, %v3102_v55  ;;  %v617_v59 = vrot.slane %v608_v57, %v3104_v56 }
  0xb7   : > { %803 = vmatpush1.bf16.msra.mxu1 %v2379_v8  ;;  %v2422_v37 = vld [vmem:[#allocation7 + $0x10] ss:$8 sps:$4 sm:$0xff]   ;;  %1417 = vmatprep.subr.bf16.mxu0 %v2420_v36  ;;  %v2425_v39 = vld [vmem:[#allocation7 + $0x20] ss:$8 sps:$4 sm:$0xff]   ;;  %v2426_v40 = vld [vmem:[#allocation7 + $0x34] ss:$8 sps:$4 sm:$0xff]   ;;  %v621_v2 = vrot.slane %v608_v57, %v3111_v60  ;;  %v625_v3 = vrot.slane %v608_v57, %v3113_v61 }
  0xb8   : > { %804 = vmatprep.subr.bf16.mxu1 %v2380_v9  ;;  %1418 = vmatpush1.bf16.msra.mxu0 %v2422_v37  ;;  %v2428_v41 = vld [vmem:[#allocation7 + $0x30] ss:$8 sps:$4 sm:$0xff]   ;;  %v2429_v42 = vld [vmem:[#allocation7 + $0x44] ss:$8 sps:$4 sm:$0xff]   ;;  %v2431_v43 = vld [vmem:[#allocation7 + $0x40] ss:$8 sps:$4 sm:$0xff]  }
  0xb9   : > { %1419 = vmatprep.subr.bf16.mxu0 %v2423_v38  ;;  %v2432_v44 = vld [vmem:[#allocation7 + $0x54] ss:$8 sps:$4 sm:$0xff]   ;;  %v2434_v45 = vld [vmem:[#allocation7 + $0x50] ss:$8 sps:$4 sm:$0xff]   ;;  %v2435_v46 = vld [vmem:[#allocation7 + $0x64] ss:$8 sps:$4 sm:$0xff]  }
  0xba   : > { %v2437_v47 = vld [vmem:[#allocation7 + $0x60] ss:$8 sps:$4 sm:$0xff]   ;;  %v2438_v48 = vld [vmem:[#allocation7 + $0x74] ss:$8 sps:$4 sm:$0xff]   ;;  %v2446_v36 = vld [vmem:[#allocation7 + $0x90] ss:$8 sps:$4 sm:$0xff]  }
  0xbb   : > { %805 = vmatpush1.bf16.msra.mxu1 %v2382_v10  ;;  %v2443_v34 = vld [vmem:[#allocation7 + $0x80] ss:$8 sps:$4 sm:$0xff]   ;;  %v2444_v35 = vld [vmem:[#allocation7 + $0x94] ss:$8 sps:$4 sm:$0xff]   ;;  %v2447_v37 = vld [vmem:[#allocation7 + $0xa4] ss:$8 sps:$4 sm:$0xff]  }
  0xbc   : > { %806 = vmatprep.subr.bf16.mxu1 %v2383_v11  ;;  %1420 = vmatpush1.bf16.msra.mxu0 %v2425_v39  ;;  %v2449_v38 = vld [vmem:[#allocation7 + $0xa0] ss:$8 sps:$4 sm:$0xff]   ;;  %v2450_v39 = vld [vmem:[#allocation7 + $0xb4] ss:$8 sps:$4 sm:$0xff]   ;;  %s3337_s8 = sld [smem:[#allocation19_spill]]  ;;  %vm2780_vm0 = vmmov 0  }
  0xbd   : > { %1421 = vmatprep.subr.bf16.mxu0 %v2426_v40  ;;  %v2452_v40 = vld [vmem:[#allocation7 + $0xb0] ss:$8 sps:$4 sm:$0xff]   ;;  %s3339_s10 = sld [smem:[#allocation21_spill]]  ;;  %s3340_s30 = sld [smem:[#allocation22_spill]] }
  0xbe   : > { %s3341_s14 = sld [smem:[#allocation23_spill]]  ;;  %s2205_s26 = sshll.u32 %s2885_s22, 7 }
  0xbf   : > { %807 = vmatpush1.bf16.msra.mxu1 %v2385_v12  ;;  %s3342_s16 = sld [smem:[#allocation24_spill]]  ;;  %s2781_s22 = smov [#allocation11]  }
  0xc0   : > { %808 = vmatprep.subr.bf16.mxu1 %v2386_v13  ;;  %1422 = vmatpush1.bf16.msra.mxu0 %v2428_v41  ;;  %v2453_v41 = vld [vmem:[#allocation7 + $0xc4] ss:$8 sps:$4 sm:$0xff]   ;;  %s2695_s27 = sshll.u32 %s2781_s22, 4  ;;  %s2696_s27 = int_to_ptr.vmem [resolvable:$false] %s2695_s27 }
  0xc1   : > { %1423 = vmatprep.subr.bf16.mxu0 %v2429_v42  ;;  %v2455_v42 = vld [vmem:[#allocation7 + $0xc0] ss:$8 sps:$4 sm:$0xff]  }
  0xc3   : > { %809 = vmatpush1.bf16.msra.mxu1 %v2388_v14 }
  0xc4   : > { %810 = vmatprep.subr.bf16.mxu1 %v2389_v15  ;;  %1424 = vmatpush1.bf16.msra.mxu0 %v2431_v43  ;;  %v2456_v43 = vld [vmem:[#allocation7 + $0xd4] ss:$8 sps:$4 sm:$0xff]  }
  0xc5   : > { %1425 = vmatprep.subr.bf16.mxu0 %v2432_v44  ;;  %v2458_v44 = vld [vmem:[#allocation7 + $0xd0] ss:$8 sps:$4 sm:$0xff]  }
  0xc7   : > { %811 = vmatpush1.bf16.msra.mxu1 %v2391_v16 }
  0xc8   : > { %839 = vmatprep.subr.bf16.mxu1 %v2395_v17  ;;  %1426 = vmatpush1.bf16.msra.mxu0 %v2434_v45  ;;  %v2459_v45 = vld [vmem:[#allocation7 + $0xe4] ss:$8 sps:$4 sm:$0xff]  }
  0xc9   : > { %1427 = vmatprep.subr.bf16.mxu0 %v2435_v46  ;;  %v2461_v46 = vld [vmem:[#allocation7 + $0xe0] ss:$8 sps:$4 sm:$0xff]  }
  0xca   : > { %829 = vmatmul.mubr.bf16.vlgmr.msra.gmra.mrb[0].mxu1 %v2392_v18 }
  0xcb   : > { %840 = vmatpush1.bf16.msra.mxu1 %v2393_v19  ;;  %871 = vmatprep.mubr.bf16.mxu1 %v2778_v0 }
  0xcc   : > { %841 = vmatprep.subr.bf16.mxu1 %v2398_v20  ;;  %1428 = vmatpush1.bf16.msra.mxu0 %v2437_v47  ;;  %v2462_v47 = vld [vmem:[#allocation7 + $0xf4] ss:$8 sps:$4 sm:$0xff]  }
  0xcd   : > { %1429 = vmatprep.subr.bf16.mxu0 %v2438_v48  ;;  %v2464_v48 = vld [vmem:[#allocation7 + $0xf0] ss:$8 sps:$4 sm:$0xff]  }
  0xcf   : > { %842 = vmatpush1.bf16.msra.mxu1 %v2396_v21 }
  0xd0   : > { %843 = vmatprep.subr.bf16.mxu1 %v2401_v22 }
  0xd3   : > { %844 = vmatpush1.bf16.msra.mxu1 %v2399_v23 }
  0xd4   : > { %845 = vmatprep.subr.bf16.mxu1 %v2404_v24 }
  0xd7   : > { %846 = vmatpush1.bf16.msra.mxu1 %v2402_v25 }
  0xd8   : > { %847 = vmatprep.subr.bf16.mxu1 %v2407_v26 }
  0xdb   : > { %848 = vmatpush1.bf16.msra.mxu1 %v2405_v27 }
  0xdc   : > { %849 = vmatprep.subr.bf16.mxu1 %v2410_v28 }
  0xdf   : > { %850 = vmatpush1.bf16.msra.mxu1 %v2408_v29 }
  0xe0   : > { %851 = vmatprep.subr.bf16.mxu1 %v2413_v30 }
  0xe3   : > { %852 = vmatpush1.bf16.msra.mxu1 %v2411_v31 }
  0xe4   : > { %853 = vmatprep.subr.bf16.mxu1 %v2416_v32  ;;  %v2440_v32 = vld [vmem:[#allocation7 + $0x70] ss:$8 sps:$4 sm:$0xff]  }
  0xe5   : > { %1430 = vmatpush1.bf16.msra.mxu0 %v2440_v32 }
  0xe7   : > { %854 = vmatpush1.bf16.msra.mxu1 %v2414_v33  ;;  %v2441_v33 = vld [vmem:[#allocation7 + $0x84] ss:$8 sps:$4 sm:$0xff]  }
  0xe8   : > { %1431 = vmatprep.subr.bf16.mxu0 %v2441_v33 }
  0xe9   : > { %1432 = vmatpush1.bf16.msra.mxu0 %v2443_v34 }
  0xea   : > { %872 = vmatmul.mubr.bf16.vlgmr.msra.gmra.mrb[4].mxu1 %v2392_v18  ;;  %1433 = vmatprep.subr.bf16.mxu0 %v2444_v35 }
  0xed   : > { %1434 = vmatpush1.bf16.msra.mxu0 %v2446_v36 }
  0xee   : > { %1435 = vmatprep.subr.bf16.mxu0 %v2447_v37 }
  0xf1   : > { %1436 = vmatpush1.bf16.msra.mxu0 %v2449_v38 }
  0xf2   : > { %1437 = vmatprep.subr.bf16.mxu0 %v2450_v39 }
  0xf5   : > { %1438 = vmatpush1.bf16.msra.mxu0 %v2452_v40 }
  0xf6   : > { %1439 = vmatprep.subr.bf16.mxu0 %v2453_v41 }
  0xf9   : > { %1440 = vmatpush1.bf16.msra.mxu0 %v2455_v42 }
  0xfa   : > { %1441 = vmatprep.subr.bf16.mxu0 %v2456_v43 }
  0xfd   : > { %1442 = vmatpush1.bf16.msra.mxu0 %v2458_v44 }
  0xfe   : > { %1443 = vmatprep.subr.bf16.mxu0 %v2459_v45 }
 0x101   : > { %1444 = vmatpush1.bf16.msra.mxu0 %v2461_v46 }
 0x102   : > { %1445 = vmatprep.subr.bf16.mxu0 %v2462_v47 }
 0x105   : > { %1446 = vmatpush1.bf16.msra.mxu0 %v2464_v48 }
 0x19d   : > { %v830_v49 = vpop.f32.mrb[0].mxu1 }
 0x19e   : > { %v832_v50 = vpop.f32.mrb[1].mxu1  ;;  %v3115_v62 = vadd.f32 %v830_v49, %v613_v58  ;;  %v2467_v49 = vld [vmem:[#allocation7 + $0x104] ss:$8 sps:$4 sm:$0xff]  }
 0x19f   : > { %v834_v51 = vpop.f32.mrb[2].mxu1  ;;  %v3117_v63 = vadd.f32 %v832_v50, %v617_v59  ;;  %1458 = vmatprep.subr.bf16.mxu0 %v2467_v49 }
 0x1a0   : > { %v836_v52 = vpop.f32.mrb[3].mxu1  ;;  %v3119_v0 = vadd.f32 %v834_v51, %v613_v58  ;;  %v897_v4 = vmul.f32 %v3115_v62, %v3115_v62 }
 0x1a1   : > { %v3121_v1 = vadd.f32 %v836_v52, %v617_v59  ;;  %v898_v5 = vmul.f32 %v3117_v63, %v3117_v63  ;;  %v884_v11 = vadd.f32 %v3117_v63, %v3115_v62 }
 0x1a2   : > { %v901_v6 = vmul.f32 %v3119_v0, %v3119_v0 }
 0x1a3   : > { %v902_v7 = vmul.f32 %v3121_v1, %v3121_v1  ;;  %v889_v12 = vadd.f32 %v3121_v1, %v3119_v0  ;;  %v905_v19 = vadd.f32 %v898_v5, %v897_v4 }
 0x1a5   : > { %v910_v22 = vadd.f32 %v902_v7, %v901_v6 }
 0x1bd   : > { %v873_v8 = vpop.f32.mrb[4].mxu1 }
 0x1be   : > { %v3133_v9 = vadd.f32 %v873_v8, %v621_v2  ;;  %v875_v10 = vpop.f32.mrb[5].mxu1  ;;  %v882_v8 = vld [vmem:[%s3288_s3] sm:$0xf] }
 0x1bf   : > { %v3139_v13 = vadd.f32 %v875_v10, %v625_v3  ;;  %v877_v14 = vpop.f32.mrb[6].mxu1  ;;  %v883_v10 = vld [vmem:[%s3289_s4] sm:$0xf] }
 0x1c0   : > { %v3141_v15 = vadd.f32 %v877_v14, %v621_v2  ;;  %v879_v16 = vpop.f32.mrb[7].mxu1  ;;  %v885_v17 = vadd.f32 %v884_v11, %v3133_v9  ;;  %v899_v18 = vmul.f32 %v3133_v9, %v3133_v9  ;;  %v953_v11 = vrot.slane %v882_v8, %v3111_v60 }
 0x1c1   : > { %v3146_v20 = vadd.f32 %v879_v16, %v625_v3  ;;  %v900_v21 = vmul.f32 %v3139_v13, %v3139_v13  ;;  %v949_v14 = vrot.slane %v882_v8, %v3104_v56  ;;  %v945_v16 = vrot.slane %v882_v8, %v3102_v55 }
 0x1c2   : > { %v903_v23 = vmul.f32 %v3141_v15, %v3141_v15  ;;  %v886_v24 = vadd.f32 %v885_v17, %v3139_v13  ;;  %v906_v25 = vadd.f32 %v905_v19, %v899_v18  ;;  %v890_v26 = vadd.f32 %v889_v12, %v3141_v15 }
 0x1c3   : > { %v904_v28 = vmul.f32 %v3146_v20, %v3146_v20  ;;  %v957_v12 = vrot.slane %v882_v8, %v3113_v61 }
 0x1c4   : > { %887 = vadd.xlane.f32.xlu0 %v886_v24  ;;  %v907_v27 = vadd.f32 %v906_v25, %v900_v21  ;;  %v911_v29 = vadd.f32 %v910_v22, %v903_v23  ;;  %v891_v30 = vadd.f32 %v890_v26, %v3146_v20  ;;  %v978_v23 = vrot.slane %v883_v10, %v3104_v56 }
 0x1c5   : > { %v974_v24 = vrot.slane %v883_v10, %v3102_v55 }
 0x1c6   : > { %908 = vadd.xlane.f32.xlu1 %v907_v27  ;;  %v912_v31 = vadd.f32 %v911_v29, %v904_v28 }
 0x1c8   : > { %892 = vadd.xlane.f32.xlu0 %v891_v30 }
 0x1ca   : > { %913 = vadd.xlane.f32.xlu1 %v912_v31 }
 0x251   : > { %v888_v50 = vpop.xlane.xlu0 %887 }
 0x252   : > { %v895_v51 = vmul.f32 0.001953125, %v888_v50 }
 0x253   : > { %v909_v52 = vpop.xlane.xlu1 %908 }
 0x254   : > { %v915_v53 = vmul.f32 0.001953125, %v909_v52  ;;  %v917_v54 = vmul.f32 %v895_v51, %v895_v51  ;;  %v921_v17 = vsub.f32 %v3115_v62, %v895_v51  ;;  %v923_v18 = vsub.f32 %v3133_v9, %v895_v51 }
 0x255   : > { %v893_v57 = vpop.xlane.xlu0 %892  ;;  %v924_v19 = vsub.f32 %v3139_v13, %v895_v51  ;;  %v922_v21 = vsub.f32 %v3117_v63, %v895_v51  ;;  %v986_v62 = vrot.slane %v883_v10, %v3113_v61  ;;  %v982_v9 = vrot.slane %v883_v10, %v3111_v60  ;;  %v2470_v10 = vld [vmem:[#allocation7 + $0x114] ss:$8 sps:$4 sm:$0xff]  }
 0x256   : > { %v896_v58 = vmul.f32 0.001953125, %v893_v57  ;;  %v919_v59 = vsub.f32 %v915_v53, %v917_v54 }
 0x257   : > { %v914_v2 = vpop.xlane.xlu1 %913 }
 0x258   : > { %v916_v3 = vmul.f32 0.001953125, %v914_v2  ;;  %v929_v4 = vadd.f32 1e-05, %v919_v59  ;;  %v918_v5 = vmul.f32 %v896_v58, %v896_v58  ;;  %v925_v29 = vsub.f32 %v3119_v0, %v896_v58 }
 0x259   : > { %v926_v30 = vsub.f32 %v3121_v1, %v896_v58  ;;  %v927_v34 = vsub.f32 %v3141_v15, %v896_v58  ;;  %v928_v35 = vsub.f32 %v3146_v20, %v896_v58 }
 0x25a   : > { %2537 = vrsqrt.f32 %v929_v4  ;;  %v920_v6 = vsub.f32 %v916_v3, %v918_v5 }
 0x25c   : > { %v930_v7 = vadd.f32 1e-05, %v920_v6  ;;  %v2465_v6 = vld [vmem:[#allocation7 + $0x100] ss:$8 sps:$4 sm:$0xff]  }
 0x25e   : > { %2539 = vrsqrt.f32 %v930_v7 }
 0x264   : > { %v2538_v22 = vpop.eup %2537 }
 0x265   : > { %v934_v25 = vmul.f32 %v2538_v22, %v922_v21  ;;  %v933_v26 = vmul.f32 %v2538_v22, %v921_v17  ;;  %v936_v27 = vmul.f32 %v2538_v22, %v924_v19  ;;  %v935_v28 = vmul.f32 %v2538_v22, %v923_v18  ;;  %v2471_v17 = vld [vmem:[#allocation7 + $0x120] ss:$8 sps:$4 sm:$0xff]   ;;  %v2476_v18 = vld [vmem:[#allocation7 + $0x134] ss:$8 sps:$4 sm:$0xff]   ;;  %v2474_v19 = vld [vmem:[#allocation7 + $0x130] ss:$8 sps:$4 sm:$0xff]  }
 0x266   : > { %v2479_v21 = vld [vmem:[#allocation7 + $0x144] ss:$8 sps:$4 sm:$0xff]   ;;  %v2477_v22 = vld [vmem:[#allocation7 + $0x140] ss:$8 sps:$4 sm:$0xff]  }
 0x267   : > { %v963_v13 = vmul.f32 %v949_v14, %v934_v25  ;;  %v962_v31 = vmul.f32 %v945_v16, %v933_v26  ;;  %v965_v63 = vmul.f32 %v957_v12, %v936_v27  ;;  %v964_v32 = vmul.f32 %v953_v11, %v935_v28  ;;  %v2485_v25 = vld [vmem:[#allocation7 + $0x164] ss:$8 sps:$4 sm:$0xff]   ;;  %v2483_v26 = vld [vmem:[#allocation7 + $0x160] ss:$8 sps:$4 sm:$0xff]   ;;  %v2488_v27 = vld [vmem:[#allocation7 + $0x174] ss:$8 sps:$4 sm:$0xff]  }
 0x268   : > { %v2540_v33 = vpop.eup %2539  ;;  %v2486_v28 = vld [vmem:[#allocation7 + $0x170] ss:$8 sps:$4 sm:$0xff]  }
 0x269   : > { %v938_v36 = vmul.f32 %v2540_v33, %v926_v30  ;;  %v992_v37 = vadd.f32 %v978_v23, %v963_v13  ;;  %v937_v38 = vmul.f32 %v2540_v33, %v925_v29  ;;  %v991_v39 = vadd.f32 %v974_v24, %v962_v31  ;;  %v2491_v29 = vld [vmem:[#allocation7 + $0x184] ss:$8 sps:$4 sm:$0xff]   ;;  %v2489_v30 = vld [vmem:[#allocation7 + $0x180] ss:$8 sps:$4 sm:$0xff]  }
 0x26a   : > { %v940_v0 = vmul.f32 %v2540_v33, %v928_v35  ;;  %v939_v40 = vmul.f32 %v2540_v33, %v927_v34  ;;  %v993_v1 = vadd.f32 %v982_v9, %v964_v32  ;;  %v994_v42 = vadd.f32 %v986_v62, %v965_v63  ;;  %v2497_v13 = vld [vmem:[#allocation7 + $0x1a4] ss:$8 sps:$4 sm:$0xff]   ;;  %v2495_v31 = vld [vmem:[#allocation7 + $0x1a0] ss:$8 sps:$4 sm:$0xff]   ;;  %v2500_v63 = vld [vmem:[#allocation7 + $0x1b4] ss:$8 sps:$4 sm:$0xff]  }
 0x26b   : > { %v967_v41 = vmul.f32 %v949_v14, %v938_v36  ;;  %v966_v61 = vmul.f32 %v945_v16, %v937_v38  ;;  %v1000_v45 = vmul.f32 0.2, %v992_v37  ;;  %v999_v47 = vmul.f32 0.2, %v991_v39  ;;  %v2468_v14 = vld [vmem:[#allocation7 + $0x110] ss:$8 sps:$4 sm:$0xff]  }
 0x26c   : > { %v969_v60 = vmul.f32 %v957_v12, %v940_v0  ;;  %v968_v43 = vmul.f32 %v953_v11, %v939_v40  ;;  %v1001_v49 = vmul.f32 0.2, %v993_v1  ;;  %v1002_v51 = vmul.f32 0.2, %v994_v42  ;;  %v2473_v16 = vld [vmem:[#allocation7 + $0x124] ss:$8 sps:$4 sm:$0xff]  }
 0x26d   : > { %v996_v44 = vadd.f32 %v978_v23, %v967_v41  ;;  %v995_v46 = vadd.f32 %v974_v24, %v966_v61  ;;  %v1008_v54 = vmax.f32 %v992_v37, %v1000_v45  ;;  %v1007_v58 = vmax.f32 %v991_v39, %v999_v47  ;;  %v2482_v23 = vld [vmem:[#allocation7 + $0x154] ss:$8 sps:$4 sm:$0xff]   ;;  %v2480_v24 = vld [vmem:[#allocation7 + $0x150] ss:$8 sps:$4 sm:$0xff]   ;;  %v2503_v33 = vld [vmem:[#allocation7 + $0x1c4] ss:$8 sps:$4 sm:$0xff]  }
 0x26e   : > { %v998_v48 = vadd.f32 %v986_v62, %v969_v60  ;;  %v997_v15 = vadd.f32 %v982_v9, %v968_v43  ;;  %v1009_v3 = vmax.f32 %v993_v1, %v1001_v49  ;;  %v1010_v8 = vmax.f32 %v994_v42, %v1002_v51  ;;  %v2494_v62 = vld [vmem:[#allocation7 + $0x194] ss:$8 sps:$4 sm:$0xff]   ;;  %v2492_v9 = vld [vmem:[#allocation7 + $0x190] ss:$8 sps:$4 sm:$0xff]   ;;  %v2501_v34 = vld [vmem:[#allocation7 + $0x1c0] ss:$8 sps:$4 sm:$0xff]  }
 0x26f   : > { %v1004_v20 = vmul.f32 0.2, %v996_v44  ;;  %v1003_v50 = vmul.f32 0.2, %v995_v46  ;;  %v2498_v32 = vld [vmem:[#allocation7 + $0x1b0] ss:$8 sps:$4 sm:$0xff]  }
 0x270   : > { %v1006_v52 = vmul.f32 0.2, %v998_v48  ;;  %v1005_v53 = vmul.f32 0.2, %v997_v15  ;;  %v2506_v35 = vld [vmem:[#allocation7 + $0x1d4] ss:$8 sps:$4 sm:$0xff]  }
 0x271   : > { %v1012_v57 = vmax.f32 %v996_v44, %v1004_v20  ;;  %v1011_v59 = vmax.f32 %v995_v46, %v1003_v50  ;;  %v2504_v36 = vld [vmem:[#allocation7 + $0x1d0] ss:$8 sps:$4 sm:$0xff]   ;;  %v2509_v37 = vld [vmem:[#allocation7 + $0x1e4] ss:$8 sps:$4 sm:$0xff]   ;;  %v2507_v38 = vld [vmem:[#allocation7 + $0x1e0] ss:$8 sps:$4 sm:$0xff]  }
 0x272   : > { %v1014_v2 = vmax.f32 %v998_v48, %v1006_v52  ;;  %v1013_v4 = vmax.f32 %v997_v15, %v1005_v53  ;;  %v2512_v39 = vld [vmem:[#allocation7 + $0x1f4] ss:$8 sps:$4 sm:$0xff]   ;;  %v2510_v0 = vld [vmem:[#allocation7 + $0x1f0] ss:$8 sps:$4 sm:$0xff]  }
 0x273   : > { %v1016_v5 = vpack.c.bf16 %v1012_v57, %v1008_v54  ;;  %v1015_v7 = vpack.c.bf16 %v1011_v59, %v1007_v58  ;;  %v1083_v40 = vld [vmem:[%s3291_s6] sm:$0x3]  ;;  %v2513_v54 = vld [vmem:[#allocation8 + $0x40] sm:$0xff]   ;;  %v2515_v58 = vld [vmem:[#allocation8 + $0x48] sm:$0xff]  }
 0x274   : > { %v3179_v11 = vpack.c.bf16 %v1013_v4, %v1009_v3  ;;  %v1018_v12 = vpack.c.bf16 %v1014_v2, %v1010_v8  ;;  %v1088_v1 = vrot.slane %v1083_v40, %v3102_v55  ;;  %v1092_v41 = vrot.slane %v1083_v40, %v3104_v56  ;;  %v2514_v57 = vld [vmem:[#allocation8] sm:$0xff]   ;;  %2211 = vmatprep.subr.bf16.mxu1 %v2513_v54  ;;  %v2516_v59 = vld [vmem:[#allocation8 + $0x8] sm:$0xff]   ;;  %v2517_v2 = vld [vmem:[#allocation8 + $0x50] sm:$0xff]  }
 0x275   : > { %1447 = vmatprep.mubr.bf16.mxu0 %v1016_v5  ;;  %2212 = vmatpush3.bf16.msra.mxu1 %v2514_v57  ;;  %v2518_v3 = vld [vmem:[#allocation8 + $0x10] sm:$0xff]   ;;  %v2519_v4 = vld [vmem:[#allocation8 + $0x58] sm:$0xff]   ;;  %v2523_v8 = vld [vmem:[#allocation8 + $0x68] sm:$0xff]  }
 0x276   : > { %1448 = vmatmul.mubr.bf16.vlgmr.msra.gmra.mrb[0].mxu0 %v1015_v7  ;;  %2213 = vmatprep.subr.bf16.mxu1 %v2515_v58  ;;  %v2520_v5 = vld [vmem:[#allocation8 + $0x18] sm:$0xff]   ;;  %v2522_v7 = vld [vmem:[#allocation8 + $0x20] sm:$0xff]   ;;  %v2167_v57 = vld [vmem:[%s3338_s11] ss:$0 sm:$0xff] }
 0x277   : > { %1459 = vmatpush1.bf16.msra.mxu0 %v2465_v6  ;;  %1490 = vmatprep.mubr.bf16.mxu0 %v1018_v12  ;;  %v2521_v6 = vld [vmem:[#allocation8 + $0x60] sm:$0xff]   ;;  %v2526_v12 = vld [vmem:[#allocation8 + $0x30] sm:$0xff]  }
 0x278   : > { %1460 = vmatprep.subr.bf16.mxu0 %v2470_v10  ;;  %v2524_v10 = vld [vmem:[#allocation8 + $0x28] sm:$0xff]  }
 0x279   : > { %2214 = vmatpush3.bf16.msra.mxu1 %v2516_v59 }
 0x27a   : > { %2215 = vmatprep.subr.bf16.mxu1 %v2517_v2 }
 0x27b   : > { %1461 = vmatpush1.bf16.msra.mxu0 %v2468_v14  ;;  %v2527_v14 = vld [vmem:[#allocation8 + $0x78] sm:$0xff]  }
 0x27c   : > { %1462 = vmatprep.subr.bf16.mxu0 %v2473_v16  ;;  %v2528_v16 = vld [vmem:[#allocation8 + $0x38] sm:$0xff]  }
 0x27d   : > { %2216 = vmatpush3.bf16.msra.mxu1 %v2518_v3 }
 0x27e   : > { %2217 = vmatprep.subr.bf16.mxu1 %v2519_v4 }
 0x27f   : > { %1463 = vmatpush1.bf16.msra.mxu0 %v2471_v17 }
 0x280   : > { %1464 = vmatprep.subr.bf16.mxu0 %v2476_v18 }
 0x281   : > { %2218 = vmatpush3.bf16.msra.mxu1 %v2520_v5 }
 0x282   : > { %2219 = vmatprep.subr.bf16.mxu1 %v2521_v6 }
 0x283   : > { %1465 = vmatpush1.bf16.msra.mxu0 %v2474_v19 }
 0x284   : > { %1466 = vmatprep.subr.bf16.mxu0 %v2479_v21 }
 0x285   : > { %2220 = vmatpush3.bf16.msra.mxu1 %v2522_v7 }
 0x286   : > { %2221 = vmatprep.subr.bf16.mxu1 %v2523_v8 }
 0x287   : > { %1467 = vmatpush1.bf16.msra.mxu0 %v2477_v22 }
 0x288   : > { %1468 = vmatprep.subr.bf16.mxu0 %v2482_v23 }
 0x289   : > { %2222 = vmatpush3.bf16.msra.mxu1 %v2524_v10  ;;  %v2529_v10 = vld [vmem:[#allocation10] sm:$0xff]  }
 0x28b   : > { %1469 = vmatpush1.bf16.msra.mxu0 %v2480_v24 }
 0x28c   : > { %1470 = vmatprep.subr.bf16.mxu0 %v2485_v25 }
 0x28f   : > { %1471 = vmatpush1.bf16.msra.mxu0 %v2483_v26 }
 0x290   : > { %1472 = vmatprep.subr.bf16.mxu0 %v2488_v27 }
 0x293   : > { %1473 = vmatpush1.bf16.msra.mxu0 %v2486_v28 }
 0x294   : > { %1474 = vmatprep.subr.bf16.mxu0 %v2491_v29 }
 0x297   : > { %1475 = vmatpush1.bf16.msra.mxu0 %v2489_v30 }
 0x298   : > { %1476 = vmatprep.subr.bf16.mxu0 %v2494_v62 }
 0x29b   : > { %1477 = vmatpush1.bf16.msra.mxu0 %v2492_v9  ;;  %v1501_v9 = vld [vmem:[%s3292_s7] sm:$0x3] }
 0x29c   : > { %1478 = vmatprep.subr.bf16.mxu0 %v2497_v13  ;;  %v1502_v13 = vld [vmem:[%s3337_s8] sm:$0x3]  ;;  %s570_s8 = scalar_lea.vmem [#allocation11], %s2064_s18  ;;  %s1929_s18 = scalar_lea.sflag [#allocation4], %s3081_s1 }
 0x29d   : > { %s1942_s24 = sshll.u32 %s570_s8, 4  ;;  %s3236_s24 = int_to_ptr.vmem [resolvable:$true] %s1942_s24 }
 0x29e   : > { %s2691_s29 = scalar_lea.vmem %s3236_s24, 128  ;;  %p2698_p12 = scmp.lt.s32.totalorder %s3236_s24, %s2696_s27 }
 0x29f   : > { %1479 = vmatpush1.bf16.msra.mxu0 %v2495_v31  ;;  %p2692_p3 = scmp.ne.s32.totalorder %s3236_s24, %s2691_s29 }
 0x2a0   : > { %1480 = vmatprep.subr.bf16.mxu0 %v2500_v63 }
 0x2a1   : > { %p2693_p5 = pnand %p2692_p3, %p3026_p10 }
 0x2a3   : > { %1481 = vmatpush1.bf16.msra.mxu0 %v2498_v32  ;;  %v1544_v32 = vrot.slane %v1501_v9, %v3102_v55  ;;  %p2694_p7 = pneg %p2693_p5 }
 0x2a4   : > { %1482 = vmatprep.subr.bf16.mxu0 %v2503_v33  ;;  %v1548_v33 = vrot.slane %v1501_v9, %v3104_v56 }
 0x2a7   : > { %1483 = vmatpush1.bf16.msra.mxu0 %v2501_v34 }
 0x2a8   : > { %1484 = vmatprep.subr.bf16.mxu0 %v2506_v35  ;;  %v1559_v35 = vrot.slane %v1502_v13, %v3102_v55 }
 0x2ab   : > { %1485 = vmatpush1.bf16.msra.mxu0 %v2504_v36  ;;  %v1563_v36 = vrot.slane %v1502_v13, %v3104_v56 }
 0x2ac   : > { %1486 = vmatprep.subr.bf16.mxu0 %v2509_v37 }
 0x2af   : > { %1487 = vmatpush1.bf16.msra.mxu0 %v2507_v38 }
 0x2b0   : > { %1488 = vmatprep.subr.bf16.mxu0 %v2512_v39 }
 0x2b3   : > { %1489 = vmatpush1.bf16.msra.mxu0 %v2510_v0 }
 0x2b6   : > { %1491 = vmatmul.mubr.bf16.vlgmr.msra.gmra.mrb[0].mxu0 %v3179_v11  ;;  %v2525_v11 = vld [vmem:[#allocation8 + $0x70] sm:$0xff]  }
 0x2b7   : > { %2223 = vmatprep.subr.bf16.mxu1 %v2525_v11  ;;  %v2779_v11 = vmov 0.0  }
 0x2b8   : > { %2224 = vmatpush3.bf16.msra.mxu1 %v2526_v12  ;;  %v2530_v12 = vld [vmem:[#allocation10 + $0x8] sm:$0xff]  }
 0x2b9   : > { %2225 = vmatprep.subr.bf16.mxu1 %v2527_v14  ;;  %v2531_v14 = vld [vmem:[#allocation10 + $0x10] sm:$0xff]  }
 0x2bc   : > { %2226 = vmatpush3.bf16.msra.mxu1 %v2528_v16  ;;  %v2532_v16 = vld [vmem:[#allocation10 + $0x18] sm:$0xff]  }
 0x2bd   : > { %2242 = vmatprep.subr.bf16.mxu1 %v2779_v11 }
 0x389   : > { %v1492_v61 = vpop.f32.mrb[0].mxu0 }
 0x38a   : > { %v3187_v42 = vadd.f32 %v1492_v61, %v1088_v1  ;;  %v1494_v60 = vpop.f32.mrb[1].mxu0 }
 0x38b   : > { %v3189_v43 = vadd.f32 %v1494_v60, %v1092_v41  ;;  %v1496_v44 = vpop.f32.mrb[2].mxu0 }
 0x38c   : > { %v3191_v45 = vadd.f32 %v1496_v44, %v1088_v1  ;;  %v1498_v46 = vpop.f32.mrb[3].mxu0  ;;  %v1512_v15 = vmul.f32 %v3187_v42, %v3187_v42 }
 0x38d   : > { %v3193_v47 = vadd.f32 %v1498_v46, %v1092_v41  ;;  %v1503_v48 = vadd.f32 %v3189_v43, %v3187_v42  ;;  %v1513_v49 = vmul.f32 %v3189_v43, %v3189_v43 }
 0x38e   : > { %v1514_v50 = vmul.f32 %v3191_v45, %v3191_v45 }
 0x38f   : > { %1504 = vadd.xlane.f32.xlu0 %v1503_v48  ;;  %v1506_v20 = vadd.f32 %v3193_v47, %v3191_v45  ;;  %v1515_v51 = vmul.f32 %v3193_v47, %v3193_v47  ;;  %v1516_v52 = vadd.f32 %v1513_v49, %v1512_v15 }
 0x391   : > { %1507 = vadd.xlane.f32.xlu1 %v1506_v20  ;;  %v1519_v53 = vadd.f32 %v1515_v51, %v1514_v50 }
 0x393   : > { %1517 = vadd.xlane.f32.xlu0 %v1516_v52 }
 0x395   : > { %1520 = vadd.xlane.f32.xlu1 %v1519_v53 }
 0x41c   : > { %v1505_v17 = vpop.xlane.xlu0 %1504 }
 0x41d   : > { %v1510_v18 = vmul.f32 0.00390625, %v1505_v17  ;;  %v2533_v17 = vld [vmem:[#allocation10 + $0x20] sm:$0xff]  }
 0x41e   : > { %v1508_v19 = vpop.xlane.xlu1 %1507 }
 0x41f   : > { %v1511_v21 = vmul.f32 0.00390625, %v1508_v19  ;;  %v1524_v23 = vmul.f32 %v1510_v18, %v1510_v18  ;;  %v1528_v31 = vsub.f32 %v3187_v42, %v1510_v18  ;;  %v1529_v63 = vsub.f32 %v3189_v43, %v1510_v18  ;;  %v2534_v18 = vld [vmem:[#allocation10 + $0x28] sm:$0xff]   ;;  %v2535_v19 = vld [vmem:[#allocation10 + $0x30] sm:$0xff]  }
 0x420   : > { %v1518_v22 = vpop.xlane.xlu0 %1517 }
 0x421   : > { %v1522_v24 = vmul.f32 0.00390625, %v1518_v22  ;;  %v1525_v27 = vmul.f32 %v1511_v21, %v1511_v21  ;;  %v1530_v37 = vsub.f32 %v3191_v45, %v1511_v21  ;;  %v1531_v38 = vsub.f32 %v3193_v47, %v1511_v21  ;;  %v2536_v21 = vld [vmem:[#allocation10 + $0x38] sm:$0xff]  }
 0x422   : > { %v1521_v25 = vpop.xlane.xlu1 %1520 }
 0x423   : > { %v1526_v26 = vsub.f32 %v1522_v24, %v1524_v23  ;;  %v1523_v28 = vmul.f32 0.00390625, %v1521_v25 }
 0x425   : > { %v1532_v29 = vadd.f32 1e-05, %v1526_v26  ;;  %v1527_v30 = vsub.f32 %v1523_v28, %v1525_v27 }
 0x427   : > { %2541 = vrsqrt.f32 %v1532_v29  ;;  %v1533_v62 = vadd.f32 1e-05, %v1527_v30 }
 0x429   : > { %2543 = vrsqrt.f32 %v1533_v62 }
 0x431   : > { %v2542_v34 = vpop.eup %2541 }
 0x432   : > { %v1536_v39 = vmul.f32 %v2542_v34, %v1528_v31  ;;  %v1537_v0 = vmul.f32 %v2542_v34, %v1529_v63  ;;  %v2184_v34 = vld [vmem:[%s3339_s10] ss:$0 sm:$0xff]  ;;  %s3241_s10 = scalar_lea.hbm %s3342_s16, %s2205_s26 }
 0x433   : > { %v2544_v40 = vpop.eup %2543 }
 0x434   : > { %v1538_v1 = vmul.f32 %v2544_v40, %v1530_v37  ;;  %v1539_v41 = vmul.f32 %v2544_v40, %v1531_v38  ;;  %v1552_v61 = vmul.f32 %v1548_v33, %v1537_v0  ;;  %v1551_v42 = vmul.f32 %v1544_v32, %v1536_v39  ;;  %v2185_v38 = vld [vmem:[%s3340_s30] ss:$0 sm:$0xff]  ;;  %s2697_s30 = scalar_lea.vmem %s2696_s27, 256 }
 0x435   : > { %p2699_p2 = scmp.lt.s32.totalorder %s2697_s30, %s2691_s29 }
 0x436   : > { %v1554_v60 = vmul.f32 %v1548_v33, %v1539_v41  ;;  %v1567_v43 = vadd.f32 %v1563_v36, %v1552_v61  ;;  %v1553_v44 = vmul.f32 %v1544_v32, %v1538_v1  ;;  %v1566_v46 = vadd.f32 %v1559_v35, %v1551_v42 }
 0x437   : > { %p2700_p1 = por %p2699_p2, %p2698_p12 }
 0x438   : > { %v1569_v48 = vadd.f32 %v1563_v36, %v1554_v60  ;;  %v1571_v15 = vmul.f32 0.2, %v1567_v43  ;;  %v1568_v55 = vadd.f32 %v1559_v35, %v1553_v44  ;;  %v1570_v49 = vmul.f32 0.2, %v1566_v46 }
 0x439   : > { %p2701_p13 = pnand %p2700_p1, %p2694_p7 }
 0x43a   : > { %v1573_v56 = vmul.f32 0.2, %v1569_v48  ;;  %v1572_v20 = vmul.f32 0.2, %v1568_v55  ;;  %v1575_v45 = vmax.f32 %v1567_v43, %v1571_v15  ;;  %v1574_v47 = vmax.f32 %v1566_v46, %v1570_v49  ;;  %v2186_v46 = vld [vmem:[%s3341_s14] ss:$0 sm:$0xff] }
 0x43c   : > { %v1577_v50 = vmax.f32 %v1569_v48, %v1573_v56  ;;  %v1576_v51 = vmax.f32 %v1568_v55, %v1572_v20 }
 0x43e   : > { %v1579_v52 = vpack.c.bf16 %v1577_v50, %v1575_v45  ;;  %v1578_v53 = vpack.c.bf16 %v1576_v51, %v1574_v47 }
 0x440   : > { %1747 = vmatprep.mubr.bf16.mxu1 %v1579_v52 }
 0x441   : > { %1748 = vmatmul.mubr.bf16.vlgmr.msra.gmra.mrb[8].mxu1 %v1578_v53 }
 0x442   : > { %2243 = vmatpush3.bf16.msra.mxu1 %v2529_v10  ;;  %2258 = vmatprep.mubr.msk.bf16.mxu1 %vm2780_vm0, %v2779_v11 }
 0x443   : > { %2244 = vmatprep.subr.bf16.mxu1 %v2779_v11 }
 0x446   : > { %2245 = vmatpush3.bf16.msra.mxu1 %v2530_v12 }
 0x447   : > { %2246 = vmatprep.subr.bf16.mxu1 %v2779_v11 }
 0x44a   : > { %2247 = vmatpush3.bf16.msra.mxu1 %v2531_v14 }
 0x44b   : > { %2248 = vmatprep.subr.bf16.mxu1 %v2779_v11 }
 0x44e   : > { %2249 = vmatpush3.bf16.msra.mxu1 %v2532_v16 }
 0x44f   : > { %2250 = vmatprep.subr.bf16.mxu1 %v2779_v11 }
 0x452   : > { %2251 = vmatpush3.bf16.msra.mxu1 %v2533_v17 }
 0x453   : > { %2252 = vmatprep.subr.bf16.mxu1 %v2779_v11 }
 0x456   : > { %2253 = vmatpush3.bf16.msra.mxu1 %v2534_v18 }
 0x457   : > { %2254 = vmatprep.subr.bf16.mxu1 %v2779_v11 }
 0x45a   : > { %2255 = vmatpush3.bf16.msra.mxu1 %v2535_v19 }
 0x45b   : > { %2256 = vmatprep.subr.bf16.mxu1 %v2779_v11 }
 0x45e   : > { %2257 = vmatpush3.bf16.msra.mxu1 %v2536_v21 }
 0x514   : > { %v2227_v54 = vpop.f32.mrb[8].mxu1 }
 0x515   : > { %v2228_v58 = vpop.f32.mrb[9].mxu1 }
 0x516   : > { %v2229_v59 = vadd.f32 %v2228_v58, %v2227_v54  ;;  %v2230_v2 = vpop.f32.mrb[10].mxu1 }
 0x517   : > { %v2231_v3 = vpop.f32.mrb[11].mxu1 }
 0x518   : > { %v1750_v4 = vadd.f32 %v2229_v59, %v2167_v57  ;;  %v2232_v5 = vadd.f32 %v2231_v3, %v2230_v2 }
 0x51a   : > { %v1753_v6 = vadd.f32 %v2232_v5, %v2167_v57  ;;  %1758 = vadd.xlane.f32.xlu0 %v1750_v4  ;;  %v1765_v7 = vmul.f32 %v1750_v4, %v1750_v4 }
 0x51c   : > { %1760 = vadd.xlane.f32.xlu1 %v1753_v6  ;;  %v1766_v8 = vmul.f32 %v1753_v6, %v1753_v6 }
 0x51e   : > { %1767 = vadd.xlane.f32.xlu0 %v1765_v7 }
 0x520   : > { %1769 = vadd.xlane.f32.xlu1 %v1766_v8 }
 0x5a7   : > { %v1759_v22 = vpop.xlane.xlu0 %1758 }
 0x5a8   : > { %v1763_v23 = vmul.f32 0.0078125, %v1759_v22 }
 0x5a9   : > { %v1761_v24 = vpop.xlane.xlu1 %1760 }
 0x5aa   : > { %v1764_v25 = vmul.f32 0.0078125, %v1761_v24  ;;  %v1773_v27 = vmul.f32 %v1763_v23, %v1763_v23  ;;  %v1777_v32 = vsub.f32 %v1750_v4, %v1763_v23 }
 0x5ab   : > { %v1768_v26 = vpop.xlane.xlu0 %1767 }
 0x5ac   : > { %v1771_v28 = vmul.f32 0.0078125, %v1768_v26  ;;  %v1774_v30 = vmul.f32 %v1764_v25, %v1764_v25  ;;  %v1778_v35 = vsub.f32 %v1753_v6, %v1764_v25 }
 0x5ad   : > { %v1770_v29 = vpop.xlane.xlu1 %1769 }
 0x5ae   : > { %v1775_v62 = vsub.f32 %v1771_v28, %v1773_v27  ;;  %v1772_v9 = vmul.f32 0.0078125, %v1770_v29 }
 0x5b0   : > { %v1779_v13 = vadd.f32 1e-05, %v1775_v62  ;;  %v1776_v31 = vsub.f32 %v1772_v9, %v1774_v30 }
 0x5b2   : > { %2545 = vrsqrt.f32 %v1779_v13  ;;  %v1780_v63 = vadd.f32 1e-05, %v1776_v31 }
 0x5b4   : > { %2547 = vrsqrt.f32 %v1780_v63 }
 0x5bc   : > { %v2546_v33 = vpop.eup %2545 }
 0x5bd   : > { %v1783_v36 = vmul.f32 %v2546_v33, %v1777_v32 }
 0x5be   : > { %v2548_v37 = vpop.eup %2547 }
 0x5bf   : > { %v1784_v39 = vmul.f32 %v2548_v37, %v1778_v35  ;;  %v1791_v0 = vmul.f32 %v2184_v34, %v1783_v36 }
 0x5c1   : > { %v1792_v40 = vmul.f32 %v2184_v34, %v1784_v39  ;;  %v1799_v1 = vadd.f32 %v2185_v38, %v1791_v0 }
 0x5c3   : > { %v1800_v41 = vadd.f32 %v2185_v38, %v1792_v40  ;;  %v1801_v61 = vmul.f32 0.2, %v1799_v1 }
 0x5c5   : > { %v1802_v42 = vmul.f32 0.2, %v1800_v41  ;;  %v1803_v60 = vmax.f32 %v1799_v1, %v1801_v61 }
 0x5c7   : > { %v1804_v43 = vmax.f32 %v1800_v41, %v1802_v42 }
 0x5c9   : > { %v1805_v44 = vpack.c.bf16 %v1804_v43, %v1803_v60 }
 0x5cb   : > { %2259 = vmatmul.mubr.bf16.vlgmr.msra.gmra.mrb[12].mxu1 %v1805_v44 }
 0x69e   : > { %v1911_v48 = vpop.f32.mrb[12].mxu1 }
 0x69f   : > { %v2260_v15 = vpop.f32.mrb[13].mxu1  ;;  %v1912_v49 = vadd.f32 %v2186_v46, %v1911_v48 }
 0x6a0   : > { %v1914_v55 = vpop.f32.mrb[14].mxu1 }
 0x6a1   : > { %v1915_v56 = vadd.f32 %v2186_v46, %v1914_v55  ;;  %v2261_v20 = vpop.f32.mrb[15].mxu1 }
 0x6a3   : > { %v2209_v45 = vpack.c.bf16 %v1915_v56, %v1912_v49 }
 0x6a5   : > { %2210 = vst [vmem:[%s570_s8] sm:$0xff] %v2209_v45  }
 0x6a6   : > { %2704 = shalt.err (!%p2701_p13)
}
 0x6a7   : > { %s2705_s23 = scalar_lea.hbm %s3241_s10, 128  ;;  %s2709_s8 = scalar_lea.hbm %s3342_s16, 256 }
 0x6a8   : > { %p2706_p9 = scmp.ne.s32.totalorder %s3241_s10, %s2705_s23  ;;  %p2710_p4 = scmp.lt.u32.totalorder %s3241_s10, %s3342_s16 }
 0x6a9   : > { %p2711_p8 = scmp.lt.u32.totalorder %s2709_s8, %s2705_s23  ;;  %p2713_p3 = scmp.lt.u32.totalorder %s2705_s23, %s3241_s10 }
 0x6aa   : > { %p2707_p0 = pnand %p2706_p9, %p3026_p10 }
 0x6ab   : > { %p2712_p6 = por %p2711_p8, %p2710_p4 }
 0x6ac   : > { %p2708_p11 = pneg %p2707_p0 }
 0x6ad   : > { %p2714_p5 = por %p2713_p3, %p2712_p6 }
 0x6af   : > { %p2715_p7 = pnand %p2714_p5, %p2708_p11 }
 0x6b1   : > { %2718 = shalt.err (!%p2715_p7)
}
 0x6b2   : > { %s2782_s12 = smov 64   ;;  %s2783_s29 = smov 4  }
 0x6b3   : > { %2288 = dma.vmem_to_hbm [thread:$0]  (%p3026_p10), %s3236_s24, 128, %s3241_s10, %s1929_s18, %s2782_s12, %s2782_s12, %s2783_s29  }
 0x6b4 PF: > { %s3343_s22 = sld [smem:[#allocation16_spill]]  ;;  %s3344_s27 = sld [smem:[#allocation17_spill]] }
 0x6b5   : > { %p3346_p2 = scmp.ge.s32.totalorder %s2765_s21, 2 }
 0x6ba   : > { %s1957_s30 = sand.u32 1, %s3343_s22   ;;  %p3345_p12 = scmp.ne.s32.totalorder %s3344_s27, 0 }
 0x6bb   : > { %s1958_s23 = scalar_lea.sflag [#allocation4], %s1957_s30 }
 0x6bc   : > { %p2308_p1 = pnand %p3346_p2, %p3345_p12 }
 0x6be   : > { %2748 = dma.done.wait (!%p2308_p1), %s1958_s23, 128  }
 0x6bf   : > { %2750 = vsyncadd (!%p2308_p1), %s1958_s23, 4294967168  ;;  %p30_p13 = scmp.ge.s32.totalorder %s3016_s15, 4   ;;  %s3347_s18 = smov %s2757_s19 }
 0x6c0   : > { %s3348_s19 = smov %s2761_s20  ;;  %s3349_s20 = smov %s3032_s25 }
 0x6c1   : > { %s3350_s21 = smov %s3016_s15  ;;  %32 = sbr.rel (!%p30_p13) target bundleno = 15 (0xf), region = 141 }
 0x6c8   :  { %1963 = vsyncpa [#allocation3], 1 }
 0x6c9   :  { %1965 = vsyncpa [#allocation3 + $0x1], 1 }
 0x6ca   :  { %1966 = vsyncpa [#allocation6], 1 }
 0x6cb   :  { %1967 = vsyncpa [#allocation9], 1 }
 0x6cc   :  { %1968 = vsyncpa [#allocation4], 1 }
 0x6cd   :  { %1970 = vsyncpa [#allocation4 + $0x1], 1 }

// kernel: tpu_custom_call.1
= control target key start
LH: loop header
LB: loop body
LE: loop exit
PB: predicated region body
PF: predicated region fallthrough
CT: control target
= control target key end

     0   :  { %s3285_s0 = inlined_call_operand.hbm [shape: bf16[32,128], index: 0, kind: input, shape index: {}]   ;;  %s3286_s1 = inlined_call_operand.hbm [shape: bf16[128,512], index: 1, kind: input, shape index: {}]   ;;  %s3287_s2 = inlined_call_operand.vmem [shape: f32[1,512], index: 2, kind: input, shape index: {}]   ;;  %s3288_s3 = inlined_call_operand.vmem [shape: f32[1,512], index: 3, kind: input, shape index: {}]   ;;  %s3289_s4 = inlined_call_operand.vmem [shape: f32[1,512], index: 4, kind: input, shape index: {}]   ;;  %s3290_s5 = inlined_call_operand.hbm [shape: bf16[512,256], index: 5, kind: input, shape index: {}]   ;;  %s3291_s6 = inlined_call_operand.vmem [shape: f32[1,256], index: 6, kind: input, shape index: {}]   ;;  %s3292_s7 = inlined_call_operand.vmem [shape: f32[1,256], index: 7, kind: input, shape index: {}]   ;;  %s3293_s8 = inlined_call_operand.vmem [shape: f32[1,256], index: 8, kind: input, shape index: {}]   ;;  %s3294_s9 = inlined_call_operand.hbm [shape: bf16[256,128], index: 9, kind: input, shape index: {}]   ;;  %s3295_s10 = inlined_call_operand.vmem [shape: f32[1,128], index: 10, kind: input, shape index: {}]   ;;  %s3296_s11 = inlined_call_operand.vmem [shape: f32[1,128], index: 11, kind: input, shape index: {}]   ;;  %s3297_s12 = inlined_call_operand.vmem [shape: f32[1,128], index: 12, kind: input, shape index: {}]   ;;  %s3298_s13 = inlined_call_operand.hbm [shape: bf16[128,128], index: 13, kind: input, shape index: {}]   ;;  %s3299_s14 = inlined_call_operand.vmem [shape: f32[1,128], index: 14, kind: input, shape index: {}]   ;;  %s3300_s15 = inlined_call_operand.hbm [shape: bf16[32,128], index: 15, kind: output, shape index: {}]  }
   0x1   :  { %3311 = sst [smem:[#allocation18_spill]] %s3286_s1 }
   0x2   :  { %3312 = sst [smem:[#allocation19_spill]] %s3293_s8 }
   0x3   :  { %3313 = sst [smem:[#allocation20_spill]] %s3295_s10 }
   0x4   :  { %3314 = sst [smem:[#allocation21_spill]] %s3296_s11 }
   0x5   :  { %3315 = sst [smem:[#allocation22_spill]] %s3297_s12 }
   0x6   :  { %3316 = sst [smem:[#allocation23_spill]] %s3299_s14 }
   0x7   :  { %3317 = sst [smem:[#allocation24_spill]] %s3300_s15 }
   0x8   :  { %20 = vsyncpa [#allocation3], 0 }
   0x9   :  { %22 = vsyncpa [#allocation3 + $0x1], 0 }
   0xa   :  { %23 = vsyncpa [#allocation6], 0 }
   0xb   :  { %24 = vsyncpa [#allocation9], 0 }
   0xc   :  { %25 = vsyncpa [#allocation4], 0 }
   0xd   :  { %27 = vsyncpa [#allocation4 + $0x1], 0  ;;  %s2864_s18 = smov 0   ;;  %s2866_s19 = smov 0  }
   0xe   :  { %s2868_s20 = smov 0   ;;  %s2870_s21 = smov 0  }
   0xf LB: > { %3318 = sst [smem:[#allocation16_spill]] %s2753_s18  ;;  %s2885_s22 = sadd.s32 4294967295, %s2765_s21   ;;  %s2765_s21 = sphi %s2870_s21, %s3350_s21   ;;  %s2761_s20 = sphi %s2868_s20, %s3349_s20   ;;  %s2757_s19 = sphi %s2866_s19, %s3348_s19   ;;  %s2753_s18 = sphi %s2864_s18, %s3347_s18  }
  0x10   : > { %s2053_s23 = sadd.s32 4294967294, %s2765_s21   ;;  %p53_p0 = scmp.ne.s32.totalorder %s2757_s19, %s2753_s18 }
  0x11   : > { %p3304_p1 = scmp.eq.s32.totalorder %s2885_s22, 0  ;;  %p377_p3 = scmp.eq.s32.totalorder %s2053_s23, 1 }
  0x12   : > { %p2054_p5 = scmp.ge.s32.totalorder %s2765_s21, 1  ;;  %p384_p7 = scmp.lt.s32.totalorder %s2765_s21, 3 }
  0x13   : > { %p2894_p4 = por %p3304_p1, %p53_p0  ;;  %p2899_p6 = por %p377_p3, %p53_p0 }
  0x14   : > { %p2904_p8 = pnand %p2054_p5, %p384_p7  ;;  %s2767_s27 = smov [#allocation5]  }
  0x15   : > { %s3319_s24 = scalar_select %p2894_p4, 1, 0 }
  0x16   : > { %s3320_s25 = scalar_select %p2899_p6, 1, 0 }
  0x17   : > { %s3322_s26 = scalar_select %p2904_p8, 1, 0 }
  0x18   : > { %3321 = sst [smem:[#allocation17_spill]] %s3320_s25  ;;  %s396_s28 = sshll.u32 %s2767_s27, 4  ;;  %s2908_s28 = int_to_ptr.vmem [resolvable:$true] %s396_s28 }
  0x19   : > { %p2290_p9 = pneg %p2904_p8  ;;  %s2768_s30 = smov [#allocation8]  }
  0x1a   : > { %s440_s16 = sshll.u32 %s2768_s30, 4  ;;  %s3324_s1 = sld [smem:[#allocation18_spill]]  ;;  %s2919_s16 = int_to_ptr.vmem [resolvable:$true] %s440_s16 }
  0x1b   : > { %p2915_p11 = pnand %p2290_p9, %p3304_p1 }
  0x1d   : > { %p2929_p13 = pneg %p2915_p11 }
  0x20   : > { %s2549_s25 = scalar_lea.hbm %s3324_s1, 4096 }
  0x21   : > { %p2550_p12 = scmp.ne.s32.totalorder %s3324_s1, %s2549_s25  ;;  %p2556_p5 = scmp.lt.u32.totalorder %s2549_s25, %s3324_s1 }
  0x23   : > { %p2552_p0 = pnand %p2929_p13, %p2550_p12 }
  0x25   : > { %p2553_p3 = pneg %p2552_p0 }
  0x27   : > { %p2558_p7 = pnand %p2556_p5, %p2553_p3 }
  0x29   : > { %2561 = shalt.err (!%p2558_p7)
}
  0x2a   : > { %s2562_s18 = scalar_lea.vmem %s2908_s28, 4096  ;;  %p2570_p2 = scmp.lt.s32.totalorder %s2908_s28, %s2908_s28 }
  0x2b   : > { %p2563_p9 = scmp.ne.s32.totalorder %s2908_s28, %s2562_s18  ;;  %p2571_p6 = scmp.lt.s32.totalorder %s2562_s18, %s2562_s18 }
  0x2d   : > { %p2565_p10 = pnand %p2563_p9, %p2929_p13  ;;  %p2572_p12 = por %p2571_p6, %p2570_p2 }
  0x2f   : > { %p2566_p1 = pneg %p2565_p10 }
  0x31   : > { %p2573_p0 = pnand %p2572_p12, %p2566_p1 }
  0x33   : > { %2576 = shalt.err (!%p2573_p0)
}
  0x34   : > { %s2769_s17 = smov 256   ;;  %s2770_s14 = smov 16  }
  0x35   : > { %2293 = dma.hbm_to_vmem [thread:$0]  (!%p2915_p11), %s3324_s1, 4096, %s2908_s28, [#allocation6], %s2769_s17, %s2769_s17, %s2770_s14  }
  0x36   : > { %s2577_s12 = scalar_lea.hbm %s3294_s9, 2048 }
  0x37   : > { %p2578_p2 = scmp.ne.s32.totalorder %s3294_s9, %s2577_s12  ;;  %p2584_p10 = scmp.lt.u32.totalorder %s2577_s12, %s3294_s9 }
  0x39   : > { %p2580_p1 = pnand %p2578_p2, %p2929_p13 }
  0x3b   : > { %p2581_p6 = pneg %p2580_p1 }
  0x3d   : > { %p2586_p3 = pnand %p2584_p10, %p2581_p6 }
  0x3f   : > { %2589 = shalt.err (!%p2586_p3)
}
  0x40   : > { %s2590_s28 = scalar_lea.vmem %s2919_s16, 2048  ;;  %p2598_p12 = scmp.lt.s32.totalorder %s2919_s16, %s2919_s16 }
  0x41   : > { %p2591_p5 = scmp.ne.s32.totalorder %s2919_s16, %s2590_s28  ;;  %p2599_p0 = scmp.lt.s32.totalorder %s2590_s28, %s2590_s28 }
  0x43   : > { %p2593_p7 = pnand %p2591_p5, %p2929_p13  ;;  %p2600_p2 = por %p2599_p0, %p2598_p12 }
  0x45   : > { %p2594_p9 = pneg %p2593_p7 }
  0x47   : > { %p2601_p1 = pnand %p2600_p2, %p2594_p9 }
  0x49   : > { %2604 = shalt.err (!%p2601_p1)
}
  0x4a   : > { %s3307_s10 = smov 64   ;;  %s3309_s8 = smov 4  }
  0x4b   : > { %2299 = dma.hbm_to_vmem [thread:$0]  (!%p2915_p11), %s3294_s9, 2048, %s2919_s16, [#allocation9], %s3307_s10, %s3307_s10, %s3309_s8  }
  0x4c   : > { %s2773_s17 = smov [#allocation7]   ;;  %s2605_s27 = scalar_lea.hbm %s3290_s5, 8192 }
  0x4d   : > { %s418_s14 = sshll.u32 %s2773_s17, 4  ;;  %p2606_p6 = scmp.ne.s32.totalorder %s3290_s5, %s2605_s27  ;;  %s419_s14 = int_to_ptr.vmem [resolvable:$true] %s418_s14 }
  0x4e   : > { %p2612_p5 = scmp.lt.u32.totalorder %s2605_s27, %s3290_s5 }
  0x4f   : > { %p2608_p10 = pnand %p2606_p6, %p2929_p13 }
  0x51   : > { %p2609_p3 = pneg %p2608_p10 }
  0x53   : > { %p2614_p7 = pnand %p2612_p5, %p2609_p3 }
  0x55   : > { %2617 = shalt.err (!%p2614_p7)
}
  0x56   : > { %s2618_s16 = scalar_lea.vmem %s419_s14, 8192  ;;  %p2626_p2 = scmp.lt.s32.totalorder %s419_s14, %s419_s14 }
  0x57   : > { %p2619_p9 = scmp.ne.s32.totalorder %s419_s14, %s2618_s16  ;;  %p2627_p1 = scmp.lt.s32.totalorder %s2618_s16, %s2618_s16 }
  0x59   : > { %p2621_p12 = pnand %p2619_p9, %p2929_p13  ;;  %p2628_p4 = por %p2627_p1, %p2626_p2 }
  0x5b   : > { %p2622_p0 = pneg %p2621_p12 }
  0x5d   : > { %p2629_p8 = pnand %p2628_p4, %p2622_p0 }
  0x5f   : > { %2632 = shalt.err (!%p2629_p8)
}
  0x60   : > { %s2774_s11 = smov 128   ;;  %s2775_s12 = smov 8  }
  0x61   : > { %2296 = dma.hbm_to_vmem [thread:$0]  (!%p2915_p11), %s3290_s5, 8192, %s419_s14, [#allocation6], %s2774_s11, %s2774_s11, %s2775_s12  }
  0x62   : > { %s2776_s25 = smov [#allocation10]   ;;  %s2633_s18 = scalar_lea.hbm %s3298_s13, 1024 }
  0x63   : > { %s462_s23 = sshll.u32 %s2776_s25, 4  ;;  %p2634_p4 = scmp.ne.s32.totalorder %s3298_s13, %s2633_s18  ;;  %s463_s23 = int_to_ptr.vmem [resolvable:$true] %s462_s23 }
  0x64   : > { %p2640_p10 = scmp.lt.u32.totalorder %s2633_s18, %s3298_s13 }
  0x65   : > { %p2636_p8 = pnand %p2634_p4, %p2929_p13 }
  0x67   : > { %p2637_p6 = pneg %p2636_p8 }
  0x69   : > { %p2642_p3 = pnand %p2640_p10, %p2637_p6 }
  0x6b   : > { %2645 = shalt.err (!%p2642_p3)
}
  0x6c   : > { %s2646_s14 = scalar_lea.vmem %s463_s23, 1024  ;;  %p2654_p12 = scmp.lt.s32.totalorder %s463_s23, %s463_s23 }
  0x6d   : > { %p2647_p5 = scmp.ne.s32.totalorder %s463_s23, %s2646_s14  ;;  %p2655_p0 = scmp.lt.s32.totalorder %s2646_s14, %s2646_s14 }
  0x6f   : > { %p2649_p7 = pnand %p2647_p5, %p2929_p13  ;;  %p2656_p2 = por %p2655_p0, %p2654_p12 }
  0x71   : > { %p2650_p9 = pneg %p2649_p7 }
  0x73   : > { %p2657_p1 = pnand %p2656_p2, %p2650_p9 }
  0x75   : > { %2660 = shalt.err (!%p2657_p1)
}
  0x76   : > { %s3326_s11 = smov 4   ;;  %s3327_s12 = smov 64  }
  0x77   : > { %2302 = dma.hbm_to_vmem [thread:$0]  (!%p2915_p11), %s3298_s13, 1024, %s463_s23, [#allocation9], %s3327_s12, %s3327_s12, %s3326_s11  }
  0x78   : > { %s3016_s15 = sadd.s32 1, %s2765_s21   ;;  %s40_s29 = sadd.s32 1, %s2761_s20 }
  0x79   : > { %s37_s1 = ssub.s32 %s2765_s21, %s3016_s15  ;;  %p47_p13 = scmp.ne.s32.totalorder %s2761_s20, %s2757_s19 }
  0x7a   : > { %p38_p4 = scmp.eq.s32.totalorder %s37_s1, 0  ;;  %p48_p8 = scmp.eq.s32.totalorder %s2765_s21, 0 }
  0x7b   : > { %p3328_p6 = scmp.eq.s32.totalorder %s2885_s22, 1  ;;  %p2315_p3 = scmp.lt.s32.totalorder %s2765_s21, 2 }
  0x7c   : > { %s3032_s25 = scalar_select %p38_p4, %s2761_s20, %s40_s29  }
  0x7d   : > { %p3026_p10 = por %p3328_p6, %p47_p13  ;;  %p49_p5 = por %p48_p8, %p47_p13 }
  0x7e   : > { %s479_s27 = sand.u32 1, %s2761_s20   ;;  %s2202_s23 = sshll.u32 %s2765_s21, 7 }
  0x7f   : > { %s2060_s30 = sshll.u32 %s479_s27, 3  ;;  %s3039_s16 = scalar_lea.hbm %s3285_s0, %s2202_s23 }
  0x80   : > { %s483_s14 = scalar_lea.vmem [#allocation2], %s2060_s30  ;;  %p3043_p11 = pnand %p2315_p3, %p49_p5 }
  0x81   : > { %s490_s10 = sshll.u32 %s483_s14, 4  ;;  %s3047_s29 = scalar_lea.sflag [#allocation3], %s479_s27  ;;  %s3041_s10 = int_to_ptr.vmem [resolvable:$true] %s490_s10 }
  0x82   : > { %s2661_s1 = scalar_lea.hbm %s3039_s16, 128  ;;  %p2663_p9 = pneg %p3043_p11 }
  0x83   : > { %p2662_p7 = scmp.ne.s32.totalorder %s3039_s16, %s2661_s1  ;;  %s2666_s18 = scalar_lea.hbm %s3285_s0, 256 }
  0x84   : > { %p2667_p2 = scmp.lt.u32.totalorder %s3039_s16, %s3285_s0  ;;  %p2668_p1 = scmp.lt.u32.totalorder %s2666_s18, %s2661_s1 }
  0x85   : > { %p2664_p12 = pnand %p2663_p9, %p2662_p7  ;;  %p2670_p4 = scmp.lt.u32.totalorder %s2661_s1, %s3039_s16 }
  0x86   : > { %p2669_p13 = por %p2668_p1, %p2667_p2 }
  0x87   : > { %p2665_p0 = pneg %p2664_p12 }
  0x88   : > { %p2671_p8 = por %p2670_p4, %p2669_p13 }
  0x8a   : > { %p2672_p6 = pnand %p2671_p8, %p2665_p0 }
  0x8c   : > { %2675 = shalt.err (!%p2672_p6)
}
  0x8d   : > { %s2676_s27 = scalar_lea.vmem %s3041_s10, 128  ;;  %s2777_s30 = smov [#allocation2]  }
  0x8e   : > { %p2677_p3 = scmp.ne.s32.totalorder %s3041_s10, %s2676_s27  ;;  %s2681_s23 = sshll.u32 %s2777_s30, 4  ;;  %s2682_s23 = int_to_ptr.vmem [resolvable:$false] %s2681_s23 }
  0x8f   : > { %s2683_s28 = scalar_lea.vmem %s2682_s23, 256  ;;  %p2684_p12 = scmp.lt.s32.totalorder %s3041_s10, %s2682_s23 }
  0x90   : > { %p2679_p5 = pnand %p2677_p3, %p2663_p9  ;;  %p2685_p2 = scmp.lt.s32.totalorder %s2683_s28, %s2676_s27 }
  0x92   : > { %p2680_p7 = pneg %p2679_p5  ;;  %p2686_p1 = por %p2685_p2, %p2684_p12 }
  0x94   : > { %p2687_p13 = pnand %p2686_p1, %p2680_p7 }
  0x96   : > { %2690 = shalt.err (!%p2687_p13)
}
  0x97   : > { %2306 = dma.hbm_to_vmem [thread:$0]  (!%p3043_p11), %s3039_s16, 128, %s3041_s10, %s3047_s29, %s3327_s12, %s3327_s12, %s3326_s11  }
  0x98   : > { %p3331_p9 = scmp.ne.s32.totalorder %s3322_s26, 0 }
  0x99   : > { %s3081_s1 = sand.u32 (!%p3331_p9), 1, %s2757_s19   ;;  %p3332_p0 = scmp.ne.s32.totalorder (!%p3331_p9), %s3319_s24, 0 }
  0x9a   : > { %502 = sbr.rel (%p3331_p9) target bundleno = 1716 (0x6b4), region = 80  ;;  %s2064_s18 = sshll.u32 (!%p3331_p9), %s3081_s1, 3 }
  0x9b   : > { %s505_s14 = scalar_lea.sflag (!%p3331_p9), [#allocation3], %s3081_s1  ;;  %s3087_s8 = scalar_lea.vmem (!%p3331_p9), [#allocation2], %s2064_s18 }
  0xa1   : > { %2736 = dma.done.wait (%p3332_p0), %s505_s14, 128  }
  0xa2   : > { %2738 = vsyncadd (%p3332_p0), %s505_s14, 4294967168  ;;  %p3333_p11 = scmp.eq.s32.totalorder %s2885_s22, 0 }
  0xa4   : > { %2740 = dma.done.wait (%p3333_p11), [#allocation6], 12288   ;;  %p3334_p4 = pmov %p3333_p11 }
  0xa6   : > { %2742 = vsyncadd (%p3334_p4), [#allocation6], 4294955008  ;;  %p3335_p8 = pmov %p3334_p4 }
  0xa7   : > { %p3336_p6 = pmov %p3334_p4 }
  0xa8   : > { %2744 = dma.done.wait (%p3335_p8), [#allocation9], 3072  }
  0xa9   : > { %2746 = vsyncadd (%p3336_p6), [#allocation9], 4294964224  ;;  %v2778_v0 = vmov 0   ;;  %v2368_v1 = vld [vmem:[#allocation5 + $0x4] ss:$16 sps:$4 sm:$0xff]   ;;  %v610_v53 = vlaneseq  ;;  %s3338_s11 = sld [smem:[#allocation20_spill]] }
  0xaa   : > { %828 = vmatprep.mubr.bf16.mxu1 %v2778_v0  ;;  %v2370_v2 = vld [vmem:[#allocation5] ss:$16 sps:$4 sm:$0xff]   ;;  %796 = vmatprep.subr.bf16.mxu1 %v2368_v1  ;;  %v2371_v3 = vld [vmem:[#allocation5 + $0x24] ss:$16 sps:$4 sm:$0xff]   ;;  %v2395_v17 = vld [vmem:[#allocation5 + $0xc] ss:$16 sps:$4 sm:$0xff]  }
  0xab   : > { %797 = vmatpush1.bf16.msra.mxu1 %v2370_v2  ;;  %v2373_v4 = vld [vmem:[#allocation5 + $0x20] ss:$16 sps:$4 sm:$0xff]   ;;  %v2374_v5 = vld [vmem:[#allocation5 + $0x44] ss:$16 sps:$4 sm:$0xff]   ;;  %v2393_v19 = vld [vmem:[#allocation5 + $0x8] ss:$16 sps:$4 sm:$0xff]  }
  0xac   : > { %798 = vmatprep.subr.bf16.mxu1 %v2371_v3  ;;  %v2376_v6 = vld [vmem:[#allocation5 + $0x40] ss:$16 sps:$4 sm:$0xff]   ;;  %v2377_v7 = vld [vmem:[#allocation5 + $0x64] ss:$16 sps:$4 sm:$0xff]   ;;  %v2398_v20 = vld [vmem:[#allocation5 + $0x2c] ss:$16 sps:$4 sm:$0xff]  }
  0xad   : > { %v2379_v8 = vld [vmem:[#allocation5 + $0x60] ss:$16 sps:$4 sm:$0xff]   ;;  %v2380_v9 = vld [vmem:[#allocation5 + $0x84] ss:$16 sps:$4 sm:$0xff]   ;;  %v2396_v21 = vld [vmem:[#allocation5 + $0x28] ss:$16 sps:$4 sm:$0xff]  }
  0xae   : > { %v2382_v10 = vld [vmem:[#allocation5 + $0x80] ss:$16 sps:$4 sm:$0xff]   ;;  %v2383_v11 = vld [vmem:[#allocation5 + $0xa4] ss:$16 sps:$4 sm:$0xff]   ;;  %v2401_v22 = vld [vmem:[#allocation5 + $0x4c] ss:$16 sps:$4 sm:$0xff]  }
  0xaf   : > { %799 = vmatpush1.bf16.msra.mxu1 %v2373_v4  ;;  %v2385_v12 = vld [vmem:[#allocation5 + $0xa0] ss:$16 sps:$4 sm:$0xff]   ;;  %v2386_v13 = vld [vmem:[#allocation5 + $0xc4] ss:$16 sps:$4 sm:$0xff]   ;;  %v2399_v23 = vld [vmem:[#allocation5 + $0x48] ss:$16 sps:$4 sm:$0xff]  }
  0xb0   : > { %800 = vmatprep.subr.bf16.mxu1 %v2374_v5  ;;  %v2388_v14 = vld [vmem:[#allocation5 + $0xc0] ss:$16 sps:$4 sm:$0xff]   ;;  %v2389_v15 = vld [vmem:[#allocation5 + $0xe4] ss:$16 sps:$4 sm:$0xff]   ;;  %v2404_v24 = vld [vmem:[#allocation5 + $0x6c] ss:$16 sps:$4 sm:$0xff]  }
  0xb1   : > { %v2391_v16 = vld [vmem:[#allocation5 + $0xe0] ss:$16 sps:$4 sm:$0xff]   ;;  %v2402_v25 = vld [vmem:[#allocation5 + $0x68] ss:$16 sps:$4 sm:$0xff]   ;;  %v2407_v26 = vld [vmem:[#allocation5 + $0x8c] ss:$16 sps:$4 sm:$0xff]  }
  0xb2   : > { %v2392_v18 = vld [vmem:[%s3087_s8] sm:$0xff]   ;;  %v2417_v34 = vld [vmem:[#allocation7 + $0x4] ss:$8 sps:$4 sm:$0xff]   ;;  %v2419_v35 = vld [vmem:[#allocation7] ss:$8 sps:$4 sm:$0xff]   ;;  %v611_v54 = vshrl.u32 %v610_v53, 7 }
  0xb3   : > { %801 = vmatpush1.bf16.msra.mxu1 %v2376_v6  ;;  %v2405_v27 = vld [vmem:[#allocation5 + $0x88] ss:$16 sps:$4 sm:$0xff]   ;;  %v2410_v28 = vld [vmem:[#allocation5 + $0xac] ss:$16 sps:$4 sm:$0xff]   ;;  %1415 = vmatprep.subr.bf16.mxu0 %v2417_v34  ;;  %v608_v57 = vld [vmem:[%s3287_s2] sm:$0xf] }
  0xb4   : > { %802 = vmatprep.subr.bf16.mxu1 %v2377_v7  ;;  %v2408_v29 = vld [vmem:[#allocation5 + $0xa8] ss:$16 sps:$4 sm:$0xff]   ;;  %v2413_v30 = vld [vmem:[#allocation5 + $0xcc] ss:$16 sps:$4 sm:$0xff]   ;;  %1416 = vmatpush1.bf16.msra.mxu0 %v2419_v35  ;;  %v3102_v55 = vsub.s32 0, %v611_v54  ;;  %v3104_v56 = vsub.s32 1, %v611_v54 }
  0xb5   : > { %v2411_v31 = vld [vmem:[#allocation5 + $0xc8] ss:$16 sps:$4 sm:$0xff]   ;;  %v2416_v32 = vld [vmem:[#allocation5 + $0xec] ss:$16 sps:$4 sm:$0xff]   ;;  %v3111_v60 = vsub.s32 2, %v611_v54  ;;  %v3113_v61 = vsub.s32 3, %v611_v54 }
  0xb6   : > { %v2414_v33 = vld [vmem:[#allocation5 + $0xe8] ss:$16 sps:$4 sm:$0xff]   ;;  %v2420_v36 = vld [vmem:[#allocation7 + $0x14] ss:$8 sps:$4 sm:$0xff]   ;;  %v2423_v38 = vld [vmem:[#allocation7 + $0x24] ss:$8 sps:$4 sm:$0xff]   ;;  %v613_v58 = vrot.slane %v608_v57, %v3102_v55  ;;  %v617_v59 = vrot.slane %v608_v57, %v3104_v56 }
  0xb7   : > { %803 = vmatpush1.bf16.msra.mxu1 %v2379_v8  ;;  %v2422_v37 = vld [vmem:[#allocation7 + $0x10] ss:$8 sps:$4 sm:$0xff]   ;;  %1417 = vmatprep.subr.bf16.mxu0 %v2420_v36  ;;  %v2425_v39 = vld [vmem:[#allocation7 + $0x20] ss:$8 sps:$4 sm:$0xff]   ;;  %v2426_v40 = vld [vmem:[#allocation7 + $0x34] ss:$8 sps:$4 sm:$0xff]   ;;  %v621_v2 = vrot.slane %v608_v57, %v3111_v60  ;;  %v625_v3 = vrot.slane %v608_v57, %v3113_v61 }
  0xb8   : > { %804 = vmatprep.subr.bf16.mxu1 %v2380_v9  ;;  %1418 = vmatpush1.bf16.msra.mxu0 %v2422_v37  ;;  %v2428_v41 = vld [vmem:[#allocation7 + $0x30] ss:$8 sps:$4 sm:$0xff]   ;;  %v2429_v42 = vld [vmem:[#allocation7 + $0x44] ss:$8 sps:$4 sm:$0xff]   ;;  %v2431_v43 = vld [vmem:[#allocation7 + $0x40] ss:$8 sps:$4 sm:$0xff]  }
  0xb9   : > { %1419 = vmatprep.subr.bf16.mxu0 %v2423_v38  ;;  %v2432_v44 = vld [vmem:[#allocation7 + $0x54] ss:$8 sps:$4 sm:$0xff]   ;;  %v2434_v45 = vld [vmem:[#allocation7 + $0x50] ss:$8 sps:$4 sm:$0xff]   ;;  %v2435_v46 = vld [vmem:[#allocation7 + $0x64] ss:$8 sps:$4 sm:$0xff]  }
  0xba   : > { %v2437_v47 = vld [vmem:[#allocation7 + $0x60] ss:$8 sps:$4 sm:$0xff]   ;;  %v2438_v48 = vld [vmem:[#allocation7 + $0x74] ss:$8 sps:$4 sm:$0xff]   ;;  %v2446_v36 = vld [vmem:[#allocation7 + $0x90] ss:$8 sps:$4 sm:$0xff]  }
  0xbb   : > { %805 = vmatpush1.bf16.msra.mxu1 %v2382_v10  ;;  %v2443_v34 = vld [vmem:[#allocation7 + $0x80] ss:$8 sps:$4 sm:$0xff]   ;;  %v2444_v35 = vld [vmem:[#allocation7 + $0x94] ss:$8 sps:$4 sm:$0xff]   ;;  %v2447_v37 = vld [vmem:[#allocation7 + $0xa4] ss:$8 sps:$4 sm:$0xff]  }
  0xbc   : > { %806 = vmatprep.subr.bf16.mxu1 %v2383_v11  ;;  %1420 = vmatpush1.bf16.msra.mxu0 %v2425_v39  ;;  %v2449_v38 = vld [vmem:[#allocation7 + $0xa0] ss:$8 sps:$4 sm:$0xff]   ;;  %v2450_v39 = vld [vmem:[#allocation7 + $0xb4] ss:$8 sps:$4 sm:$0xff]   ;;  %s3337_s8 = sld [smem:[#allocation19_spill]]  ;;  %vm2780_vm0 = vmmov 0  }
  0xbd   : > { %1421 = vmatprep.subr.bf16.mxu0 %v2426_v40  ;;  %v2452_v40 = vld [vmem:[#allocation7 + $0xb0] ss:$8 sps:$4 sm:$0xff]   ;;  %s3339_s10 = sld [smem:[#allocation21_spill]]  ;;  %s3340_s30 = sld [smem:[#allocation22_spill]] }
  0xbe   : > { %s3341_s14 = sld [smem:[#allocation23_spill]]  ;;  %s2205_s26 = sshll.u32 %s2885_s22, 7 }
  0xbf   : > { %807 = vmatpush1.bf16.msra.mxu1 %v2385_v12  ;;  %s3342_s16 = sld [smem:[#allocation24_spill]]  ;;  %s2781_s22 = smov [#allocation11]  }
  0xc0   : > { %808 = vmatprep.subr.bf16.mxu1 %v2386_v13  ;;  %1422 = vmatpush1.bf16.msra.mxu0 %v2428_v41  ;;  %v2453_v41 = vld [vmem:[#allocation7 + $0xc4] ss:$8 sps:$4 sm:$0xff]   ;;  %s2695_s27 = sshll.u32 %s2781_s22, 4  ;;  %s2696_s27 = int_to_ptr.vmem [resolvable:$false] %s2695_s27 }
  0xc1   : > { %1423 = vmatprep.subr.bf16.mxu0 %v2429_v42  ;;  %v2455_v42 = vld [vmem:[#allocation7 + $0xc0] ss:$8 sps:$4 sm:$0xff]  }
  0xc3   : > { %809 = vmatpush1.bf16.msra.mxu1 %v2388_v14 }
  0xc4   : > { %810 = vmatprep.subr.bf16.mxu1 %v2389_v15  ;;  %1424 = vmatpush1.bf16.msra.mxu0 %v2431_v43  ;;  %v2456_v43 = vld [vmem:[#allocation7 + $0xd4] ss:$8 sps:$4 sm:$0xff]  }
  0xc5   : > { %1425 = vmatprep.subr.bf16.mxu0 %v2432_v44  ;;  %v2458_v44 = vld [vmem:[#allocation7 + $0xd0] ss:$8 sps:$4 sm:$0xff]  }
  0xc7   : > { %811 = vmatpush1.bf16.msra.mxu1 %v2391_v16 }
  0xc8   : > { %839 = vmatprep.subr.bf16.mxu1 %v2395_v17  ;;  %1426 = vmatpush1.bf16.msra.mxu0 %v2434_v45  ;;  %v2459_v45 = vld [vmem:[#allocation7 + $0xe4] ss:$8 sps:$4 sm:$0xff]  }
  0xc9   : > { %1427 = vmatprep.subr.bf16.mxu0 %v2435_v46  ;;  %v2461_v46 = vld [vmem:[#allocation7 + $0xe0] ss:$8 sps:$4 sm:$0xff]  }
  0xca   : > { %829 = vmatmul.mubr.bf16.vlgmr.msra.gmra.mrb[0].mxu1 %v2392_v18 }
  0xcb   : > { %840 = vmatpush1.bf16.msra.mxu1 %v2393_v19  ;;  %871 = vmatprep.mubr.bf16.mxu1 %v2778_v0 }
  0xcc   : > { %841 = vmatprep.subr.bf16.mxu1 %v2398_v20  ;;  %1428 = vmatpush1.bf16.msra.mxu0 %v2437_v47  ;;  %v2462_v47 = vld [vmem:[#allocation7 + $0xf4] ss:$8 sps:$4 sm:$0xff]  }
  0xcd   : > { %1429 = vmatprep.subr.bf16.mxu0 %v2438_v48  ;;  %v2464_v48 = vld [vmem:[#allocation7 + $0xf0] ss:$8 sps:$4 sm:$0xff]  }
  0xcf   : > { %842 = vmatpush1.bf16.msra.mxu1 %v2396_v21 }
  0xd0   : > { %843 = vmatprep.subr.bf16.mxu1 %v2401_v22 }
  0xd3   : > { %844 = vmatpush1.bf16.msra.mxu1 %v2399_v23 }
  0xd4   : > { %845 = vmatprep.subr.bf16.mxu1 %v2404_v24 }
  0xd7   : > { %846 = vmatpush1.bf16.msra.mxu1 %v2402_v25 }
  0xd8   : > { %847 = vmatprep.subr.bf16.mxu1 %v2407_v26 }
  0xdb   : > { %848 = vmatpush1.bf16.msra.mxu1 %v2405_v27 }
  0xdc   : > { %849 = vmatprep.subr.bf16.mxu1 %v2410_v28 }
  0xdf   : > { %850 = vmatpush1.bf16.msra.mxu1 %v2408_v29 }
  0xe0   : > { %851 = vmatprep.subr.bf16.mxu1 %v2413_v30 }
  0xe3   : > { %852 = vmatpush1.bf16.msra.mxu1 %v2411_v31 }
  0xe4   : > { %853 = vmatprep.subr.bf16.mxu1 %v2416_v32  ;;  %v2440_v32 = vld [vmem:[#allocation7 + $0x70] ss:$8 sps:$4 sm:$0xff]  }
  0xe5   : > { %1430 = vmatpush1.bf16.msra.mxu0 %v2440_v32 }
  0xe7   : > { %854 = vmatpush1.bf16.msra.mxu1 %v2414_v33  ;;  %v2441_v33 = vld [vmem:[#allocation7 + $0x84] ss:$8 sps:$4 sm:$0xff]  }
  0xe8   : > { %1431 = vmatprep.subr.bf16.mxu0 %v2441_v33 }
  0xe9   : > { %1432 = vmatpush1.bf16.msra.mxu0 %v2443_v34 }
  0xea   : > { %872 = vmatmul.mubr.bf16.vlgmr.msra.gmra.mrb[4].mxu1 %v2392_v18  ;;  %1433 = vmatprep.subr.bf16.mxu0 %v2444_v35 }
  0xed   : > { %1434 = vmatpush1.bf16.msra.mxu0 %v2446_v36 }
  0xee   : > { %1435 = vmatprep.subr.bf16.mxu0 %v2447_v37 }
  0xf1   : > { %1436 = vmatpush1.bf16.msra.mxu0 %v2449_v38 }
  0xf2   : > { %1437 = vmatprep.subr.bf16.mxu0 %v2450_v39 }
  0xf5   : > { %1438 = vmatpush1.bf16.msra.mxu0 %v2452_v40 }
  0xf6   : > { %1439 = vmatprep.subr.bf16.mxu0 %v2453_v41 }
  0xf9   : > { %1440 = vmatpush1.bf16.msra.mxu0 %v2455_v42 }
  0xfa   : > { %1441 = vmatprep.subr.bf16.mxu0 %v2456_v43 }
  0xfd   : > { %1442 = vmatpush1.bf16.msra.mxu0 %v2458_v44 }
  0xfe   : > { %1443 = vmatprep.subr.bf16.mxu0 %v2459_v45 }
 0x101   : > { %1444 = vmatpush1.bf16.msra.mxu0 %v2461_v46 }
 0x102   : > { %1445 = vmatprep.subr.bf16.mxu0 %v2462_v47 }
 0x105   : > { %1446 = vmatpush1.bf16.msra.mxu0 %v2464_v48 }
 0x19d   : > { %v830_v49 = vpop.f32.mrb[0].mxu1 }
 0x19e   : > { %v832_v50 = vpop.f32.mrb[1].mxu1  ;;  %v3115_v62 = vadd.f32 %v830_v49, %v613_v58  ;;  %v2467_v49 = vld [vmem:[#allocation7 + $0x104] ss:$8 sps:$4 sm:$0xff]  }
 0x19f   : > { %v834_v51 = vpop.f32.mrb[2].mxu1  ;;  %v3117_v63 = vadd.f32 %v832_v50, %v617_v59  ;;  %1458 = vmatprep.subr.bf16.mxu0 %v2467_v49 }
 0x1a0   : > { %v836_v52 = vpop.f32.mrb[3].mxu1  ;;  %v3119_v0 = vadd.f32 %v834_v51, %v613_v58  ;;  %v897_v4 = vmul.f32 %v3115_v62, %v3115_v62 }
 0x1a1   : > { %v3121_v1 = vadd.f32 %v836_v52, %v617_v59  ;;  %v898_v5 = vmul.f32 %v3117_v63, %v3117_v63  ;;  %v884_v11 = vadd.f32 %v3117_v63, %v3115_v62 }
 0x1a2   : > { %v901_v6 = vmul.f32 %v3119_v0, %v3119_v0 }
 0x1a3   : > { %v902_v7 = vmul.f32 %v3121_v1, %v3121_v1  ;;  %v889_v12 = vadd.f32 %v3121_v1, %v3119_v0  ;;  %v905_v19 = vadd.f32 %v898_v5, %v897_v4 }
 0x1a5   : > { %v910_v22 = vadd.f32 %v902_v7, %v901_v6 }
 0x1bd   : > { %v873_v8 = vpop.f32.mrb[4].mxu1 }
 0x1be   : > { %v3133_v9 = vadd.f32 %v873_v8, %v621_v2  ;;  %v875_v10 = vpop.f32.mrb[5].mxu1  ;;  %v882_v8 = vld [vmem:[%s3288_s3] sm:$0xf] }
 0x1bf   : > { %v3139_v13 = vadd.f32 %v875_v10, %v625_v3  ;;  %v877_v14 = vpop.f32.mrb[6].mxu1  ;;  %v883_v10 = vld [vmem:[%s3289_s4] sm:$0xf] }
 0x1c0   : > { %v3141_v15 = vadd.f32 %v877_v14, %v621_v2  ;;  %v879_v16 = vpop.f32.mrb[7].mxu1  ;;  %v885_v17 = vadd.f32 %v884_v11, %v3133_v9  ;;  %v899_v18 = vmul.f32 %v3133_v9, %v3133_v9  ;;  %v953_v11 = vrot.slane %v882_v8, %v3111_v60 }
 0x1c1   : > { %v3146_v20 = vadd.f32 %v879_v16, %v625_v3  ;;  %v900_v21 = vmul.f32 %v3139_v13, %v3139_v13  ;;  %v949_v14 = vrot.slane %v882_v8, %v3104_v56  ;;  %v945_v16 = vrot.slane %v882_v8, %v3102_v55 }
 0x1c2   : > { %v903_v23 = vmul.f32 %v3141_v15, %v3141_v15  ;;  %v886_v24 = vadd.f32 %v885_v17, %v3139_v13  ;;  %v906_v25 = vadd.f32 %v905_v19, %v899_v18  ;;  %v890_v26 = vadd.f32 %v889_v12, %v3141_v15 }
 0x1c3   : > { %v904_v28 = vmul.f32 %v3146_v20, %v3146_v20  ;;  %v957_v12 = vrot.slane %v882_v8, %v3113_v61 }
 0x1c4   : > { %887 = vadd.xlane.f32.xlu0 %v886_v24  ;;  %v907_v27 = vadd.f32 %v906_v25, %v900_v21  ;;  %v911_v29 = vadd.f32 %v910_v22, %v903_v23  ;;  %v891_v30 = vadd.f32 %v890_v26, %v3146_v20  ;;  %v978_v23 = vrot.slane %v883_v10, %v3104_v56 }
 0x1c5   : > { %v974_v24 = vrot.slane %v883_v10, %v3102_v55 }
 0x1c6   : > { %908 = vadd.xlane.f32.xlu1 %v907_v27  ;;  %v912_v31 = vadd.f32 %v911_v29, %v904_v28 }
 0x1c8   : > { %892 = vadd.xlane.f32.xlu0 %v891_v30 }
 0x1ca   : > { %913 = vadd.xlane.f32.xlu1 %v912_v31 }
 0x251   : > { %v888_v50 = vpop.xlane.xlu0 %887 }
 0x252   : > { %v895_v51 = vmul.f32 0.001953125, %v888_v50 }
 0x253   : > { %v909_v52 = vpop.xlane.xlu1 %908 }
 0x254   : > { %v915_v53 = vmul.f32 0.001953125, %v909_v52  ;;  %v917_v54 = vmul.f32 %v895_v51, %v895_v51  ;;  %v921_v17 = vsub.f32 %v3115_v62, %v895_v51  ;;  %v923_v18 = vsub.f32 %v3133_v9, %v895_v51 }
 0x255   : > { %v893_v57 = vpop.xlane.xlu0 %892  ;;  %v924_v19 = vsub.f32 %v3139_v13, %v895_v51  ;;  %v922_v21 = vsub.f32 %v3117_v63, %v895_v51  ;;  %v986_v62 = vrot.slane %v883_v10, %v3113_v61  ;;  %v982_v9 = vrot.slane %v883_v10, %v3111_v60  ;;  %v2470_v10 = vld [vmem:[#allocation7 + $0x114] ss:$8 sps:$4 sm:$0xff]  }
 0x256   : > { %v896_v58 = vmul.f32 0.001953125, %v893_v57  ;;  %v919_v59 = vsub.f32 %v915_v53, %v917_v54 }
 0x257   : > { %v914_v2 = vpop.xlane.xlu1 %913 }
 0x258   : > { %v916_v3 = vmul.f32 0.001953125, %v914_v2  ;;  %v929_v4 = vadd.f32 1e-05, %v919_v59  ;;  %v918_v5 = vmul.f32 %v896_v58, %v896_v58  ;;  %v925_v29 = vsub.f32 %v3119_v0, %v896_v58 }
 0x259   : > { %v926_v30 = vsub.f32 %v3121_v1, %v896_v58  ;;  %v927_v34 = vsub.f32 %v3141_v15, %v896_v58  ;;  %v928_v35 = vsub.f32 %v3146_v20, %v896_v58 }
 0x25a   : > { %2537 = vrsqrt.f32 %v929_v4  ;;  %v920_v6 = vsub.f32 %v916_v3, %v918_v5 }
 0x25c   : > { %v930_v7 = vadd.f32 1e-05, %v920_v6  ;;  %v2465_v6 = vld [vmem:[#allocation7 + $0x100] ss:$8 sps:$4 sm:$0xff]  }
 0x25e   : > { %2539 = vrsqrt.f32 %v930_v7 }
 0x264   : > { %v2538_v22 = vpop.eup %2537 }
 0x265   : > { %v934_v25 = vmul.f32 %v2538_v22, %v922_v21  ;;  %v933_v26 = vmul.f32 %v2538_v22, %v921_v17  ;;  %v936_v27 = vmul.f32 %v2538_v22, %v924_v19  ;;  %v935_v28 = vmul.f32 %v2538_v22, %v923_v18  ;;  %v2471_v17 = vld [vmem:[#allocation7 + $0x120] ss:$8 sps:$4 sm:$0xff]   ;;  %v2476_v18 = vld [vmem:[#allocation7 + $0x134] ss:$8 sps:$4 sm:$0xff]   ;;  %v2474_v19 = vld [vmem:[#allocation7 + $0x130] ss:$8 sps:$4 sm:$0xff]  }
 0x266   : > { %v2479_v21 = vld [vmem:[#allocation7 + $0x144] ss:$8 sps:$4 sm:$0xff]   ;;  %v2477_v22 = vld [vmem:[#allocation7 + $0x140] ss:$8 sps:$4 sm:$0xff]  }
 0x267   : > { %v963_v13 = vmul.f32 %v949_v14, %v934_v25  ;;  %v962_v31 = vmul.f32 %v945_v16, %v933_v26  ;;  %v965_v63 = vmul.f32 %v957_v12, %v936_v27  ;;  %v964_v32 = vmul.f32 %v953_v11, %v935_v28  ;;  %v2485_v25 = vld [vmem:[#allocation7 + $0x164] ss:$8 sps:$4 sm:$0xff]   ;;  %v2483_v26 = vld [vmem:[#allocation7 + $0x160] ss:$8 sps:$4 sm:$0xff]   ;;  %v2488_v27 = vld [vmem:[#allocation7 + $0x174] ss:$8 sps:$4 sm:$0xff]  }
 0x268   : > { %v2540_v33 = vpop.eup %2539  ;;  %v2486_v28 = vld [vmem:[#allocation7 + $0x170] ss:$8 sps:$4 sm:$0xff]  }
 0x269   : > { %v938_v36 = vmul.f32 %v2540_v33, %v926_v30  ;;  %v992_v37 = vadd.f32 %v978_v23, %v963_v13  ;;  %v937_v38 = vmul.f32 %v2540_v33, %v925_v29  ;;  %v991_v39 = vadd.f32 %v974_v24, %v962_v31  ;;  %v2491_v29 = vld [vmem:[#allocation7 + $0x184] ss:$8 sps:$4 sm:$0xff]   ;;  %v2489_v30 = vld [vmem:[#allocation7 + $0x180] ss:$8 sps:$4 sm:$0xff]  }
 0x26a   : > { %v940_v0 = vmul.f32 %v2540_v33, %v928_v35  ;;  %v939_v40 = vmul.f32 %v2540_v33, %v927_v34  ;;  %v993_v1 = vadd.f32 %v982_v9, %v964_v32  ;;  %v994_v42 = vadd.f32 %v986_v62, %v965_v63  ;;  %v2497_v13 = vld [vmem:[#allocation7 + $0x1a4] ss:$8 sps:$4 sm:$0xff]   ;;  %v2495_v31 = vld [vmem:[#allocation7 + $0x1a0] ss:$8 sps:$4 sm:$0xff]   ;;  %v2500_v63 = vld [vmem:[#allocation7 + $0x1b4] ss:$8 sps:$4 sm:$0xff]  }
 0x26b   : > { %v967_v41 = vmul.f32 %v949_v14, %v938_v36  ;;  %v966_v61 = vmul.f32 %v945_v16, %v937_v38  ;;  %v1000_v45 = vmul.f32 0.2, %v992_v37  ;;  %v999_v47 = vmul.f32 0.2, %v991_v39  ;;  %v2468_v14 = vld [vmem:[#allocation7 + $0x110] ss:$8 sps:$4 sm:$0xff]  }
 0x26c   : > { %v969_v60 = vmul.f32 %v957_v12, %v940_v0  ;;  %v968_v43 = vmul.f32 %v953_v11, %v939_v40  ;;  %v1001_v49 = vmul.f32 0.2, %v993_v1  ;;  %v1002_v51 = vmul.f32 0.2, %v994_v42  ;;  %v2473_v16 = vld [vmem:[#allocation7 + $0x124] ss:$8 sps:$4 sm:$0xff]  }
 0x26d   : > { %v996_v44 = vadd.f32 %v978_v23, %v967_v41  ;;  %v995_v46 = vadd.f32 %v974_v24, %v966_v61  ;;  %v1008_v54 = vmax.f32 %v992_v37, %v1000_v45  ;;  %v1007_v58 = vmax.f32 %v991_v39, %v999_v47  ;;  %v2482_v23 = vld [vmem:[#allocation7 + $0x154] ss:$8 sps:$4 sm:$0xff]   ;;  %v2480_v24 = vld [vmem:[#allocation7 + $0x150] ss:$8 sps:$4 sm:$0xff]   ;;  %v2503_v33 = vld [vmem:[#allocation7 + $0x1c4] ss:$8 sps:$4 sm:$0xff]  }
 0x26e   : > { %v998_v48 = vadd.f32 %v986_v62, %v969_v60  ;;  %v997_v15 = vadd.f32 %v982_v9, %v968_v43  ;;  %v1009_v3 = vmax.f32 %v993_v1, %v1001_v49  ;;  %v1010_v8 = vmax.f32 %v994_v42, %v1002_v51  ;;  %v2494_v62 = vld [vmem:[#allocation7 + $0x194] ss:$8 sps:$4 sm:$0xff]   ;;  %v2492_v9 = vld [vmem:[#allocation7 + $0x190] ss:$8 sps:$4 sm:$0xff]   ;;  %v2501_v34 = vld [vmem:[#allocation7 + $0x1c0] ss:$8 sps:$4 sm:$0xff]  }
 0x26f   : > { %v1004_v20 = vmul.f32 0.2, %v996_v44  ;;  %v1003_v50 = vmul.f32 0.2, %v995_v46  ;;  %v2498_v32 = vld [vmem:[#allocation7 + $0x1b0] ss:$8 sps:$4 sm:$0xff]  }
 0x270   : > { %v1006_v52 = vmul.f32 0.2, %v998_v48  ;;  %v1005_v53 = vmul.f32 0.2, %v997_v15  ;;  %v2506_v35 = vld [vmem:[#allocation7 + $0x1d4] ss:$8 sps:$4 sm:$0xff]  }
 0x271   : > { %v1012_v57 = vmax.f32 %v996_v44, %v1004_v20  ;;  %v1011_v59 = vmax.f32 %v995_v46, %v1003_v50  ;;  %v2504_v36 = vld [vmem:[#allocation7 + $0x1d0] ss:$8 sps:$4 sm:$0xff]   ;;  %v2509_v37 = vld [vmem:[#allocation7 + $0x1e4] ss:$8 sps:$4 sm:$0xff]   ;;  %v2507_v38 = vld [vmem:[#allocation7 + $0x1e0] ss:$8 sps:$4 sm:$0xff]  }
 0x272   : > { %v1014_v2 = vmax.f32 %v998_v48, %v1006_v52  ;;  %v1013_v4 = vmax.f32 %v997_v15, %v1005_v53  ;;  %v2512_v39 = vld [vmem:[#allocation7 + $0x1f4] ss:$8 sps:$4 sm:$0xff]   ;;  %v2510_v0 = vld [vmem:[#allocation7 + $0x1f0] ss:$8 sps:$4 sm:$0xff]  }
 0x273   : > { %v1016_v5 = vpack.c.bf16 %v1012_v57, %v1008_v54  ;;  %v1015_v7 = vpack.c.bf16 %v1011_v59, %v1007_v58  ;;  %v1083_v40 = vld [vmem:[%s3291_s6] sm:$0x3]  ;;  %v2513_v54 = vld [vmem:[#allocation8 + $0x40] sm:$0xff]   ;;  %v2515_v58 = vld [vmem:[#allocation8 + $0x48] sm:$0xff]  }
 0x274   : > { %v3179_v11 = vpack.c.bf16 %v1013_v4, %v1009_v3  ;;  %v1018_v12 = vpack.c.bf16 %v1014_v2, %v1010_v8  ;;  %v1088_v1 = vrot.slane %v1083_v40, %v3102_v55  ;;  %v1092_v41 = vrot.slane %v1083_v40, %v3104_v56  ;;  %v2514_v57 = vld [vmem:[#allocation8] sm:$0xff]   ;;  %2211 = vmatprep.subr.bf16.mxu1 %v2513_v54  ;;  %v2516_v59 = vld [vmem:[#allocation8 + $0x8] sm:$0xff]   ;;  %v2517_v2 = vld [vmem:[#allocation8 + $0x50] sm:$0xff]  }
 0x275   : > { %1447 = vmatprep.mubr.bf16.mxu0 %v1016_v5  ;;  %2212 = vmatpush3.bf16.msra.mxu1 %v2514_v57  ;;  %v2518_v3 = vld [vmem:[#allocation8 + $0x10] sm:$0xff]   ;;  %v2519_v4 = vld [vmem:[#allocation8 + $0x58] sm:$0xff]   ;;  %v2523_v8 = vld [vmem:[#allocation8 + $0x68] sm:$0xff]  }
 0x276   : > { %1448 = vmatmul.mubr.bf16.vlgmr.msra.gmra.mrb[0].mxu0 %v1015_v7  ;;  %2213 = vmatprep.subr.bf16.mxu1 %v2515_v58  ;;  %v2520_v5 = vld [vmem:[#allocation8 + $0x18] sm:$0xff]   ;;  %v2522_v7 = vld [vmem:[#allocation8 + $0x20] sm:$0xff]   ;;  %v2167_v57 = vld [vmem:[%s3338_s11] ss:$0 sm:$0xff] }
 0x277   : > { %1459 = vmatpush1.bf16.msra.mxu0 %v2465_v6  ;;  %1490 = vmatprep.mubr.bf16.mxu0 %v1018_v12  ;;  %v2521_v6 = vld [vmem:[#allocation8 + $0x60] sm:$0xff]   ;;  %v2526_v12 = vld [vmem:[#allocation8 + $0x30] sm:$0xff]  }
 0x278   : > { %1460 = vmatprep.subr.bf16.mxu0 %v2470_v10  ;;  %v2524_v10 = vld [vmem:[#allocation8 + $0x28] sm:$0xff]  }
 0x279   : > { %2214 = vmatpush3.bf16.msra.mxu1 %v2516_v59 }
 0x27a   : > { %2215 = vmatprep.subr.bf16.mxu1 %v2517_v2 }
 0x27b   : > { %1461 = vmatpush1.bf16.msra.mxu0 %v2468_v14  ;;  %v2527_v14 = vld [vmem:[#allocation8 + $0x78] sm:$0xff]  }
 0x27c   : > { %1462 = vmatprep.subr.bf16.mxu0 %v2473_v16  ;;  %v2528_v16 = vld [vmem:[#allocation8 + $0x38] sm:$0xff]  }
 0x27d   : > { %2216 = vmatpush3.bf16.msra.mxu1 %v2518_v3 }
 0x27e   : > { %2217 = vmatprep.subr.bf16.mxu1 %v2519_v4 }
 0x27f   : > { %1463 = vmatpush1.bf16.msra.mxu0 %v2471_v17 }
 0x280   : > { %1464 = vmatprep.subr.bf16.mxu0 %v2476_v18 }
 0x281   : > { %2218 = vmatpush3.bf16.msra.mxu1 %v2520_v5 }
 0x282   : > { %2219 = vmatprep.subr.bf16.mxu1 %v2521_v6 }
 0x283   : > { %1465 = vmatpush1.bf16.msra.mxu0 %v2474_v19 }
 0x284   : > { %1466 = vmatprep.subr.bf16.mxu0 %v2479_v21 }
 0x285   : > { %2220 = vmatpush3.bf16.msra.mxu1 %v2522_v7 }
 0x286   : > { %2221 = vmatprep.subr.bf16.mxu1 %v2523_v8 }
 0x287   : > { %1467 = vmatpush1.bf16.msra.mxu0 %v2477_v22 }
 0x288   : > { %1468 = vmatprep.subr.bf16.mxu0 %v2482_v23 }
 0x289   : > { %2222 = vmatpush3.bf16.msra.mxu1 %v2524_v10  ;;  %v2529_v10 = vld [vmem:[#allocation10] sm:$0xff]  }
 0x28b   : > { %1469 = vmatpush1.bf16.msra.mxu0 %v2480_v24 }
 0x28c   : > { %1470 = vmatprep.subr.bf16.mxu0 %v2485_v25 }
 0x28f   : > { %1471 = vmatpush1.bf16.msra.mxu0 %v2483_v26 }
 0x290   : > { %1472 = vmatprep.subr.bf16.mxu0 %v2488_v27 }
 0x293   : > { %1473 = vmatpush1.bf16.msra.mxu0 %v2486_v28 }
 0x294   : > { %1474 = vmatprep.subr.bf16.mxu0 %v2491_v29 }
 0x297   : > { %1475 = vmatpush1.bf16.msra.mxu0 %v2489_v30 }
 0x298   : > { %1476 = vmatprep.subr.bf16.mxu0 %v2494_v62 }
 0x29b   : > { %1477 = vmatpush1.bf16.msra.mxu0 %v2492_v9  ;;  %v1501_v9 = vld [vmem:[%s3292_s7] sm:$0x3] }
 0x29c   : > { %1478 = vmatprep.subr.bf16.mxu0 %v2497_v13  ;;  %v1502_v13 = vld [vmem:[%s3337_s8] sm:$0x3]  ;;  %s570_s8 = scalar_lea.vmem [#allocation11], %s2064_s18  ;;  %s1929_s18 = scalar_lea.sflag [#allocation4], %s3081_s1 }
 0x29d   : > { %s1942_s24 = sshll.u32 %s570_s8, 4  ;;  %s3236_s24 = int_to_ptr.vmem [resolvable:$true] %s1942_s24 }
 0x29e   : > { %s2691_s29 = scalar_lea.vmem %s3236_s24, 128  ;;  %p2698_p12 = scmp.lt.s32.totalorder %s3236_s24, %s2696_s27 }
 0x29f   : > { %1479 = vmatpush1.bf16.msra.mxu0 %v2495_v31  ;;  %p2692_p3 = scmp.ne.s32.totalorder %s3236_s24, %s2691_s29 }
 0x2a0   : > { %1480 = vmatprep.subr.bf16.mxu0 %v2500_v63 }
 0x2a1   : > { %p2693_p5 = pnand %p2692_p3, %p3026_p10 }
 0x2a3   : > { %1481 = vmatpush1.bf16.msra.mxu0 %v2498_v32  ;;  %v1544_v32 = vrot.slane %v1501_v9, %v3102_v55  ;;  %p2694_p7 = pneg %p2693_p5 }
 0x2a4   : > { %1482 = vmatprep.subr.bf16.mxu0 %v2503_v33  ;;  %v1548_v33 = vrot.slane %v1501_v9, %v3104_v56 }
 0x2a7   : > { %1483 = vmatpush1.bf16.msra.mxu0 %v2501_v34 }
 0x2a8   : > { %1484 = vmatprep.subr.bf16.mxu0 %v2506_v35  ;;  %v1559_v35 = vrot.slane %v1502_v13, %v3102_v55 }
 0x2ab   : > { %1485 = vmatpush1.bf16.msra.mxu0 %v2504_v36  ;;  %v1563_v36 = vrot.slane %v1502_v13, %v3104_v56 }
 0x2ac   : > { %1486 = vmatprep.subr.bf16.mxu0 %v2509_v37 }
 0x2af   : > { %1487 = vmatpush1.bf16.msra.mxu0 %v2507_v38 }
 0x2b0   : > { %1488 = vmatprep.subr.bf16.mxu0 %v2512_v39 }
 0x2b3   : > { %1489 = vmatpush1.bf16.msra.mxu0 %v2510_v0 }
 0x2b6   : > { %1491 = vmatmul.mubr.bf16.vlgmr.msra.gmra.mrb[0].mxu0 %v3179_v11  ;;  %v2525_v11 = vld [vmem:[#allocation8 + $0x70] sm:$0xff]  }
 0x2b7   : > { %2223 = vmatprep.subr.bf16.mxu1 %v2525_v11  ;;  %v2779_v11 = vmov 0.0  }
 0x2b8   : > { %2224 = vmatpush3.bf16.msra.mxu1 %v2526_v12  ;;  %v2530_v12 = vld [vmem:[#allocation10 + $0x8] sm:$0xff]  }
 0x2b9   : > { %2225 = vmatprep.subr.bf16.mxu1 %v2527_v14  ;;  %v2531_v14 = vld [vmem:[#allocation10 + $0x10] sm:$0xff]  }
 0x2bc   : > { %2226 = vmatpush3.bf16.msra.mxu1 %v2528_v16  ;;  %v2532_v16 = vld [vmem:[#allocation10 + $0x18] sm:$0xff]  }
 0x2bd   : > { %2242 = vmatprep.subr.bf16.mxu1 %v2779_v11 }
 0x389   : > { %v1492_v61 = vpop.f32.mrb[0].mxu0 }
 0x38a   : > { %v3187_v42 = vadd.f32 %v1492_v61, %v1088_v1  ;;  %v1494_v60 = vpop.f32.mrb[1].mxu0 }
 0x38b   : > { %v3189_v43 = vadd.f32 %v1494_v60, %v1092_v41  ;;  %v1496_v44 = vpop.f32.mrb[2].mxu0 }
 0x38c   : > { %v3191_v45 = vadd.f32 %v1496_v44, %v1088_v1  ;;  %v1498_v46 = vpop.f32.mrb[3].mxu0  ;;  %v1512_v15 = vmul.f32 %v3187_v42, %v3187_v42 }
 0x38d   : > { %v3193_v47 = vadd.f32 %v1498_v46, %v1092_v41  ;;  %v1503_v48 = vadd.f32 %v3189_v43, %v3187_v42  ;;  %v1513_v49 = vmul.f32 %v3189_v43, %v3189_v43 }
 0x38e   : > { %v1514_v50 = vmul.f32 %v3191_v45, %v3191_v45 }
 0x38f   : > { %1504 = vadd.xlane.f32.xlu0 %v1503_v48  ;;  %v1506_v20 = vadd.f32 %v3193_v47, %v3191_v45  ;;  %v1515_v51 = vmul.f32 %v3193_v47, %v3193_v47  ;;  %v1516_v52 = vadd.f32 %v1513_v49, %v1512_v15 }
 0x391   : > { %1507 = vadd.xlane.f32.xlu1 %v1506_v20  ;;  %v1519_v53 = vadd.f32 %v1515_v51, %v1514_v50 }
 0x393   : > { %1517 = vadd.xlane.f32.xlu0 %v1516_v52 }
 0x395   : > { %1520 = vadd.xlane.f32.xlu1 %v1519_v53 }
 0x41c   : > { %v1505_v17 = vpop.xlane.xlu0 %1504 }
 0x41d   : > { %v1510_v18 = vmul.f32 0.00390625, %v1505_v17  ;;  %v2533_v17 = vld [vmem:[#allocation10 + $0x20] sm:$0xff]  }
 0x41e   : > { %v1508_v19 = vpop.xlane.xlu1 %1507 }
 0x41f   : > { %v1511_v21 = vmul.f32 0.00390625, %v1508_v19  ;;  %v1524_v23 = vmul.f32 %v1510_v18, %v1510_v18  ;;  %v1528_v31 = vsub.f32 %v3187_v42, %v1510_v18  ;;  %v1529_v63 = vsub.f32 %v3189_v43, %v1510_v18  ;;  %v2534_v18 = vld [vmem:[#allocation10 + $0x28] sm:$0xff]   ;;  %v2535_v19 = vld [vmem:[#allocation10 + $0x30] sm:$0xff]  }
 0x420   : > { %v1518_v22 = vpop.xlane.xlu0 %1517 }
 0x421   : > { %v1522_v24 = vmul.f32 0.00390625, %v1518_v22  ;;  %v1525_v27 = vmul.f32 %v1511_v21, %v1511_v21  ;;  %v1530_v37 = vsub.f32 %v3191_v45, %v1511_v21  ;;  %v1531_v38 = vsub.f32 %v3193_v47, %v1511_v21  ;;  %v2536_v21 = vld [vmem:[#allocation10 + $0x38] sm:$0xff]  }
 0x422   : > { %v1521_v25 = vpop.xlane.xlu1 %1520 }
 0x423   : > { %v1526_v26 = vsub.f32 %v1522_v24, %v1524_v23  ;;  %v1523_v28 = vmul.f32 0.00390625, %v1521_v25 }
 0x425   : > { %v1532_v29 = vadd.f32 1e-05, %v1526_v26  ;;  %v1527_v30 = vsub.f32 %v1523_v28, %v1525_v27 }
 0x427   : > { %2541 = vrsqrt.f32 %v1532_v29  ;;  %v1533_v62 = vadd.f32 1e-05, %v1527_v30 }
 0x429   : > { %2543 = vrsqrt.f32 %v1533_v62 }
 0x431   : > { %v2542_v34 = vpop.eup %2541 }
 0x432   : > { %v1536_v39 = vmul.f32 %v2542_v34, %v1528_v31  ;;  %v1537_v0 = vmul.f32 %v2542_v34, %v1529_v63  ;;  %v2184_v34 = vld [vmem:[%s3339_s10] ss:$0 sm:$0xff]  ;;  %s3241_s10 = scalar_lea.hbm %s3342_s16, %s2205_s26 }
 0x433   : > { %v2544_v40 = vpop.eup %2543 }
 0x434   : > { %v1538_v1 = vmul.f32 %v2544_v40, %v1530_v37  ;;  %v1539_v41 = vmul.f32 %v2544_v40, %v1531_v38  ;;  %v1552_v61 = vmul.f32 %v1548_v33, %v1537_v0  ;;  %v1551_v42 = vmul.f32 %v1544_v32, %v1536_v39  ;;  %v2185_v38 = vld [vmem:[%s3340_s30] ss:$0 sm:$0xff]  ;;  %s2697_s30 = scalar_lea.vmem %s2696_s27, 256 }
 0x435   : > { %p2699_p2 = scmp.lt.s32.totalorder %s2697_s30, %s2691_s29 }
 0x436   : > { %v1554_v60 = vmul.f32 %v1548_v33, %v1539_v41  ;;  %v1567_v43 = vadd.f32 %v1563_v36, %v1552_v61  ;;  %v1553_v44 = vmul.f32 %v1544_v32, %v1538_v1  ;;  %v1566_v46 = vadd.f32 %v1559_v35, %v1551_v42 }
 0x437   : > { %p2700_p1 = por %p2699_p2, %p2698_p12 }
 0x438   : > { %v1569_v48 = vadd.f32 %v1563_v36, %v1554_v60  ;;  %v1571_v15 = vmul.f32 0.2, %v1567_v43  ;;  %v1568_v55 = vadd.f32 %v1559_v35, %v1553_v44  ;;  %v1570_v49 = vmul.f32 0.2, %v1566_v46 }
 0x439   : > { %p2701_p13 = pnand %p2700_p1, %p2694_p7 }
 0x43a   : > { %v1573_v56 = vmul.f32 0.2, %v1569_v48  ;;  %v1572_v20 = vmul.f32 0.2, %v1568_v55  ;;  %v1575_v45 = vmax.f32 %v1567_v43, %v1571_v15  ;;  %v1574_v47 = vmax.f32 %v1566_v46, %v1570_v49  ;;  %v2186_v46 = vld [vmem:[%s3341_s14] ss:$0 sm:$0xff] }
 0x43c   : > { %v1577_v50 = vmax.f32 %v1569_v48, %v1573_v56  ;;  %v1576_v51 = vmax.f32 %v1568_v55, %v1572_v20 }
 0x43e   : > { %v1579_v52 = vpack.c.bf16 %v1577_v50, %v1575_v45  ;;  %v1578_v53 = vpack.c.bf16 %v1576_v51, %v1574_v47 }
 0x440   : > { %1747 = vmatprep.mubr.bf16.mxu1 %v1579_v52 }
 0x441   : > { %1748 = vmatmul.mubr.bf16.vlgmr.msra.gmra.mrb[8].mxu1 %v1578_v53 }
 0x442   : > { %2243 = vmatpush3.bf16.msra.mxu1 %v2529_v10  ;;  %2258 = vmatprep.mubr.msk.bf16.mxu1 %vm2780_vm0, %v2779_v11 }
 0x443   : > { %2244 = vmatprep.subr.bf16.mxu1 %v2779_v11 }
 0x446   : > { %2245 = vmatpush3.bf16.msra.mxu1 %v2530_v12 }
 0x447   : > { %2246 = vmatprep.subr.bf16.mxu1 %v2779_v11 }
 0x44a   : > { %2247 = vmatpush3.bf16.msra.mxu1 %v2531_v14 }
 0x44b   : > { %2248 = vmatprep.subr.bf16.mxu1 %v2779_v11 }
 0x44e   : > { %2249 = vmatpush3.bf16.msra.mxu1 %v2532_v16 }
 0x44f   : > { %2250 = vmatprep.subr.bf16.mxu1 %v2779_v11 }
 0x452   : > { %2251 = vmatpush3.bf16.msra.mxu1 %v2533_v17 }
 0x453   : > { %2252 = vmatprep.subr.bf16.mxu1 %v2779_v11 }
 0x456   : > { %2253 = vmatpush3.bf16.msra.mxu1 %v2534_v18 }
 0x457   : > { %2254 = vmatprep.subr.bf16.mxu1 %v2779_v11 }
 0x45a   : > { %2255 = vmatpush3.bf16.msra.mxu1 %v2535_v19 }
 0x45b   : > { %2256 = vmatprep.subr.bf16.mxu1 %v2779_v11 }
 0x45e   : > { %2257 = vmatpush3.bf16.msra.mxu1 %v2536_v21 }
 0x514   : > { %v2227_v54 = vpop.f32.mrb[8].mxu1 }
 0x515   : > { %v2228_v58 = vpop.f32.mrb[9].mxu1 }
 0x516   : > { %v2229_v59 = vadd.f32 %v2228_v58, %v2227_v54  ;;  %v2230_v2 = vpop.f32.mrb[10].mxu1 }
 0x517   : > { %v2231_v3 = vpop.f32.mrb[11].mxu1 }
 0x518   : > { %v1750_v4 = vadd.f32 %v2229_v59, %v2167_v57  ;;  %v2232_v5 = vadd.f32 %v2231_v3, %v2230_v2 }
 0x51a   : > { %v1753_v6 = vadd.f32 %v2232_v5, %v2167_v57  ;;  %1758 = vadd.xlane.f32.xlu0 %v1750_v4  ;;  %v1765_v7 = vmul.f32 %v1750_v4, %v1750_v4 }
 0x51c   : > { %1760 = vadd.xlane.f32.xlu1 %v1753_v6  ;;  %v1766_v8 = vmul.f32 %v1753_v6, %v1753_v6 }
 0x51e   : > { %1767 = vadd.xlane.f32.xlu0 %v1765_v7 }
 0x520   : > { %1769 = vadd.xlane.f32.xlu1 %v1766_v8 }
 0x5a7   : > { %v1759_v22 = vpop.xlane.xlu0 %1758 }
 0x5a8   : > { %v1763_v23 = vmul.f32 0.0078125, %v1759_v22 }
 0x5a9   : > { %v1761_v24 = vpop.xlane.xlu1 %1760 }
 0x5aa   : > { %v1764_v25 = vmul.f32 0.0078125, %v1761_v24  ;;  %v1773_v27 = vmul.f32 %v1763_v23, %v1763_v23  ;;  %v1777_v32 = vsub.f32 %v1750_v4, %v1763_v23 }
 0x5ab   : > { %v1768_v26 = vpop.xlane.xlu0 %1767 }
 0x5ac   : > { %v1771_v28 = vmul.f32 0.0078125, %v1768_v26  ;;  %v1774_v30 = vmul.f32 %v1764_v25, %v1764_v25  ;;  %v1778_v35 = vsub.f32 %v1753_v6, %v1764_v25 }
 0x5ad   : > { %v1770_v29 = vpop.xlane.xlu1 %1769 }
 0x5ae   : > { %v1775_v62 = vsub.f32 %v1771_v28, %v1773_v27  ;;  %v1772_v9 = vmul.f32 0.0078125, %v1770_v29 }
 0x5b0   : > { %v1779_v13 = vadd.f32 1e-05, %v1775_v62  ;;  %v1776_v31 = vsub.f32 %v1772_v9, %v1774_v30 }
 0x5b2   : > { %2545 = vrsqrt.f32 %v1779_v13  ;;  %v1780_v63 = vadd.f32 1e-05, %v1776_v31 }
 0x5b4   : > { %2547 = vrsqrt.f32 %v1780_v63 }
 0x5bc   : > { %v2546_v33 = vpop.eup %2545 }
 0x5bd   : > { %v1783_v36 = vmul.f32 %v2546_v33, %v1777_v32 }
 0x5be   : > { %v2548_v37 = vpop.eup %2547 }
 0x5bf   : > { %v1784_v39 = vmul.f32 %v2548_v37, %v1778_v35  ;;  %v1791_v0 = vmul.f32 %v2184_v34, %v1783_v36 }
 0x5c1   : > { %v1792_v40 = vmul.f32 %v2184_v34, %v1784_v39  ;;  %v1799_v1 = vadd.f32 %v2185_v38, %v1791_v0 }
 0x5c3   : > { %v1800_v41 = vadd.f32 %v2185_v38, %v1792_v40  ;;  %v1801_v61 = vmul.f32 0.2, %v1799_v1 }
 0x5c5   : > { %v1802_v42 = vmul.f32 0.2, %v1800_v41  ;;  %v1803_v60 = vmax.f32 %v1799_v1, %v1801_v61 }
 0x5c7   : > { %v1804_v43 = vmax.f32 %v1800_v41, %v1802_v42 }
 0x5c9   : > { %v1805_v44 = vpack.c.bf16 %v1804_v43, %v1803_v60 }
 0x5cb   : > { %2259 = vmatmul.mubr.bf16.vlgmr.msra.gmra.mrb[12].mxu1 %v1805_v44 }
 0x69e   : > { %v1911_v48 = vpop.f32.mrb[12].mxu1 }
 0x69f   : > { %v2260_v15 = vpop.f32.mrb[13].mxu1  ;;  %v1912_v49 = vadd.f32 %v2186_v46, %v1911_v48 }
 0x6a0   : > { %v1914_v55 = vpop.f32.mrb[14].mxu1 }
 0x6a1   : > { %v1915_v56 = vadd.f32 %v2186_v46, %v1914_v55  ;;  %v2261_v20 = vpop.f32.mrb[15].mxu1 }
 0x6a3   : > { %v2209_v45 = vpack.c.bf16 %v1915_v56, %v1912_v49 }
 0x6a5   : > { %2210 = vst [vmem:[%s570_s8] sm:$0xff] %v2209_v45  }
 0x6a6   : > { %2704 = shalt.err (!%p2701_p13)
}
 0x6a7   : > { %s2705_s23 = scalar_lea.hbm %s3241_s10, 128  ;;  %s2709_s8 = scalar_lea.hbm %s3342_s16, 256 }
 0x6a8   : > { %p2706_p9 = scmp.ne.s32.totalorder %s3241_s10, %s2705_s23  ;;  %p2710_p4 = scmp.lt.u32.totalorder %s3241_s10, %s3342_s16 }
 0x6a9   : > { %p2711_p8 = scmp.lt.u32.totalorder %s2709_s8, %s2705_s23  ;;  %p2713_p3 = scmp.lt.u32.totalorder %s2705_s23, %s3241_s10 }
 0x6aa   : > { %p2707_p0 = pnand %p2706_p9, %p3026_p10 }
 0x6ab   : > { %p2712_p6 = por %p2711_p8, %p2710_p4 }
 0x6ac   : > { %p2708_p11 = pneg %p2707_p0 }
 0x6ad   : > { %p2714_p5 = por %p2713_p3, %p2712_p6 }
 0x6af   : > { %p2715_p7 = pnand %p2714_p5, %p2708_p11 }
 0x6b1   : > { %2718 = shalt.err (!%p2715_p7)
}
 0x6b2   : > { %s2782_s12 = smov 64   ;;  %s2783_s29 = smov 4  }
 0x6b3   : > { %2288 = dma.vmem_to_hbm [thread:$0]  (%p3026_p10), %s3236_s24, 128, %s3241_s10, %s1929_s18, %s2782_s12, %s2782_s12, %s2783_s29  }
 0x6b4 PF: > { %s3343_s22 = sld [smem:[#allocation16_spill]]  ;;  %s3344_s27 = sld [smem:[#allocation17_spill]] }
 0x6b5   : > { %p3346_p2 = scmp.ge.s32.totalorder %s2765_s21, 2 }
 0x6ba   : > { %s1957_s30 = sand.u32 1, %s3343_s22   ;;  %p3345_p12 = scmp.ne.s32.totalorder %s3344_s27, 0 }
 0x6bb   : > { %s1958_s23 = scalar_lea.sflag [#allocation4], %s1957_s30 }
 0x6bc   : > { %p2308_p1 = pnand %p3346_p2, %p3345_p12 }
 0x6be   : > { %2748 = dma.done.wait (!%p2308_p1), %s1958_s23, 128  }
 0x6bf   : > { %2750 = vsyncadd (!%p2308_p1), %s1958_s23, 4294967168  ;;  %p30_p13 = scmp.ge.s32.totalorder %s3016_s15, 4   ;;  %s3347_s18 = smov %s2757_s19 }
 0x6c0   : > { %s3348_s19 = smov %s2761_s20  ;;  %s3349_s20 = smov %s3032_s25 }
 0x6c1   : > { %s3350_s21 = smov %s3016_s15  ;;  %32 = sbr.rel (!%p30_p13) target bundleno = 15 (0xf), region = 141 }
 0x6c8   :  { %1963 = vsyncpa [#allocation3], 1 }
 0x6c9   :  { %1965 = vsyncpa [#allocation3 + $0x1], 1 }
 0x6ca   :  { %1966 = vsyncpa [#allocation6], 1 }
 0x6cb   :  { %1967 = vsyncpa [#allocation9], 1 }
 0x6cc   :  { %1968 = vsyncpa [#allocation4], 1 }
 0x6cd   :  { %1970 = vsyncpa [#allocation4 + $0x1], 1 }

</bundles_post_ra>
